<compile_context>
chip_gen: v7x
topology: tpu7x:2x2x1
jax: 0.10.0
libtpu: 0.0.40
codegen_flags: <defaults>
</compile_context>

<pallas_src>
import jax
import jax.numpy as jnp
from jax.experimental import pallas as pl
from jax.experimental.pallas import tpu as pltpu


# ----------------------------- Pallas kernels ------------------------------

def _fused_embed_kernel(x_ref, w_ref, b_ref, o_ref):
    # (B*T, F)bf16 @ (F, Npad)bf16 + (1, Npad)f32 -> (B*T, Npad)f32
    o_ref[...] = (jnp.dot(x_ref[...], w_ref[...],
                          preferred_element_type=jnp.float32) + b_ref[...])


def pallas_fused_embed(x_bf16, w_bf16, b_f32):
    """Single-block fused block-diagonal embedding matmul (lane-dense output)."""
    M = x_bf16.shape[0]
    N = w_bf16.shape[1]
    return pl.pallas_call(
        _fused_embed_kernel,
        out_shape=jax.ShapeDtypeStruct((M, N), jnp.float32),
    )(x_bf16, w_bf16, b_f32)


def _lstm_attn_pool_kernel(x_ref, wih_ref, whh_ref, bl_ref,
                           wq_ref, wk_ref, wv_ref, bq_ref, bk_ref, bv_ref,
                           o_ref, hseq_scr):
    """Fused: LSTM over time (h0=c0=0, PyTorch gate order i,f,g,o)
    -> self-attention (softmax(QK^T/sqrt(D)) V) -> mean-pool over time."""
    T, B, _ = x_ref.shape
    L = whh_ref.shape[0]

    wih = wih_ref[...]            # (L, 4L) bf16
    whh = whh_ref[...]            # (L, 4L) bf16
    bl = bl_ref[...]              # (1, 4L) f32  (= b_ih + b_hh)

    h = jnp.zeros((B, L), jnp.float32)
    c = jnp.zeros((B, L), jnp.float32)
    # T is small & static -> fully unrolled; every index below is static.
    for t in range(T):
        gates = (jnp.dot(x_ref[t], wih, preferred_element_type=jnp.float32)
                 + jnp.dot(h.astype(jnp.bfloat16), whh,
                           preferred_element_type=jnp.float32)
                 + bl)                                   # (B, 4L) f32
        i_g = jax.nn.sigmoid(gates[:, 0 * L:1 * L])
        f_g = jax.nn.sigmoid(gates[:, 1 * L:2 * L])
        g_g = jnp.tanh(gates[:, 2 * L:3 * L])
        o_g = jax.nn.sigmoid(gates[:, 3 * L:4 * L])
        c = f_g * c + i_g * g_g
        h = o_g * jnp.tanh(c)
        hseq_scr[:, t:t + 1, :] = h[:, None, :]          # (B, T, L) VMEM scratch

    wq = wq_ref[...]; wk = wk_ref[...]; wv = wv_ref[...]      # (L, L) bf16
    bq = bq_ref[...]; bk = bk_ref[...]; bv = bv_ref[...]      # (1, L) f32
    scale = 1.0 / (L ** 0.5)
    inv_t = 1.0 / T
    dn = (((1,), (1,)), ((), ()))     # contract last dims: q @ k^T, no transpose

    rows = []
    for b in range(B):                # B small & static -> unrolled, no grid cost
        xb = hseq_scr[b].astype(jnp.bfloat16)                 # (T, L)
        q = jnp.dot(xb, wq, preferred_element_type=jnp.float32) + bq
        k = jnp.dot(xb, wk, preferred_element_type=jnp.float32) + bk
        v = jnp.dot(xb, wv, preferred_element_type=jnp.float32) + bv
        s = jax.lax.dot_general((q * scale).astype(jnp.bfloat16),
                                k.astype(jnp.bfloat16), dn,
                                preferred_element_type=jnp.float32)  # (T, T)
        s = s - jnp.max(s, axis=-1, keepdims=True)            # stable softmax
        p = jnp.exp(s)
        p = p * pl.reciprocal(jnp.sum(p, axis=-1, keepdims=True), approx=True)
        ob = jnp.dot(p.astype(jnp.bfloat16), v.astype(jnp.bfloat16),
                     preferred_element_type=jnp.float32)       # (T, L)
        rows.append(jnp.sum(ob, axis=0, keepdims=True) * inv_t)  # mean over T
    o_ref[...] = jnp.concatenate(rows, axis=0)                 # (B, L)


def pallas_lstm_attn_pool(gcn_tm_bf16, wih, whh, b_lstm, wq, wk, wv, bq, bk, bv):
    """gcn_tm_bf16: (T, B, L) time-major bf16.  Returns pooled (B, L) f32."""
    T, B, L = gcn_tm_bf16.shape
    return pl.pallas_call(
        _lstm_attn_pool_kernel,
        out_shape=jax.ShapeDtypeStruct((B, L), jnp.float32),
        scratch_shapes=[pltpu.VMEM((B, T, L), jnp.float32)],
    )(gcn_tm_bf16, wih, whh, b_lstm, wq, wk, wv, bq, bk, bv)


# ------------------------- XLA-side building blocks -------------------------

def _batchnorm_train(x):
    """ValEmbed BatchNorm1d over channels = last dim, batch stats over (B, T).
    TODO(synk): training-mode batch statistics; eval mode would use running stats."""
    x = x.astype(jnp.float32)
    m = jnp.mean(x, axis=(0, 1), keepdims=True)
    v = jnp.mean((x - m) ** 2, axis=(0, 1), keepdims=True)
    return (x - m) * jax.lax.rsqrt(v + 1e-5)


def gcn_dynamic_all_steps(x, xw, bias, k=5):
    """All timesteps at once: create_dynamic_edge_index (top-k similarity graph)
    + GCNConv-style symmetric normalization + bias + ReLU.
    x: (B,T,6L) node features, xw: (B,T,L) features already times the GCN weight.
    Returns (T, B, L) time-major."""
    # TODO(synk): top_k / graph construction has no Pallas equivalent; batched XLA.
    B = x.shape[0]
    sim = jnp.einsum('btf,ctf->tbc', x, x)                       # (T, B, B)
    _, idx = jax.lax.top_k(sim, k)                               # (T, B, k)
    m = jnp.sum(jax.nn.one_hot(idx, B, dtype=jnp.float32), axis=2)  # [t, src, dst]
    a = jnp.swapaxes(m, 1, 2)                                    # A[t, dst, src]
    eye = jnp.eye(B, dtype=jnp.float32)
    a = a * (1.0 - eye) + eye                                    # self loops
    deg = jnp.sum(a, axis=-1)
    dinv = jnp.where(deg > 0, jax.lax.rsqrt(deg), 0.0)
    a_norm = dinv[:, :, None] * a * dinv[:, None, :]
    agg = jnp.einsum('tij,jtl->til', a_norm, xw)                 # (T, B, L)
    return jax.nn.relu(agg + bias)


# ------------------------------- GNNBase -----------------------------------

def gnn_base_forward(fp, meds, chart, out_codes, proc, lab, conds, demo, cfg):
    """fairness = False path of GNNBase.forward. Returns (sigmoid(out), out)."""
    B, T = meds.shape[0], meds.shape[1]
    L = cfg['latent_size']

    meds = jnp.clip(meds, 0, cfg['med_vocab'] - 1)
    chart = jnp.clip(chart, 0, cfg['chart_vocab'] - 1)
    out_codes = jnp.clip(out_codes, 0, cfg['out_vocab'] - 1)
    proc = jnp.clip(proc, 0, cfg['proc_vocab'] - 1)
    lab = jnp.clip(lab, 0, cfg['lab_vocab'] - 1)
    conds = jnp.clip(conds, 0, cfg['cond_vocab'] - 1)

    med_n = _batchnorm_train(meds)
    chart_n = _batchnorm_train(chart)
    lab_n = _batchnorm_train(lab)
    cond_b = jnp.broadcast_to(conds.astype(jnp.float32)[:, None, :],
                              (B, T, conds.shape[-1]))

    # Raw per-row features; the embedding tables are folded into the fused weight.
    feat = jnp.concatenate(
        [med_n, chart_n, out_codes.astype(jnp.float32),
         proc.astype(jnp.float32), lab_n, cond_b], axis=-1)      # (B, T, F)
    F_in = feat.shape[-1]

    # One fused block-diagonal matmul: produces the concatenated embedding x
    # (6L wide) AND the GCN-projected features xw (L wide) in a single launch.
    y = pallas_fused_embed(feat.reshape(B * T, F_in).astype(jnp.bfloat16),
                           fp['embed_w'], fp['embed_b'])         # (B*T, 256) f32
    y = y.reshape(B, T, -1)
    x = y[..., :6 * L]                                           # (B, T, 6L)
    xw = y[..., 6 * L:7 * L]                                     # (B, T, L)

    # Dynamic top-k graph + GCN aggregation, batched over all T (XLA).
    gcn_out = gcn_dynamic_all_steps(x, xw, fp['gcn_b'])          # (T, B, L)

    # Fused LSTM + attention + mean-pool Pallas kernel.
    pooled = pallas_lstm_attn_pool(
        gcn_out.astype(jnp.bfloat16),
        fp['lstm_wih'], fp['lstm_whh'], fp['lstm_b'],
        fp['wq'], fp['wk'], fp['wv'], fp['bq'], fp['bk'], fp['bv'])  # (B, L)

    # Static (demographic) branch + tiny tail layers: left to XLA (sub-vreg
    # shapes; a pallas launch would cost more than the compute).
    gender_e = fp['gender_tab'][demo[:, 0]]
    eth_e = fp['eth_tab'][demo[:, 1]]
    ins_e = fp['ins_tab'][demo[:, 2]]
    age_e = fp['age_tab'][demo[:, 3]]
    x2 = jnp.concatenate([gender_e, eth_e, ins_e, age_e], axis=1)    # (B, 4L)
    out2 = x2 @ fp['statfc_w'] + fp['statfc_b']
    out2 = out2 @ fp['statfc2_w'] + fp['statfc2_b']                  # (B, 64)

    pooled2 = jnp.concatenate([pooled, out2], axis=1)                # (B, L+64)
    x_fc = jax.nn.relu(pooled2 @ fp['ffc1_w'] + fp['ffc1_b'])        # (B, 64)
    logits = x_fc @ fp['ffc2_w'] + fp['ffc2_b']                      # (B, 1)
    return jax.nn.sigmoid(logits), logits


# ------------------------------ params --------------------------------------

def init_params(key, cfg):
    L, E = cfg['latent_size'], cfg['embed_size']
    keys = iter(jax.random.split(key, 64))

    def lin(fi, fo):
        w = jax.random.normal(next(keys), (fi, fo), jnp.float32) * 0.05
        b = jax.random.normal(next(keys), (fo,), jnp.float32) * 0.05
        return (w, b)

    def emb(v, d, pad0=False):
        t = jax.random.normal(next(keys), (v, d), jnp.float32) * 0.05
        if pad0:
            t = t.at[0].set(0.0)   # nn.Embedding padding_idx=0
        return t

    p = {}
    p['med_fc'] = lin(cfg['med_vocab'], L)
    p['chart_fc'] = lin(cfg['chart_vocab'], L)
    p['lab_fc'] = lin(cfg['lab_vocab'], L)
    p['proc_emb'] = emb(cfg['proc_vocab'], E)
    p['proc_fc'] = lin(cfg['proc_vocab'] * E, L)
    p['out_emb'] = emb(cfg['out_vocab'], E)
    p['out_fc'] = lin(cfg['out_vocab'] * E, L)
    p['cond_emb'] = emb(cfg['cond_vocab'], E)
    p['cond_fc'] = lin(cfg['cond_vocab'] * E, L)
    p['eth_tab'] = emb(cfg['eth_vocab'], L, pad0=True)
    p['gender_tab'] = emb(cfg['gender_vocab'], L, pad0=True)
    p['age_tab'] = emb(cfg['age_vocab'], L, pad0=True)
    p['ins_tab'] = emb(cfg['ins_vocab'], L, pad0=True)
    p['statfc'] = lin(4 * L, L)
    p['statfc2'] = lin(L, 64)
    p['ffc1'] = lin(L + 64, 64)
    p['ffc2'] = lin(64, 1)
    p['gcn_w'] = jax.random.normal(next(keys), (6 * L, L), jnp.float32) * 0.05
    p['gcn_b'] = jax.random.normal(next(keys), (L,), jnp.float32) * 0.05
    # LSTM params: W_ih^T (L,4L), W_hh^T (L,4L), b_ih (4L,), b_hh (4L,)
    p['lstm'] = (jax.random.normal(next(keys), (L, 4 * L), jnp.float32) * 0.05,
                 jax.random.normal(next(keys), (L, 4 * L), jnp.float32) * 0.05,
                 jax.random.normal(next(keys), (4 * L,), jnp.float32) * 0.05,
                 jax.random.normal(next(keys), (4 * L,), jnp.float32) * 0.05)
    p['attn_q'] = lin(L, L)
    p['attn_k'] = lin(L, L)
    p['attn_v'] = lin(L, L)
    return p


def fuse_params(p, cfg):
    """Fold embedding tables into FC weights, build the block-diagonal fused
    embedding weight (+ composed GCN-projection columns, lane-padded to a
    multiple of 128), and pre-cast all MXU operands to bf16. Runs once."""
    L, E = cfg['latent_size'], cfg['embed_size']

    def code_eff(emb, fc_w):
        # fc(flatten(code[..., None] * emb)) == code @ W_eff, with
        # W_eff[v, l] = sum_e emb[v, e] * fc_w[v*E + e, l]
        V = emb.shape[0]
        return jnp.einsum('ve,vel->vl', emb, fc_w.reshape(V, E, L))

    blocks = [
        (p['med_fc'][0], p['med_fc'][1]),
        (p['chart_fc'][0], p['chart_fc'][1]),
        (code_eff(p['out_emb'], p['out_fc'][0]), p['out_fc'][1]),
        (code_eff(p['proc_emb'], p['proc_fc'][0]), p['proc_fc'][1]),
        (p['lab_fc'][0], p['lab_fc'][1]),
        (code_eff(p['cond_emb'], p['cond_fc'][0]), p['cond_fc'][1]),
    ]
    f_total = sum(int(w.shape[0]) for w, _ in blocks)
    w_bd = jnp.zeros((f_total, 6 * L), jnp.float32)
    row = 0
    for i, (w, _) in enumerate(blocks):
        w_bd = w_bd.at[row:row + w.shape[0], i * L:(i + 1) * L].set(w)
        row += int(w.shape[0])
    b_cat = jnp.concatenate([b for _, b in blocks])              # (6L,)

    # (raw @ W_bd + b) @ W_gcn == raw @ (W_bd @ W_gcn) + b @ W_gcn
    w_gcn_cols = w_bd @ p['gcn_w']                               # (F, L)
    b_gcn_cols = b_cat @ p['gcn_w']                              # (L,)
    w_full = jnp.concatenate([w_bd, w_gcn_cols], axis=1)         # (F, 7L)
    b_full = jnp.concatenate([b_cat, b_gcn_cols])                # (7L,)
    pad = (-w_full.shape[1]) % 128                               # lane-dense out
    w_full = jnp.pad(w_full, ((0, 0), (0, pad)))
    b_full = jnp.pad(b_full, (0, pad))

    w_ih_t, w_hh_t, b_ih, b_hh = p['lstm']
    return {
        'embed_w': w_full.astype(jnp.bfloat16),
        'embed_b': b_full.reshape(1, -1).astype(jnp.float32),
        'gcn_b': p['gcn_b'].astype(jnp.float32),
        'lstm_wih': w_ih_t.astype(jnp.bfloat16),
        'lstm_whh': w_hh_t.astype(jnp.bfloat16),
        'lstm_b': (b_ih + b_hh).reshape(1, -1).astype(jnp.float32),
        'wq': p['attn_q'][0].astype(jnp.bfloat16),
        'wk': p['attn_k'][0].astype(jnp.bfloat16),
        'wv': p['attn_v'][0].astype(jnp.bfloat16),
        'bq': p['attn_q'][1].reshape(1, -1).astype(jnp.float32),
        'bk': p['attn_k'][1].reshape(1, -1).astype(jnp.float32),
        'bv': p['attn_v'][1].reshape(1, -1).astype(jnp.float32),
        'gender_tab': p['gender_tab'], 'eth_tab': p['eth_tab'],
        'ins_tab': p['ins_tab'], 'age_tab': p['age_tab'],
        'statfc_w': p['statfc'][0], 'statfc_b': p['statfc'][1],
        'statfc2_w': p['statfc2'][0], 'statfc2_b': p['statfc2'][1],
        'ffc1_w': p['ffc1'][0], 'ffc1_b': p['ffc1'][1],
        'ffc2_w': p['ffc2'][0], 'ffc2_b': p['ffc2'][1],
    }


# --------------------------------- main --------------------------------------

if __name__ == "__main__":
    cfg = dict(latent_size=32, embed_size=16,
               med_vocab=6, chart_vocab=7, lab_vocab=5,
               proc_vocab=5, out_vocab=4, cond_vocab=6,
               eth_vocab=3, gender_vocab=3, age_vocab=10, ins_vocab=4)
    B, T = 8, 8            # batch >= 5 so the top-k(5) similarity graph is valid
    assert B >= 5

    key = jax.random.PRNGKey(0)
    kp, k1, k2, k3, k4, k5, k6, k7 = jax.random.split(key, 8)
    params = init_params(kp, cfg)
    fparams = fuse_params(params, cfg)     # once, outside jit (bf16 pre-cast)

    meds = jax.random.uniform(k1, (B, T, cfg['med_vocab']), jnp.float32, 0.0, 3.0)
    chart = jax.random.uniform(k2, (B, T, cfg['chart_vocab']), jnp.float32, 0.0, 3.0)
    lab = jax.random.uniform(k3, (B, T, cfg['lab_vocab']), jnp.float32, 0.0, 3.0)
    proc = jax.random.bernoulli(k4, 0.5, (B, T, cfg['proc_vocab'])).astype(jnp.float32)
    out_codes = jax.random.bernoulli(k5, 0.5, (B, T, cfg['out_vocab'])).astype(jnp.float32)
    conds = jax.random.bernoulli(k6, 0.5, (B, cfg['cond_vocab'])).astype(jnp.float32)
    demo = jnp.stack([
        jax.random.randint(jax.random.fold_in(k7, 0), (B,), 0, cfg['gender_vocab']),
        jax.random.randint(jax.random.fold_in(k7, 1), (B,), 0, cfg['eth_vocab']),
        jax.random.randint(jax.random.fold_in(k7, 2), (B,), 0, cfg['ins_vocab']),
        jax.random.randint(jax.random.fold_in(k7, 3), (B,), 0, cfg['age_vocab']),
    ], axis=1)

    @jax.jit
    def fwd(fp, meds, chart, out_codes, proc, lab, conds, demo):
        return gnn_base_forward(fp, meds, chart, out_codes, proc, lab,
                                conds, demo, cfg)

    sigout, logits = fwd(fparams, meds, chart, out_codes, proc, lab, conds, demo)
    jax.block_until_ready((sigout, logits))
    assert sigout.shape == (B, 1) and logits.shape == (B, 1)
    assert bool(jnp.all(jnp.isfinite(sigout))) and bool(jnp.all(jnp.isfinite(logits)))
    print("KERNEL_OK")
</pallas_src>

<mosaic_0001>
module attributes {stable_mosaic.version = 11 : i64} {
  func.func @_fused_embed_kernel(%arg0: memref<64x33xbf16, #tpu.memory_space<vmem>>, %arg1: memref<33x256xbf16, #tpu.memory_space<vmem>>, %arg2: memref<1x256xf32, #tpu.memory_space<vmem>>, %arg3: memref<64x256xf32, #tpu.memory_space<vmem>>) attributes {dimension_semantics = [], scalar_prefetch = 0 : i64, scratch_operands = 0 : i64, tpu.core_type = #tpu.core_type<tc>} {
    %c0 = arith.constant 0 : index
    %c0_0 = arith.constant 0 : index
    %0 = vector.load %arg0[%c0, %c0_0] : memref<64x33xbf16, #tpu.memory_space<vmem>>, vector<64x33xbf16>
    %c0_1 = arith.constant 0 : index
    %c0_2 = arith.constant 0 : index
    %1 = vector.load %arg1[%c0_1, %c0_2] : memref<33x256xbf16, #tpu.memory_space<vmem>>, vector<33x256xbf16>
    %cst = arith.constant dense<0.000000e+00> : vector<64x256xf32>
    %2 = tpu.matmul %0, %1, %cst {dimension_numbers = #tpu.dot_dimension_numbers<[1], [0], [0], [1], [0, 0, 1, 1], [], []>} : vector<64x33xbf16>, vector<33x256xbf16>, vector<64x256xf32> -> vector<64x256xf32>
    %c0_3 = arith.constant 0 : index
    %c0_4 = arith.constant 0 : index
    %3 = vector.load %arg2[%c0_3, %c0_4] : memref<1x256xf32, #tpu.memory_space<vmem>>, vector<1x256xf32>
    %4 = vector.broadcast %3 : vector<1x256xf32> to vector<64x256xf32>
    %5 = arith.addf %2, %4 : vector<64x256xf32>
    %c0_5 = arith.constant 0 : index
    %c0_6 = arith.constant 0 : index
    %6 = vector.load %arg3[%c0_5, %c0_6] : memref<64x256xf32, #tpu.memory_space<vmem>>, vector<64x256xf32>
    tpu.vector_store %arg3[%c0_5, %c0_6], %5 {strides = array<i32>} : memref<64x256xf32, #tpu.memory_space<vmem>>, vector<64x256xf32>,
    return
  }
}

module attributes {stable_mosaic.version = 11 : i64} {
  func.func @_lstm_attn_pool_kernel(%arg0: memref<8x8x32xbf16, #tpu.memory_space<vmem>>, %arg1: memref<32x128xbf16, #tpu.memory_space<vmem>>, %arg2: memref<32x128xbf16, #tpu.memory_space<vmem>>, %arg3: memref<1x128xf32, #tpu.memory_space<vmem>>, %arg4: memref<32x32xbf16, #tpu.memory_space<vmem>>, %arg5: memref<32x32xbf16, #tpu.memory_space<vmem>>, %arg6: memref<32x32xbf16, #tpu.memory_space<vmem>>, %arg7: memref<1x32xf32, #tpu.memory_space<vmem>>, %arg8: memref<1x32xf32, #tpu.memory_space<vmem>>, %arg9: memref<1x32xf32, #tpu.memory_space<vmem>>, %arg10: memref<8x32xf32, #tpu.memory_space<vmem>>, %arg11: memref<8x8x32xf32, #tpu.memory_space<vmem>>) attributes {dimension_semantics = [], scalar_prefetch = 0 : i64, scratch_operands = 1 : i64, tpu.core_type = #tpu.core_type<tc>} {
    %c0 = arith.constant 0 : index
    %c0_0 = arith.constant 0 : index
    %0 = vector.load %arg1[%c0, %c0_0] : memref<32x128xbf16, #tpu.memory_space<vmem>>, vector<32x128xbf16>
    %c0_1 = arith.constant 0 : index
    %c0_2 = arith.constant 0 : index
    %1 = vector.load %arg2[%c0_1, %c0_2] : memref<32x128xbf16, #tpu.memory_space<vmem>>, vector<32x128xbf16>
    %c0_3 = arith.constant 0 : index
    %c0_4 = arith.constant 0 : index
    %2 = vector.load %arg3[%c0_3, %c0_4] : memref<1x128xf32, #tpu.memory_space<vmem>>, vector<1x128xf32>
    %cst = arith.constant 0.000000e+00 : f32
    %3 = vector.broadcast %cst : f32 to vector<8x32xf32>
    %cst_5 = arith.constant 0.000000e+00 : f32
    %4 = vector.broadcast %cst_5 : f32 to vector<8x32xf32>
    %c0_6 = arith.constant 0 : index
    %c0_7 = arith.constant 0 : index
    %c0_8 = arith.constant 0 : index
    %5 = vector.load %arg0[%c0_6, %c0_7, %c0_8] : memref<8x8x32xbf16, #tpu.memory_space<vmem>>, vector<1x8x32xbf16>
    %6 = vector.shape_cast %5 : vector<1x8x32xbf16> to vector<8x32xbf16>
    %cst_9 = arith.constant dense<0.000000e+00> : vector<8x128xf32>
    %7 = tpu.matmul %6, %0, %cst_9 {dimension_numbers = #tpu.dot_dimension_numbers<[1], [0], [0], [1], [0, 0, 1, 1], [], []>} : vector<8x32xbf16>, vector<32x128xbf16>, vector<8x128xf32> -> vector<8x128xf32>
    %8 = arith.truncf %3 : vector<8x32xf32> to vector<8x32xbf16>
    %cst_10 = arith.constant dense<0.000000e+00> : vector<8x128xf32>
    %9 = tpu.matmul %8, %1, %cst_10 {dimension_numbers = #tpu.dot_dimension_numbers<[1], [0], [0], [1], [0, 0, 1, 1], [], []>} : vector<8x32xbf16>, vector<32x128xbf16>, vector<8x128xf32> -> vector<8x128xf32>
    %10 = arith.addf %7, %9 : vector<8x128xf32>
    %11 = vector.broadcast %2 : vector<1x128xf32> to vector<8x128xf32>
    %12 = arith.addf %10, %11 : vector<8x128xf32>
    %13 = vector.extract_strided_slice %12 {offsets = [0, 0], sizes = [8, 32], strides = [1, 1]} : vector<8x128xf32> to vector<8x32xf32>
    %14 = arith.negf %13 : vector<8x32xf32>
    %15 = math.exp %14 : vector<8x32xf32>
    %cst_11 = arith.constant 1.000000e+00 : f32
    %16 = vector.broadcast %cst_11 : f32 to vector<8x32xf32>
    %17 = arith.addf %16, %15 : vector<8x32xf32>
    %18 = arith.divf %16, %17 : vector<8x32xf32>
    %19 = vector.extract_strided_slice %12 {offsets = [0, 32], sizes = [8, 32], strides = [1, 1]} : vector<8x128xf32> to vector<8x32xf32>
    %20 = arith.negf %19 : vector<8x32xf32>
    %21 = math.exp %20 : vector<8x32xf32>
    %cst_12 = arith.constant 1.000000e+00 : f32
    %22 = vector.broadcast %cst_12 : f32 to vector<8x32xf32>
    %23 = arith.addf %22, %21 : vector<8x32xf32>
    %24 = arith.divf %22, %23 : vector<8x32xf32>
    %25 = vector.extract_strided_slice %12 {offsets = [0, 64], sizes = [8, 32], strides = [1, 1]} : vector<8x128xf32> to vector<8x32xf32>
    %26 = math.tanh %25 : vector<8x32xf32>
    %27 = vector.extract_strided_slice %12 {offsets = [0, 96], sizes = [8, 32], strides = [1, 1]} : vector<8x128xf32> to vector<8x32xf32>
    %28 = arith.negf %27 : vector<8x32xf32>
    %29 = math.exp %28 : vector<8x32xf32>
    %cst_13 = arith.constant 1.000000e+00 : f32
    %30 = vector.broadcast %cst_13 : f32 to vector<8x32xf32>
    %31 = arith.addf %30, %29 : vector<8x32xf32>
    %32 = arith.divf %30, %31 : vector<8x32xf32>
    %33 = arith.mulf %24, %4 : vector<8x32xf32>
    %34 = arith.mulf %18, %26 : vector<8x32xf32>
    %35 = arith.addf %33, %34 : vector<8x32xf32>
    %36 = math.tanh %35 : vector<8x32xf32>
    %37 = arith.mulf %32, %36 : vector<8x32xf32>
    %38 = vector.shape_cast %37 : vector<8x32xf32> to vector<8x1x32xf32>
    %c0_14 = arith.constant 0 : index
    %c0_15 = arith.constant 0 : index
    %c0_16 = arith.constant 0 : index
    %39 = vector.load %arg11[%c0_14, %c0_15, %c0_16] : memref<8x8x32xf32, #tpu.memory_space<vmem>>, vector<8x1x32xf32>
    tpu.vector_store %arg11[%c0_14, %c0_15, %c0_16], %38 {strides = array<i32>} : memref<8x8x32xf32, #tpu.memory_space<vmem>>, vector<8x1x32xf32>,
    %c1 = arith.constant 1 : index
    %c0_17 = arith.constant 0 : index
    %c0_18 = arith.constant 0 : index
    %40 = vector.load %arg0[%c1, %c0_17, %c0_18] : memref<8x8x32xbf16, #tpu.memory_space<vmem>>, vector<1x8x32xbf16>
    %41 = vector.shape_cast %40 : vector<1x8x32xbf16> to vector<8x32xbf16>
    %cst_19 = arith.constant dense<0.000000e+00> : vector<8x128xf32>
    %42 = tpu.matmul %41, %0, %cst_19 {dimension_numbers = #tpu.dot_dimension_numbers<[1], [0], [0], [1], [0, 0, 1, 1], [], []>} : vector<8x32xbf16>, vector<32x128xbf16>, vector<8x128xf32> -> vector<8x128xf32>
    %43 = arith.truncf %37 : vector<8x32xf32> to vector<8x32xbf16>
    %cst_20 = arith.constant dense<0.000000e+00> : vector<8x128xf32>
    %44 = tpu.matmul %43, %1, %cst_20 {dimension_numbers = #tpu.dot_dimension_numbers<[1], [0], [0], [1], [0, 0, 1, 1], [], []>} : vector<8x32xbf16>, vector<32x128xbf16>, vector<8x128xf32> -> vector<8x128xf32>
    %45 = arith.addf %42, %44 : vector<8x128xf32>
    %46 = vector.broadcast %2 : vector<1x128xf32> to vector<8x128xf32>
    %47 = arith.addf %45, %46 : vector<8x128xf32>
    %48 = vector.extract_strided_slice %47 {offsets = [0, 0], sizes = [8, 32], strides = [1, 1]} : vector<8x128xf32> to vector<8x32xf32>
    %49 = arith.negf %48 : vector<8x32xf32>
    %50 = math.exp %49 : vector<8x32xf32>
    %cst_21 = arith.constant 1.000000e+00 : f32
    %51 = vector.broadcast %cst_21 : f32 to vector<8x32xf32>
    %52 = arith.addf %51, %50 : vector<8x32xf32>
    %53 = arith.divf %51, %52 : vector<8x32xf32>
    %54 = vector.extract_strided_slice %47 {offsets = [0, 32], sizes = [8, 32], strides = [1, 1]} : vector<8x128xf32> to vector<8x32xf32>
    %55 = arith.negf %54 : vector<8x32xf32>
    %56 = math.exp %55 : vector<8x32xf32>
    %cst_22 = arith.constant 1.000000e+00 : f32
    %57 = vector.broadcast %cst_22 : f32 to vector<8x32xf32>
    %58 = arith.addf %57, %56 : vector<8x32xf32>
    %59 = arith.divf %57, %58 : vector<8x32xf32>
    %60 = vector.extract_strided_slice %47 {offsets = [0, 64], sizes = [8, 32], strides = [1, 1]} : vector<8x128xf32> to vector<8x32xf32>
    %61 = math.tanh %60 : vector<8x32xf32>
    %62 = vector.extract_strided_slice %47 {offsets = [0, 96], sizes = [8, 32], strides = [1, 1]} : vector<8x128xf32> to vector<8x32xf32>
    %63 = arith.negf %62 : vector<8x32xf32>
    %64 = math.exp %63 : vector<8x32xf32>
    %cst_23 = arith.constant 1.000000e+00 : f32
    %65 = vector.broadcast %cst_23 : f32 to vector<8x32xf32>
    %66 = arith.addf %65, %64 : vector<8x32xf32>
    %67 = arith.divf %65, %66 : vector<8x32xf32>
    %68 = arith.mulf %59, %35 : vector<8x32xf32>
    %69 = arith.mulf %53, %61 : vector<8x32xf32>
    %70 = arith.addf %68, %69 : vector<8x32xf32>
    %71 = math.tanh %70 : vector<8x32xf32>
    %72 = arith.mulf %67, %71 : vector<8x32xf32>
    %73 = vector.shape_cast %72 : vector<8x32xf32> to vector<8x1x32xf32>
    %c0_24 = arith.constant 0 : index
    %c1_25 = arith.constant 1 : index
    %c0_26 = arith.constant 0 : index
    %74 = vector.load %arg11[%c0_24, %c1_25, %c0_26] : memref<8x8x32xf32, #tpu.memory_space<vmem>>, vector<8x1x32xf32>
    tpu.vector_store %arg11[%c0_24, %c1_25, %c0_26], %73 {strides = array<i32>} : memref<8x8x32xf32, #tpu.memory_space<vmem>>, vector<8x1x32xf32>,
    %c2 = arith.constant 2 : index
    %c0_27 = arith.constant 0 : index
    %c0_28 = arith.constant 0 : index
    %75 = vector.load %arg0[%c2, %c0_27, %c0_28] : memref<8x8x32xbf16, #tpu.memory_space<vmem>>, vector<1x8x32xbf16>
    %76 = vector.shape_cast %75 : vector<1x8x32xbf16> to vector<8x32xbf16>
    %cst_29 = arith.constant dense<0.000000e+00> : vector<8x128xf32>
    %77 = tpu.matmul %76, %0, %cst_29 {dimension_numbers = #tpu.dot_dimension_numbers<[1], [0], [0], [1], [0, 0, 1, 1], [], []>} : vector<8x32xbf16>, vector<32x128xbf16>, vector<8x128xf32> -> vector<8x128xf32>
    %78 = arith.truncf %72 : vector<8x32xf32> to vector<8x32xbf16>
    %cst_30 = arith.constant dense<0.000000e+00> : vector<8x128xf32>
    %79 = tpu.matmul %78, %1, %cst_30 {dimension_numbers = #tpu.dot_dimension_numbers<[1], [0], [0], [1], [0, 0, 1, 1], [], []>} : vector<8x32xbf16>, vector<32x128xbf16>, vector<8x128xf32> -> vector<8x128xf32>
    %80 = arith.addf %77, %79 : vector<8x128xf32>
    %81 = vector.broadcast %2 : vector<1x128xf32> to vector<8x128xf32>
    %82 = arith.addf %80, %81 : vector<8x128xf32>
    %83 = vector.extract_strided_slice %82 {offsets = [0, 0], sizes = [8, 32], strides = [1, 1]} : vector<8x128xf32> to vector<8x32xf32>
    %84 = arith.negf %83 : vector<8x32xf32>
    %85 = math.exp %84 : vector<8x32xf32>
    %cst_31 = arith.constant 1.000000e+00 : f32
    %86 = vector.broadcast %cst_31 : f32 to vector<8x32xf32>
    %87 = arith.addf %86, %85 : vector<8x32xf32>
    %88 = arith.divf %86, %87 : vector<8x32xf32>
    %89 = vector.extract_strided_slice %82 {offsets = [0, 32], sizes = [8, 32], strides = [1, 1]} : vector<8x128xf32> to vector<8x32xf32>
    %90 = arith.negf %89 : vector<8x32xf32>
    %91 = math.exp %90 : vector<8x32xf32>
    %cst_32 = arith.constant 1.000000e+00 : f32
    %92 = vector.broadcast %cst_32 : f32 to vector<8x32xf32>
    %93 = arith.addf %92, %91 : vector<8x32xf32>
    %94 = arith.divf %92, %93 : vector<8x32xf32>
    %95 = vector.extract_strided_slice %82 {offsets = [0, 64], sizes = [8, 32], strides = [1, 1]} : vector<8x128xf32> to vector<8x32xf32>
    %96 = math.tanh %95 : vector<8x32xf32>
    %97 = vector.extract_strided_slice %82 {offsets = [0, 96], sizes = [8, 32], strides = [1, 1]} : vector<8x128xf32> to vector<8x32xf32>
    %98 = arith.negf %97 : vector<8x32xf32>
    %99 = math.exp %98 : vector<8x32xf32>
    %cst_33 = arith.constant 1.000000e+00 : f32
    %100 = vector.broadcast %cst_33 : f32 to vector<8x32xf32>
    %101 = arith.addf %100, %99 : vector<8x32xf32>
    %102 = arith.divf %100, %101 : vector<8x32xf32>
    %103 = arith.mulf %94, %70 : vector<8x32xf32>
    %104 = arith.mulf %88, %96 : vector<8x32xf32>
    %105 = arith.addf %103, %104 : vector<8x32xf32>
    %106 = math.tanh %105 : vector<8x32xf32>
    %107 = arith.mulf %102, %106 : vector<8x32xf32>
    %108 = vector.shape_cast %107 : vector<8x32xf32> to vector<8x1x32xf32>
    %c0_34 = arith.constant 0 : index
    %c2_35 = arith.constant 2 : index
    %c0_36 = arith.constant 0 : index
    %109 = vector.load %arg11[%c0_34, %c2_35, %c0_36] : memref<8x8x32xf32, #tpu.memory_space<vmem>>, vector<8x1x32xf32>
    tpu.vector_store %arg11[%c0_34, %c2_35, %c0_36], %108 {strides = array<i32>} : memref<8x8x32xf32, #tpu.memory_space<vmem>>, vector<8x1x32xf32>,
    %c3 = arith.constant 3 : index
    %c0_37 = arith.constant 0 : index
    %c0_38 = arith.constant 0 : index
    %110 = vector.load %arg0[%c3, %c0_37, %c0_38] : memref<8x8x32xbf16, #tpu.memory_space<vmem>>, vector<1x8x32xbf16>
    %111 = vector.shape_cast %110 : vector<1x8x32xbf16> to vector<8x32xbf16>
    %cst_39 = arith.constant dense<0.000000e+00> : vector<8x128xf32>
    %112 = tpu.matmul %111, %0, %cst_39 {dimension_numbers = #tpu.dot_dimension_numbers<[1], [0], [0], [1], [0, 0, 1, 1], [], []>} : vector<8x32xbf16>, vector<32x128xbf16>, vector<8x128xf32> -> vector<8x128xf32>
    %113 = arith.truncf %107 : vector<8x32xf32> to vector<8x32xbf16>
    %cst_40 = arith.constant dense<0.000000e+00> : vector<8x128xf32>
    %114 = tpu.matmul %113, %1, %cst_40 {dimension_numbers = #tpu.dot_dimension_numbers<[1], [0], [0], [1], [0, 0, 1, 1], [], []>} : vector<8x32xbf16>, vector<32x128xbf16>, vector<8x128xf32> -> vector<8x128xf32>
    %115 = arith.addf %112, %114 : vector<8x128xf32>
    %116 = vector.broadcast %2 : vector<1x128xf32> to vector<8x128xf32>
    %117 = arith.addf %115, %116 : vector<8x128xf32>
    %118 = vector.extract_strided_slice %117 {offsets = [0, 0], sizes = [8, 32], strides = [1, 1]} : vector<8x128xf32> to vector<8x32xf32>
    %119 = arith.negf %118 : vector<8x32xf32>
    %120 = math.exp %119 : vector<8x32xf32>
    %cst_41 = arith.constant 1.000000e+00 : f32
    %121 = vector.broadcast %cst_41 : f32 to vector<8x32xf32>
    %122 = arith.addf %121, %120 : vector<8x32xf32>
    %123 = arith.divf %121, %122 : vector<8x32xf32>
    %124 = vector.extract_strided_slice %117 {offsets = [0, 32], sizes = [8, 32], strides = [1, 1]} : vector<8x128xf32> to vector<8x32xf32>
    %125 = arith.negf %124 : vector<8x32xf32>
    %126 = math.exp %125 : vector<8x32xf32>
    %cst_42 = arith.constant 1.000000e+00 : f32
    %127 = vector.broadcast %cst_42 : f32 to vector<8x32xf32>
    %128 = arith.addf %127, %126 : vector<8x32xf32>
    %129 = arith.divf %127, %128 : vector<8x32xf32>
    %130 = vector.extract_strided_slice %117 {offsets = [0, 64], sizes = [8, 32], strides = [1, 1]} : vector<8x128xf32> to vector<8x32xf32>
    %131 = math.tanh %130 : vector<8x32xf32>
    %132 = vector.extract_strided_slice %117 {offsets = [0, 96], sizes = [8, 32], strides = [1, 1]} : vector<8x128xf32> to vector<8x32xf32>
    %133 = arith.negf %132 : vector<8x32xf32>
    %134 = math.exp %133 : vector<8x32xf32>
    %cst_43 = arith.constant 1.000000e+00 : f32
    %135 = vector.broadcast %cst_43 : f32 to vector<8x32xf32>
    %136 = arith.addf %135, %134 : vector<8x32xf32>
    %137 = arith.divf %135, %136 : vector<8x32xf32>
    %138 = arith.mulf %129, %105 : vector<8x32xf32>
    %139 = arith.mulf %123, %131 : vector<8x32xf32>
    %140 = arith.addf %138, %139 : vector<8x32xf32>
    %141 = math.tanh %140 : vector<8x32xf32>
    %142 = arith.mulf %137, %141 : vector<8x32xf32>
    %143 = vector.shape_cast %142 : vector<8x32xf32> to vector<8x1x32xf32>
    %c0_44 = arith.constant 0 : index
    %c3_45 = arith.constant 3 : index
    %c0_46 = arith.constant 0 : index
    %144 = vector.load %arg11[%c0_44, %c3_45, %c0_46] : memref<8x8x32xf32, #tpu.memory_space<vmem>>, vector<8x1x32xf32>
    tpu.vector_store %arg11[%c0_44, %c3_45, %c0_46], %143 {strides = array<i32>} : memref<8x8x32xf32, #tpu.memory_space<vmem>>, vector<8x1x32xf32>,
    %c4 = arith.constant 4 : index
    %c0_47 = arith.constant 0 : index
    %c0_48 = arith.constant 0 : index
    %145 = vector.load %arg0[%c4, %c0_47, %c0_48] : memref<8x8x32xbf16, #tpu.memory_space<vmem>>, vector<1x8x32xbf16>
    %146 = vector.shape_cast %145 : vector<1x8x32xbf16> to vector<8x32xbf16>
    %cst_49 = arith.constant dense<0.000000e+00> : vector<8x128xf32>
    %147 = tpu.matmul %146, %0, %cst_49 {dimension_numbers = #tpu.dot_dimension_numbers<[1], [0], [0], [1], [0, 0, 1, 1], [], []>} : vector<8x32xbf16>, vector<32x128xbf16>, vector<8x128xf32> -> vector<8x128xf32>
    %148 = arith.truncf %142 : vector<8x32xf32> to vector<8x32xbf16>
    %cst_50 = arith.constant dense<0.000000e+00> : vector<8x128xf32>
    %149 = tpu.matmul %148, %1, %cst_50 {dimension_numbers = #tpu.dot_dimension_numbers<[1], [0], [0], [1], [0, 0, 1, 1], [], []>} : vector<8x32xbf16>, vector<32x128xbf16>, vector<8x128xf32> -> vector<8x128xf32>
    %150 = arith.addf %147, %149 : vector<8x128xf32>
    %151 = vector.broadcast %2 : vector<1x128xf32> to vector<8x128xf32>
    %152 = arith.addf %150, %151 : vector<8x128xf32>
    %153 = vector.extract_strided_slice %152 {offsets = [0, 0], sizes = [8, 32], strides = [1, 1]} : vector<8x128xf32> to vector<8x32xf32>
    %154 = arith.negf %153 : vector<8x32xf32>
    %155 = math.exp %154 : vector<8x32xf32>
    %cst_51 = arith.constant 1.000000e+00 : f32
    %156 = vector.broadcast %cst_51 : f32 to vector<8x32xf32>
    %157 = arith.addf %156, %155 : vector<8x32xf32>
    %158 = arith.divf %156, %157 : vector<8x32xf32>
    %159 = vector.extract_strided_slice %152 {offsets = [0, 32], sizes = [8, 32], strides = [1, 1]} : vector<8x128xf32> to vector<8x32xf32>
    %160 = arith.negf %159 : vector<8x32xf32>
    %161 = math.exp %160 : vector<8x32xf32>
    %cst_52 = arith.constant 1.000000e+00 : f32
    %162 = vector.broadcast %cst_52 : f32 to vector<8x32xf32>
    %163 = arith.addf %162, %161 : vector<8x32xf32>
    %164 = arith.divf %162, %163 : vector<8x32xf32>
    %165 = vector.extract_strided_slice %152 {offsets = [0, 64], sizes = [8, 32], strides = [1, 1]} : vector<8x128xf32> to vector<8x32xf32>
    %166 = math.tanh %165 : vector<8x32xf32>
    %167 = vector.extract_strided_slice %152 {offsets = [0, 96], sizes = [8, 32], strides = [1, 1]} : vector<8x128xf32> to vector<8x32xf32>
    %168 = arith.negf %167 : vector<8x32xf32>
    %169 = math.exp %168 : vector<8x32xf32>
    %cst_53 = arith.constant 1.000000e+00 : f32
    %170 = vector.broadcast %cst_53 : f32 to vector<8x32xf32>
    %171 = arith.addf %170, %169 : vector<8x32xf32>
    %172 = arith.divf %170, %171 : vector<8x32xf32>
    %173 = arith.mulf %164, %140 : vector<8x32xf32>
    %174 = arith.mulf %158, %166 : vector<8x32xf32>
    %175 = arith.addf %173, %174 : vector<8x32xf32>
    %176 = math.tanh %175 : vector<8x32xf32>
    %177 = arith.mulf %172, %176 : vector<8x32xf32>
    %178 = vector.shape_cast %177 : vector<8x32xf32> to vector<8x1x32xf32>
    %c0_54 = arith.constant 0 : index
    %c4_55 = arith.constant 4 : index
    %c0_56 = arith.constant 0 : index
    %179 = vector.load %arg11[%c0_54, %c4_55, %c0_56] : memref<8x8x32xf32, #tpu.memory_space<vmem>>, vector<8x1x32xf32>
    tpu.vector_store %arg11[%c0_54, %c4_55, %c0_56], %178 {strides = array<i32>} : memref<8x8x32xf32, #tpu.memory_space<vmem>>, vector<8x1x32xf32>,
    %c5 = arith.constant 5 : index
    %c0_57 = arith.constant 0 : index
    %c0_58 = arith.constant 0 : index
    %180 = vector.load %arg0[%c5, %c0_57, %c0_58] : memref<8x8x32xbf16, #tpu.memory_space<vmem>>, vector<1x8x32xbf16>
    %181 = vector.shape_cast %180 : vector<1x8x32xbf16> to vector<8x32xbf16>
    %cst_59 = arith.constant dense<0.000000e+00> : vector<8x128xf32>
    %182 = tpu.matmul %181, %0, %cst_59 {dimension_numbers = #tpu.dot_dimension_numbers<[1], [0], [0], [1], [0, 0, 1, 1], [], []>} : vector<8x32xbf16>, vector<32x128xbf16>, vector<8x128xf32> -> vector<8x128xf32>
    %183 = arith.truncf %177 : vector<8x32xf32> to vector<8x32xbf16>
    %cst_60 = arith.constant dense<0.000000e+00> : vector<8x128xf32>
    %184 = tpu.matmul %183, %1, %cst_60 {dimension_numbers = #tpu.dot_dimension_numbers<[1], [0], [0], [1], [0, 0, 1, 1], [], []>} : vector<8x32xbf16>, vector<32x128xbf16>, vector<8x128xf32> -> vector<8x128xf32>
    %185 = arith.addf %182, %184 : vector<8x128xf32>
    %186 = vector.broadcast %2 : vector<1x128xf32> to vector<8x128xf32>
    %187 = arith.addf %185, %186 : vector<8x128xf32>
    %188 = vector.extract_strided_slice %187 {offsets = [0, 0], sizes = [8, 32], strides = [1, 1]} : vector<8x128xf32> to vector<8x32xf32>
    %189 = arith.negf %188 : vector<8x32xf32>
    %190 = math.exp %189 : vector<8x32xf32>
    %cst_61 = arith.constant 1.000000e+00 : f32
    %191 = vector.broadcast %cst_61 : f32 to vector<8x32xf32>
    %192 = arith.addf %191, %190 : vector<8x32xf32>
    %193 = arith.divf %191, %192 : vector<8x32xf32>
    %194 = vector.extract_strided_slice %187 {offsets = [0, 32], sizes = [8, 32], strides = [1, 1]} : vector<8x128xf32> to vector<8x32xf32>
    %195 = arith.negf %194 : vector<8x32xf32>
    %196 = math.exp %195 : vector<8x32xf32>
    %cst_62 = arith.constant 1.000000e+00 : f32
    %197 = vector.broadcast %cst_62 : f32 to vector<8x32xf32>
    %198 = arith.addf %197, %196 : vector<8x32xf32>
    %199 = arith.divf %197, %198 : vector<8x32xf32>
    %200 = vector.extract_strided_slice %187 {offsets = [0, 64], sizes = [8, 32], strides = [1, 1]} : vector<8x128xf32> to vector<8x32xf32>
    %201 = math.tanh %200 : vector<8x32xf32>
    %202 = vector.extract_strided_slice %187 {offsets = [0, 96], sizes = [8, 32], strides = [1, 1]} : vector<8x128xf32> to vector<8x32xf32>
    %203 = arith.negf %202 : vector<8x32xf32>
    %204 = math.exp %203 : vector<8x32xf32>
    %cst_63 = arith.constant 1.000000e+00 : f32
    %205 = vector.broadcast %cst_63 : f32 to vector<8x32xf32>
    %206 = arith.addf %205, %204 : vector<8x32xf32>
    %207 = arith.divf %205, %206 : vector<8x32xf32>
    %208 = arith.mulf %199, %175 : vector<8x32xf32>
    %209 = arith.mulf %193, %201 : vector<8x32xf32>
    %210 = arith.addf %208, %209 : vector<8x32xf32>
    %211 = math.tanh %210 : vector<8x32xf32>
    %212 = arith.mulf %207, %211 : vector<8x32xf32>
    %213 = vector.shape_cast %212 : vector<8x32xf32> to vector<8x1x32xf32>
    %c0_64 = arith.constant 0 : index
    %c5_65 = arith.constant 5 : index
    %c0_66 = arith.constant 0 : index
    %214 = vector.load %arg11[%c0_64, %c5_65, %c0_66] : memref<8x8x32xf32, #tpu.memory_space<vmem>>, vector<8x1x32xf32>
    tpu.vector_store %arg11[%c0_64, %c5_65, %c0_66], %213 {strides = array<i32>} : memref<8x8x32xf32, #tpu.memory_space<vmem>>, vector<8x1x32xf32>,
    %c6 = arith.constant 6 : index
    %c0_67 = arith.constant 0 : index
    %c0_68 = arith.constant 0 : index
    %215 = vector.load %arg0[%c6, %c0_67, %c0_68] : memref<8x8x32xbf16, #tpu.memory_space<vmem>>, vector<1x8x32xbf16>
    %216 = vector.shape_cast %215 : vector<1x8x32xbf16> to vector<8x32xbf16>
    %cst_69 = arith.constant dense<0.000000e+00> : vector<8x128xf32>
    %217 = tpu.matmul %216, %0, %cst_69 {dimension_numbers = #tpu.dot_dimension_numbers<[1], [0], [0], [1], [0, 0, 1, 1], [], []>} : vector<8x32xbf16>, vector<32x128xbf16>, vector<8x128xf32> -> vector<8x128xf32>
    %218 = arith.truncf %212 : vector<8x32xf32> to vector<8x32xbf16>
    %cst_70 = arith.constant dense<0.000000e+00> : vector<8x128xf32>
    %219 = tpu.matmul %218, %1, %cst_70 {dimension_numbers = #tpu.dot_dimension_numbers<[1], [0], [0], [1], [0, 0, 1, 1], [], []>} : vector<8x32xbf16>, vector<32x128xbf16>, vector<8x128xf32> -> vector<8x128xf32>
    %220 = arith.addf %217, %219 : vector<8x128xf32>
    %221 = vector.broadcast %2 : vector<1x128xf32> to vector<8x128xf32>
    %222 = arith.addf %220, %221 : vector<8x128xf32>
    %223 = vector.extract_strided_slice %222 {offsets = [0, 0], sizes = [8, 32], strides = [1, 1]} : vector<8x128xf32> to vector<8x32xf32>
    %224 = arith.negf %223 : vector<8x32xf32>
    %225 = math.exp %224 : vector<8x32xf32>
    %cst_71 = arith.constant 1.000000e+00 : f32
    %226 = vector.broadcast %cst_71 : f32 to vector<8x32xf32>
    %227 = arith.addf %226, %225 : vector<8x32xf32>
    %228 = arith.divf %226, %227 : vector<8x32xf32>
    %229 = vector.extract_strided_slice %222 {offsets = [0, 32], sizes = [8, 32], strides = [1, 1]} : vector<8x128xf32> to vector<8x32xf32>
    %230 = arith.negf %229 : vector<8x32xf32>
    %231 = math.exp %230 : vector<8x32xf32>
    %cst_72 = arith.constant 1.000000e+00 : f32
    %232 = vector.broadcast %cst_72 : f32 to vector<8x32xf32>
    %233 = arith.addf %232, %231 : vector<8x32xf32>
    %234 = arith.divf %232, %233 : vector<8x32xf32>
    %235 = vector.extract_strided_slice %222 {offsets = [0, 64], sizes = [8, 32], strides = [1, 1]} : vector<8x128xf32> to vector<8x32xf32>
    %236 = math.tanh %235 : vector<8x32xf32>
    %237 = vector.extract_strided_slice %222 {offsets = [0, 96], sizes = [8, 32], strides = [1, 1]} : vector<8x128xf32> to vector<8x32xf32>
    %238 = arith.negf %237 : vector<8x32xf32>
    %239 = math.exp %238 : vector<8x32xf32>
    %cst_73 = arith.constant 1.000000e+00 : f32
    %240 = vector.broadcast %cst_73 : f32 to vector<8x32xf32>
    %241 = arith.addf %240, %239 : vector<8x32xf32>
    %242 = arith.divf %240, %241 : vector<8x32xf32>
    %243 = arith.mulf %234, %210 : vector<8x32xf32>
    %244 = arith.mulf %228, %236 : vector<8x32xf32>
    %245 = arith.addf %243, %244 : vector<8x32xf32>
    %246 = math.tanh %245 : vector<8x32xf32>
    %247 = arith.mulf %242, %246 : vector<8x32xf32>
    %248 = vector.shape_cast %247 : vector<8x32xf32> to vector<8x1x32xf32>
    %c0_74 = arith.constant 0 : index
    %c6_75 = arith.constant 6 : index
    %c0_76 = arith.constant 0 : index
    %249 = vector.load %arg11[%c0_74, %c6_75, %c0_76] : memref<8x8x32xf32, #tpu.memory_space<vmem>>, vector<8x1x32xf32>
    tpu.vector_store %arg11[%c0_74, %c6_75, %c0_76], %248 {strides = array<i32>} : memref<8x8x32xf32, #tpu.memory_space<vmem>>, vector<8x1x32xf32>,
    %c7 = arith.constant 7 : index
    %c0_77 = arith.constant 0 : index
    %c0_78 = arith.constant 0 : index
    %250 = vector.load %arg0[%c7, %c0_77, %c0_78] : memref<8x8x32xbf16, #tpu.memory_space<vmem>>, vector<1x8x32xbf16>
    %251 = vector.shape_cast %250 : vector<1x8x32xbf16> to vector<8x32xbf16>
    %cst_79 = arith.constant dense<0.000000e+00> : vector<8x128xf32>
    %252 = tpu.matmul %251, %0, %cst_79 {dimension_numbers = #tpu.dot_dimension_numbers<[1], [0], [0], [1], [0, 0, 1, 1], [], []>} : vector<8x32xbf16>, vector<32x128xbf16>, vector<8x128xf32> -> vector<8x128xf32>
    %253 = arith.truncf %247 : vector<8x32xf32> to vector<8x32xbf16>
    %cst_80 = arith.constant dense<0.000000e+00> : vector<8x128xf32>
    %254 = tpu.matmul %253, %1, %cst_80 {dimension_numbers = #tpu.dot_dimension_numbers<[1], [0], [0], [1], [0, 0, 1, 1], [], []>} : vector<8x32xbf16>, vector<32x128xbf16>, vector<8x128xf32> -> vector<8x128xf32>
    %255 = arith.addf %252, %254 : vector<8x128xf32>
    %256 = vector.broadcast %2 : vector<1x128xf32> to vector<8x128xf32>
    %257 = arith.addf %255, %256 : vector<8x128xf32>
    %258 = vector.extract_strided_slice %257 {offsets = [0, 0], sizes = [8, 32], strides = [1, 1]} : vector<8x128xf32> to vector<8x32xf32>
    %259 = arith.negf %258 : vector<8x32xf32>
    %260 = math.exp %259 : vector<8x32xf32>
    %cst_81 = arith.constant 1.000000e+00 : f32
    %261 = vector.broadcast %cst_81 : f32 to vector<8x32xf32>
    %262 = arith.addf %261, %260 : vector<8x32xf32>
    %263 = arith.divf %261, %262 : vector<8x32xf32>
    %264 = vector.extract_strided_slice %257 {offsets = [0, 32], sizes = [8, 32], strides = [1, 1]} : vector<8x128xf32> to vector<8x32xf32>
    %265 = arith.negf %264 : vector<8x32xf32>
    %266 = math.exp %265 : vector<8x32xf32>
    %cst_82 = arith.constant 1.000000e+00 : f32
    %267 = vector.broadcast %cst_82 : f32 to vector<8x32xf32>
    %268 = arith.addf %267, %266 : vector<8x32xf32>
    %269 = arith.divf %267, %268 : vector<8x32xf32>
    %270 = vector.extract_strided_slice %257 {offsets = [0, 64], sizes = [8, 32], strides = [1, 1]} : vector<8x128xf32> to vector<8x32xf32>
    %271 = math.tanh %270 : vector<8x32xf32>
    %272 = vector.extract_strided_slice %257 {offsets = [0, 96], sizes = [8, 32], strides = [1, 1]} : vector<8x128xf32> to vector<8x32xf32>
    %273 = arith.negf %272 : vector<8x32xf32>
    %274 = math.exp %273 : vector<8x32xf32>
    %cst_83 = arith.constant 1.000000e+00 : f32
    %275 = vector.broadcast %cst_83 : f32 to vector<8x32xf32>
    %276 = arith.addf %275, %274 : vector<8x32xf32>
    %277 = arith.divf %275, %276 : vector<8x32xf32>
    %278 = arith.mulf %269, %245 : vector<8x32xf32>
    %279 = arith.mulf %263, %271 : vector<8x32xf32>
    %280 = arith.addf %278, %279 : vector<8x32xf32>
    %281 = math.tanh %280 : vector<8x32xf32>
    %282 = arith.mulf %277, %281 : vector<8x32xf32>
    %283 = vector.shape_cast %282 : vector<8x32xf32> to vector<8x1x32xf32>
    %c0_84 = arith.constant 0 : index
    %c7_85 = arith.constant 7 : index
    %c0_86 = arith.constant 0 : index
    %284 = vector.load %arg11[%c0_84, %c7_85, %c0_86] : memref<8x8x32xf32, #tpu.memory_space<vmem>>, vector<8x1x32xf32>
    tpu.vector_store %arg11[%c0_84, %c7_85, %c0_86], %283 {strides = array<i32>} : memref<8x8x32xf32, #tpu.memory_space<vmem>>, vector<8x1x32xf32>,
    %c0_87 = arith.constant 0 : index
    %c0_88 = arith.constant 0 : index
    %285 = vector.load %arg4[%c0_87, %c0_88] : memref<32x32xbf16, #tpu.memory_space<vmem>>, vector<32x32xbf16>
    %c0_89 = arith.constant 0 : index
    %c0_90 = arith.constant 0 : index
    %286 = vector.load %arg5[%c0_89, %c0_90] : memref<32x32xbf16, #tpu.memory_space<vmem>>, vector<32x32xbf16>
    %c0_91 = arith.constant 0 : index
    %c0_92 = arith.constant 0 : index
    %287 = vector.load %arg6[%c0_91, %c0_92] : memref<32x32xbf16, #tpu.memory_space<vmem>>, vector<32x32xbf16>
    %c0_93 = arith.constant 0 : index
    %c0_94 = arith.constant 0 : index
    %288 = vector.load %arg7[%c0_93, %c0_94] : memref<1x32xf32, #tpu.memory_space<vmem>>, vector<1x32xf32>
    %c0_95 = arith.constant 0 : index
    %c0_96 = arith.constant 0 : index
    %289 = vector.load %arg8[%c0_95, %c0_96] : memref<1x32xf32, #tpu.memory_space<vmem>>, vector<1x32xf32>
    %c0_97 = arith.constant 0 : index
    %c0_98 = arith.constant 0 : index
    %290 = vector.load %arg9[%c0_97, %c0_98] : memref<1x32xf32, #tpu.memory_space<vmem>>, vector<1x32xf32>
    %c0_99 = arith.constant 0 : index
    %c0_100 = arith.constant 0 : index
    %c0_101 = arith.constant 0 : index
    %291 = vector.load %arg11[%c0_99, %c0_100, %c0_101] : memref<8x8x32xf32, #tpu.memory_space<vmem>>, vector<1x8x32xf32>
    %292 = vector.shape_cast %291 : vector<1x8x32xf32> to vector<8x32xf32>
    %293 = arith.truncf %292 : vector<8x32xf32> to vector<8x32xbf16>
    %cst_102 = arith.constant dense<0.000000e+00> : vector<8x32xf32>
    %294 = tpu.matmul %293, %285, %cst_102 {dimension_numbers = #tpu.dot_dimension_numbers<[1], [0], [0], [1], [0, 0, 1, 1], [], []>} : vector<8x32xbf16>, vector<32x32xbf16>, vector<8x32xf32> -> vector<8x32xf32>
    %295 = vector.broadcast %288 : vector<1x32xf32> to vector<8x32xf32>
    %296 = arith.addf %294, %295 : vector<8x32xf32>
    %cst_103 = arith.constant dense<0.000000e+00> : vector<8x32xf32>
    %297 = tpu.matmul %293, %286, %cst_103 {dimension_numbers = #tpu.dot_dimension_numbers<[1], [0], [0], [1], [0, 0, 1, 1], [], []>} : vector<8x32xbf16>, vector<32x32xbf16>, vector<8x32xf32> -> vector<8x32xf32>
    %298 = vector.broadcast %289 : vector<1x32xf32> to vector<8x32xf32>
    %299 = arith.addf %297, %298 : vector<8x32xf32>
    %cst_104 = arith.constant dense<0.000000e+00> : vector<8x32xf32>
    %300 = tpu.matmul %293, %287, %cst_104 {dimension_numbers = #tpu.dot_dimension_numbers<[1], [0], [0], [1], [0, 0, 1, 1], [], []>} : vector<8x32xbf16>, vector<32x32xbf16>, vector<8x32xf32> -> vector<8x32xf32>
    %301 = vector.broadcast %290 : vector<1x32xf32> to vector<8x32xf32>
    %302 = arith.addf %300, %301 : vector<8x32xf32>
    %cst_105 = arith.constant 0.176776692 : f32
    %303 = vector.broadcast %cst_105 : f32 to vector<8x32xf32>
    %304 = arith.mulf %296, %303 : vector<8x32xf32>
    %305 = arith.truncf %304 : vector<8x32xf32> to vector<8x32xbf16>
    %306 = arith.truncf %299 : vector<8x32xf32> to vector<8x32xbf16>
    %cst_106 = arith.constant dense<0.000000e+00> : vector<8x8xf32>
    %307 = tpu.matmul %305, %306, %cst_106 {dimension_numbers = #tpu.dot_dimension_numbers<[1], [1], [0], [0], [0, 0, 1, 0], [], []>} : vector<8x32xbf16>, vector<8x32xbf16>, vector<8x8xf32> -> vector<8x8xf32>
    %cst_107 = arith.constant dense<0xFF800000> : vector<8xf32>
    %308 = vector.multi_reduction <maximumf>, %307, %cst_107 [1] : vector<8x8xf32> to vector<8xf32>
    %309 = vector.shape_cast %308 : vector<8xf32> to vector<8x1xf32>
    %310 = vector.broadcast %309 : vector<8x1xf32> to vector<8x8xf32>
    %311 = arith.subf %307, %310 : vector<8x8xf32>
    %312 = math.exp %311 : vector<8x8xf32>
    %cst_108 = arith.constant dense<0.000000e+00> : vector<8xf32>
    %313 = vector.multi_reduction <add>, %312, %cst_108 [1] : vector<8x8xf32> to vector<8xf32>
    %314 = vector.shape_cast %313 : vector<8xf32> to vector<8x1xf32>
    %315 = tpu.reciprocal %314 {approx = true} : vector<8x1xf32> -> vector<8x1xf32>
    %316 = vector.broadcast %315 : vector<8x1xf32> to vector<8x8xf32>
    %317 = arith.mulf %312, %316 : vector<8x8xf32>
    %318 = arith.truncf %317 : vector<8x8xf32> to vector<8x8xbf16>
    %319 = arith.truncf %302 : vector<8x32xf32> to vector<8x32xbf16>
    %cst_109 = arith.constant dense<0.000000e+00> : vector<8x32xf32>
    %320 = tpu.matmul %318, %319, %cst_109 {dimension_numbers = #tpu.dot_dimension_numbers<[1], [0], [0], [1], [0, 0, 1, 1], [], []>} : vector<8x8xbf16>, vector<8x32xbf16>, vector<8x32xf32> -> vector<8x32xf32>
    %cst_110 = arith.constant dense<0.000000e+00> : vector<32xf32>
    %321 = vector.multi_reduction <add>, %320, %cst_110 [0] : vector<8x32xf32> to vector<32xf32>
    %322 = vector.shape_cast %321 : vector<32xf32> to vector<1x32xf32>
    %cst_111 = arith.constant 1.250000e-01 : f32
    %323 = vector.broadcast %cst_111 : f32 to vector<1x32xf32>
    %324 = arith.mulf %322, %323 : vector<1x32xf32>
    %c1_112 = arith.constant 1 : index
    %c0_113 = arith.constant 0 : index
    %c0_114 = arith.constant 0 : index
    %325 = vector.load %arg11[%c1_112, %c0_113, %c0_114] : memref<8x8x32xf32, #tpu.memory_space<vmem>>, vector<1x8x32xf32>
    %326 = vector.shape_cast %325 : vector<1x8x32xf32> to vector<8x32xf32>
    %327 = arith.truncf %326 : vector<8x32xf32> to vector<8x32xbf16>
    %cst_115 = arith.constant dense<0.000000e+00> : vector<8x32xf32>
    %328 = tpu.matmul %327, %285, %cst_115 {dimension_numbers = #tpu.dot_dimension_numbers<[1], [0], [0], [1], [0, 0, 1, 1], [], []>} : vector<8x32xbf16>, vector<32x32xbf16>, vector<8x32xf32> -> vector<8x32xf32>
    %329 = vector.broadcast %288 : vector<1x32xf32> to vector<8x32xf32>
    %330 = arith.addf %328, %329 : vector<8x32xf32>
    %cst_116 = arith.constant dense<0.000000e+00> : vector<8x32xf32>
    %331 = tpu.matmul %327, %286, %cst_116 {dimension_numbers = #tpu.dot_dimension_numbers<[1], [0], [0], [1], [0, 0, 1, 1], [], []>} : vector<8x32xbf16>, vector<32x32xbf16>, vector<8x32xf32> -> vector<8x32xf32>
    %332 = vector.broadcast %289 : vector<1x32xf32> to vector<8x32xf32>
    %333 = arith.addf %331, %332 : vector<8x32xf32>
    %cst_117 = arith.constant dense<0.000000e+00> : vector<8x32xf32>
    %334 = tpu.matmul %327, %287, %cst_117 {dimension_numbers = #tpu.dot_dimension_numbers<[1], [0], [0], [1], [0, 0, 1, 1], [], []>} : vector<8x32xbf16>, vector<32x32xbf16>, vector<8x32xf32> -> vector<8x32xf32>
    %335 = vector.broadcast %290 : vector<1x32xf32> to vector<8x32xf32>
    %336 = arith.addf %334, %335 : vector<8x32xf32>
    %cst_118 = arith.constant 0.176776692 : f32
    %337 = vector.broadcast %cst_118 : f32 to vector<8x32xf32>
    %338 = arith.mulf %330, %337 : vector<8x32xf32>
    %339 = arith.truncf %338 : vector<8x32xf32> to vector<8x32xbf16>
    %340 = arith.truncf %333 : vector<8x32xf32> to vector<8x32xbf16>
    %cst_119 = arith.constant dense<0.000000e+00> : vector<8x8xf32>
    %341 = tpu.matmul %339, %340, %cst_119 {dimension_numbers = #tpu.dot_dimension_numbers<[1], [1], [0], [0], [0, 0, 1, 0], [], []>} : vector<8x32xbf16>, vector<8x32xbf16>, vector<8x8xf32> -> vector<8x8xf32>
    %cst_120 = arith.constant dense<0xFF800000> : vector<8xf32>
    %342 = vector.multi_reduction <maximumf>, %341, %cst_120 [1] : vector<8x8xf32> to vector<8xf32>
    %343 = vector.shape_cast %342 : vector<8xf32> to vector<8x1xf32>
    %344 = vector.broadcast %343 : vector<8x1xf32> to vector<8x8xf32>
    %345 = arith.subf %341, %344 : vector<8x8xf32>
    %346 = math.exp %345 : vector<8x8xf32>
    %cst_121 = arith.constant dense<0.000000e+00> : vector<8xf32>
    %347 = vector.multi_reduction <add>, %346, %cst_121 [1] : vector<8x8xf32> to vector<8xf32>
    %348 = vector.shape_cast %347 : vector<8xf32> to vector<8x1xf32>
    %349 = tpu.reciprocal %348 {approx = true} : vector<8x1xf32> -> vector<8x1xf32>
    %350 = vector.broadcast %349 : vector<8x1xf32> to vector<8x8xf32>
    %351 = arith.mulf %346, %350 : vector<8x8xf32>
    %352 = arith.truncf %351 : vector<8x8xf32> to vector<8x8xbf16>
    %353 = arith.truncf %336 : vector<8x32xf32> to vector<8x32xbf16>
    %cst_122 = arith.constant dense<0.000000e+00> : vector<8x32xf32>
    %354 = tpu.matmul %352, %353, %cst_122 {dimension_numbers = #tpu.dot_dimension_numbers<[1], [0], [0], [1], [0, 0, 1, 1], [], []>} : vector<8x8xbf16>, vector<8x32xbf16>, vector<8x32xf32> -> vector<8x32xf32>
    %cst_123 = arith.constant dense<0.000000e+00> : vector<32xf32>
    %355 = vector.multi_reduction <add>, %354, %cst_123 [0] : vector<8x32xf32> to vector<32xf32>
    %356 = vector.shape_cast %355 : vector<32xf32> to vector<1x32xf32>
    %cst_124 = arith.constant 1.250000e-01 : f32
    %357 = vector.broadcast %cst_124 : f32 to vector<1x32xf32>
    %358 = arith.mulf %356, %357 : vector<1x32xf32>
    %c2_125 = arith.constant 2 : index
    %c0_126 = arith.constant 0 : index
    %c0_127 = arith.constant 0 : index
    %359 = vector.load %arg11[%c2_125, %c0_126, %c0_127] : memref<8x8x32xf32, #tpu.memory_space<vmem>>, vector<1x8x32xf32>
    %360 = vector.shape_cast %359 : vector<1x8x32xf32> to vector<8x32xf32>
    %361 = arith.truncf %360 : vector<8x32xf32> to vector<8x32xbf16>
    %cst_128 = arith.constant dense<0.000000e+00> : vector<8x32xf32>
    %362 = tpu.matmul %361, %285, %cst_128 {dimension_numbers = #tpu.dot_dimension_numbers<[1], [0], [0], [1], [0, 0, 1, 1], [], []>} : vector<8x32xbf16>, vector<32x32xbf16>, vector<8x32xf32> -> vector<8x32xf32>
    %363 = vector.broadcast %288 : vector<1x32xf32> to vector<8x32xf32>
    %364 = arith.addf %362, %363 : vector<8x32xf32>
    %cst_129 = arith.constant dense<0.000000e+00> : vector<8x32xf32>
    %365 = tpu.matmul %361, %286, %cst_129 {dimension_numbers = #tpu.dot_dimension_numbers<[1], [0], [0], [1], [0, 0, 1, 1], [], []>} : vector<8x32xbf16>, vector<32x32xbf16>, vector<8x32xf32> -> vector<8x32xf32>
    %366 = vector.broadcast %289 : vector<1x32xf32> to vector<8x32xf32>
    %367 = arith.addf %365, %366 : vector<8x32xf32>
    %cst_130 = arith.constant dense<0.000000e+00> : vector<8x32xf32>
    %368 = tpu.matmul %361, %287, %cst_130 {dimension_numbers = #tpu.dot_dimension_numbers<[1], [0], [0], [1], [0, 0, 1, 1], [], []>} : vector<8x32xbf16>, vector<32x32xbf16>, vector<8x32xf32> -> vector<8x32xf32>
    %369 = vector.broadcast %290 : vector<1x32xf32> to vector<8x32xf32>
    %370 = arith.addf %368, %369 : vector<8x32xf32>
    %cst_131 = arith.constant 0.176776692 : f32
    %371 = vector.broadcast %cst_131 : f32 to vector<8x32xf32>
    %372 = arith.mulf %364, %371 : vector<8x32xf32>
    %373 = arith.truncf %372 : vector<8x32xf32> to vector<8x32xbf16>
    %374 = arith.truncf %367 : vector<8x32xf32> to vector<8x32xbf16>
    %cst_132 = arith.constant dense<0.000000e+00> : vector<8x8xf32>
    %375 = tpu.matmul %373, %374, %cst_132 {dimension_numbers = #tpu.dot_dimension_numbers<[1], [1], [0], [0], [0, 0, 1, 0], [], []>} : vector<8x32xbf16>, vector<8x32xbf16>, vector<8x8xf32> -> vector<8x8xf32>
    %cst_133 = arith.constant dense<0xFF800000> : vector<8xf32>
    %376 = vector.multi_reduction <maximumf>, %375, %cst_133 [1] : vector<8x8xf32> to vector<8xf32>
    %377 = vector.shape_cast %376 : vector<8xf32> to vector<8x1xf32>
    %378 = vector.broadcast %377 : vector<8x1xf32> to vector<8x8xf32>
    %379 = arith.subf %375, %378 : vector<8x8xf32>
    %380 = math.exp %379 : vector<8x8xf32>
    %cst_134 = arith.constant dense<0.000000e+00> : vector<8xf32>
    %381 = vector.multi_reduction <add>, %380, %cst_134 [1] : vector<8x8xf32> to vector<8xf32>
    %382 = vector.shape_cast %381 : vector<8xf32> to vector<8x1xf32>
    %383 = tpu.reciprocal %382 {approx = true} : vector<8x1xf32> -> vector<8x1xf32>
    %384 = vector.broadcast %383 : vector<8x1xf32> to vector<8x8xf32>
    %385 = arith.mulf %380, %384 : vector<8x8xf32>
    %386 = arith.truncf %385 : vector<8x8xf32> to vector<8x8xbf16>
    %387 = arith.truncf %370 : vector<8x32xf32> to vector<8x32xbf16>
    %cst_135 = arith.constant dense<0.000000e+00> : vector<8x32xf32>
    %388 = tpu.matmul %386, %387, %cst_135 {dimension_numbers = #tpu.dot_dimension_numbers<[1], [0], [0], [1], [0, 0, 1, 1], [], []>} : vector<8x8xbf16>, vector<8x32xbf16>, vector<8x32xf32> -> vector<8x32xf32>
    %cst_136 = arith.constant dense<0.000000e+00> : vector<32xf32>
    %389 = vector.multi_reduction <add>, %388, %cst_136 [0] : vector<8x32xf32> to vector<32xf32>
    %390 = vector.shape_cast %389 : vector<32xf32> to vector<1x32xf32>
    %cst_137 = arith.constant 1.250000e-01 : f32
    %391 = vector.broadcast %cst_137 : f32 to vector<1x32xf32>
    %392 = arith.mulf %390, %391 : vector<1x32xf32>
    %c3_138 = arith.constant 3 : index
    %c0_139 = arith.constant 0 : index
    %c0_140 = arith.constant 0 : index
    %393 = vector.load %arg11[%c3_138, %c0_139, %c0_140] : memref<8x8x32xf32, #tpu.memory_space<vmem>>, vector<1x8x32xf32>
    %394 = vector.shape_cast %393 : vector<1x8x32xf32> to vector<8x32xf32>
    %395 = arith.truncf %394 : vector<8x32xf32> to vector<8x32xbf16>
    %cst_141 = arith.constant dense<0.000000e+00> : vector<8x32xf32>
    %396 = tpu.matmul %395, %285, %cst_141 {dimension_numbers = #tpu.dot_dimension_numbers<[1], [0], [0], [1], [0, 0, 1, 1], [], []>} : vector<8x32xbf16>, vector<32x32xbf16>, vector<8x32xf32> -> vector<8x32xf32>
    %397 = vector.broadcast %288 : vector<1x32xf32> to vector<8x32xf32>
    %398 = arith.addf %396, %397 : vector<8x32xf32>
    %cst_142 = arith.constant dense<0.000000e+00> : vector<8x32xf32>
    %399 = tpu.matmul %395, %286, %cst_142 {dimension_numbers = #tpu.dot_dimension_numbers<[1], [0], [0], [1], [0, 0, 1, 1], [], []>} : vector<8x32xbf16>, vector<32x32xbf16>, vector<8x32xf32> -> vector<8x32xf32>
    %400 = vector.broadcast %289 : vector<1x32xf32> to vector<8x32xf32>
    %401 = arith.addf %399, %400 : vector<8x32xf32>
    %cst_143 = arith.constant dense<0.000000e+00> : vector<8x32xf32>
    %402 = tpu.matmul %395, %287, %cst_143 {dimension_numbers = #tpu.dot_dimension_numbers<[1], [0], [0], [1], [0, 0, 1, 1], [], []>} : vector<8x32xbf16>, vector<32x32xbf16>, vector<8x32xf32> -> vector<8x32xf32>
    %403 = vector.broadcast %290 : vector<1x32xf32> to vector<8x32xf32>
    %404 = arith.addf %402, %403 : vector<8x32xf32>
    %cst_144 = arith.constant 0.176776692 : f32
    %405 = vector.broadcast %cst_144 : f32 to vector<8x32xf32>
    %406 = arith.mulf %398, %405 : vector<8x32xf32>
    %407 = arith.truncf %406 : vector<8x32xf32> to vector<8x32xbf16>
    %408 = arith.truncf %401 : vector<8x32xf32> to vector<8x32xbf16>
    %cst_145 = arith.constant dense<0.000000e+00> : vector<8x8xf32>
    %409 = tpu.matmul %407, %408, %cst_145 {dimension_numbers = #tpu.dot_dimension_numbers<[1], [1], [0], [0], [0, 0, 1, 0], [], []>} : vector<8x32xbf16>, vector<8x32xbf16>, vector<8x8xf32> -> vector<8x8xf32>
    %cst_146 = arith.constant dense<0xFF800000> : vector<8xf32>
    %410 = vector.multi_reduction <maximumf>, %409, %cst_146 [1] : vector<8x8xf32> to vector<8xf32>
    %411 = vector.shape_cast %410 : vector<8xf32> to vector<8x1xf32>
    %412 = vector.broadcast %411 : vector<8x1xf32> to vector<8x8xf32>
    %413 = arith.subf %409, %412 : vector<8x8xf32>
    %414 = math.exp %413 : vector<8x8xf32>
    %cst_147 = arith.constant dense<0.000000e+00> : vector<8xf32>
    %415 = vector.multi_reduction <add>, %414, %cst_147 [1] : vector<8x8xf32> to vector<8xf32>
    %416 = vector.shape_cast %415 : vector<8xf32> to vector<8x1xf32>
    %417 = tpu.reciprocal %416 {approx = true} : vector<8x1xf32> -> vector<8x1xf32>
    %418 = vector.broadcast %417 : vector<8x1xf32> to vector<8x8xf32>
    %419 = arith.mulf %414, %418 : vector<8x8xf32>
    %420 = arith.truncf %419 : vector<8x8xf32> to vector<8x8xbf16>
    %421 = arith.truncf %404 : vector<8x32xf32> to vector<8x32xbf16>
    %cst_148 = arith.constant dense<0.000000e+00> : vector<8x32xf32>
    %422 = tpu.matmul %420, %421, %cst_148 {dimension_numbers = #tpu.dot_dimension_numbers<[1], [0], [0], [1], [0, 0, 1, 1], [], []>} : vector<8x8xbf16>, vector<8x32xbf16>, vector<8x32xf32> -> vector<8x32xf32>
    %cst_149 = arith.constant dense<0.000000e+00> : vector<32xf32>
    %423 = vector.multi_reduction <add>, %422, %cst_149 [0] : vector<8x32xf32> to vector<32xf32>
    %424 = vector.shape_cast %423 : vector<32xf32> to vector<1x32xf32>
    %cst_150 = arith.constant 1.250000e-01 : f32
    %425 = vector.broadcast %cst_150 : f32 to vector<1x32xf32>
    %426 = arith.mulf %424, %425 : vector<1x32xf32>
    %c4_151 = arith.constant 4 : index
    %c0_152 = arith.constant 0 : index
    %c0_153 = arith.constant 0 : index
    %427 = vector.load %arg11[%c4_151, %c0_152, %c0_153] : memref<8x8x32xf32, #tpu.memory_space<vmem>>, vector<1x8x32xf32>
    %428 = vector.shape_cast %427 : vector<1x8x32xf32> to vector<8x32xf32>
    %429 = arith.truncf %428 : vector<8x32xf32> to vector<8x32xbf16>
    %cst_154 = arith.constant dense<0.000000e+00> : vector<8x32xf32>
    %430 = tpu.matmul %429, %285, %cst_154 {dimension_numbers = #tpu.dot_dimension_numbers<[1], [0], [0], [1], [0, 0, 1, 1], [], []>} : vector<8x32xbf16>, vector<32x32xbf16>, vector<8x32xf32> -> vector<8x32xf32>
    %431 = vector.broadcast %288 : vector<1x32xf32> to vector<8x32xf32>
    %432 = arith.addf %430, %431 : vector<8x32xf32>
    %cst_155 = arith.constant dense<0.000000e+00> : vector<8x32xf32>
    %433 = tpu.matmul %429, %286, %cst_155 {dimension_numbers = #tpu.dot_dimension_numbers<[1], [0], [0], [1], [0, 0, 1, 1], [], []>} : vector<8x32xbf16>, vector<32x32xbf16>, vector<8x32xf32> -> vector<8x32xf32>
    %434 = vector.broadcast %289 : vector<1x32xf32> to vector<8x32xf32>
    %435 = arith.addf %433, %434 : vector<8x32xf32>
    %cst_156 = arith.constant dense<0.000000e+00> : vector<8x32xf32>
    %436 = tpu.matmul %429, %287, %cst_156 {dimension_numbers = #tpu.dot_dimension_numbers<[1], [0], [0], [1], [0, 0, 1, 1], [], []>} : vector<8x32xbf16>, vector<32x32xbf16>, vector<8x32xf32> -> vector<8x32xf32>
    %437 = vector.broadcast %290 : vector<1x32xf32> to vector<8x32xf32>
    %438 = arith.addf %436, %437 : vector<8x32xf32>
    %cst_157 = arith.constant 0.176776692 : f32
    %439 = vector.broadcast %cst_157 : f32 to vector<8x32xf32>
    %440 = arith.mulf %432, %439 : vector<8x32xf32>
    %441 = arith.truncf %440 : vector<8x32xf32> to vector<8x32xbf16>
    %442 = arith.truncf %435 : vector<8x32xf32> to vector<8x32xbf16>
    %cst_158 = arith.constant dense<0.000000e+00> : vector<8x8xf32>
    %443 = tpu.matmul %441, %442, %cst_158 {dimension_numbers = #tpu.dot_dimension_numbers<[1], [1], [0], [0], [0, 0, 1, 0], [], []>} : vector<8x32xbf16>, vector<8x32xbf16>, vector<8x8xf32> -> vector<8x8xf32>
    %cst_159 = arith.constant dense<0xFF800000> : vector<8xf32>
    %444 = vector.multi_reduction <maximumf>, %443, %cst_159 [1] : vector<8x8xf32> to vector<8xf32>
    %445 = vector.shape_cast %444 : vector<8xf32> to vector<8x1xf32>
    %446 = vector.broadcast %445 : vector<8x1xf32> to vector<8x8xf32>
    %447 = arith.subf %443, %446 : vector<8x8xf32>
    %448 = math.exp %447 : vector<8x8xf32>
    %cst_160 = arith.constant dense<0.000000e+00> : vector<8xf32>
    %449 = vector.multi_reduction <add>, %448, %cst_160 [1] : vector<8x8xf32> to vector<8xf32>
    %450 = vector.shape_cast %449 : vector<8xf32> to vector<8x1xf32>
    %451 = tpu.reciprocal %450 {approx = true} : vector<8x1xf32> -> vector<8x1xf32>
    %452 = vector.broadcast %451 : vector<8x1xf32> to vector<8x8xf32>
    %453 = arith.mulf %448, %452 : vector<8x8xf32>
    %454 = arith.truncf %453 : vector<8x8xf32> to vector<8x8xbf16>
    %455 = arith.truncf %438 : vector<8x32xf32> to vector<8x32xbf16>
    %cst_161 = arith.constant dense<0.000000e+00> : vector<8x32xf32>
    %456 = tpu.matmul %454, %455, %cst_161 {dimension_numbers = #tpu.dot_dimension_numbers<[1], [0], [0], [1], [0, 0, 1, 1], [], []>} : vector<8x8xbf16>, vector<8x32xbf16>, vector<8x32xf32> -> vector<8x32xf32>
    %cst_162 = arith.constant dense<0.000000e+00> : vector<32xf32>
    %457 = vector.multi_reduction <add>, %456, %cst_162 [0] : vector<8x32xf32> to vector<32xf32>
    %458 = vector.shape_cast %457 : vector<32xf32> to vector<1x32xf32>
    %cst_163 = arith.constant 1.250000e-01 : f32
    %459 = vector.broadcast %cst_163 : f32 to vector<1x32xf32>
    %460 = arith.mulf %458, %459 : vector<1x32xf32>
    %c5_164 = arith.constant 5 : index
    %c0_165 = arith.constant 0 : index
    %c0_166 = arith.constant 0 : index
    %461 = vector.load %arg11[%c5_164, %c0_165, %c0_166] : memref<8x8x32xf32, #tpu.memory_space<vmem>>, vector<1x8x32xf32>
    %462 = vector.shape_cast %461 : vector<1x8x32xf32> to vector<8x32xf32>
    %463 = arith.truncf %462 : vector<8x32xf32> to vector<8x32xbf16>
    %cst_167 = arith.constant dense<0.000000e+00> : vector<8x32xf32>
    %464 = tpu.matmul %463, %285, %cst_167 {dimension_numbers = #tpu.dot_dimension_numbers<[1], [0], [0], [1], [0, 0, 1, 1], [], []>} : vector<8x32xbf16>, vector<32x32xbf16>, vector<8x32xf32> -> vector<8x32xf32>
    %465 = vector.broadcast %288 : vector<1x32xf32> to vector<8x32xf32>
    %466 = arith.addf %464, %465 : vector<8x32xf32>
    %cst_168 = arith.constant dense<0.000000e+00> : vector<8x32xf32>
    %467 = tpu.matmul %463, %286, %cst_168 {dimension_numbers = #tpu.dot_dimension_numbers<[1], [0], [0], [1], [0, 0, 1, 1], [], []>} : vector<8x32xbf16>, vector<32x32xbf16>, vector<8x32xf32> -> vector<8x32xf32>
    %468 = vector.broadcast %289 : vector<1x32xf32> to vector<8x32xf32>
    %469 = arith.addf %467, %468 : vector<8x32xf32>
    %cst_169 = arith.constant dense<0.000000e+00> : vector<8x32xf32>
    %470 = tpu.matmul %463, %287, %cst_169 {dimension_numbers = #tpu.dot_dimension_numbers<[1], [0], [0], [1], [0, 0, 1, 1], [], []>} : vector<8x32xbf16>, vector<32x32xbf16>, vector<8x32xf32> -> vector<8x32xf32>
    %471 = vector.broadcast %290 : vector<1x32xf32> to vector<8x32xf32>
    %472 = arith.addf %470, %471 : vector<8x32xf32>
    %cst_170 = arith.constant 0.176776692 : f32
    %473 = vector.broadcast %cst_170 : f32 to vector<8x32xf32>
    %474 = arith.mulf %466, %473 : vector<8x32xf32>
    %475 = arith.truncf %474 : vector<8x32xf32> to vector<8x32xbf16>
    %476 = arith.truncf %469 : vector<8x32xf32> to vector<8x32xbf16>
    %cst_171 = arith.constant dense<0.000000e+00> : vector<8x8xf32>
    %477 = tpu.matmul %475, %476, %cst_171 {dimension_numbers = #tpu.dot_dimension_numbers<[1], [1], [0], [0], [0, 0, 1, 0], [], []>} : vector<8x32xbf16>, vector<8x32xbf16>, vector<8x8xf32> -> vector<8x8xf32>
    %cst_172 = arith.constant dense<0xFF800000> : vector<8xf32>
    %478 = vector.multi_reduction <maximumf>, %477, %cst_172 [1] : vector<8x8xf32> to vector<8xf32>
    %479 = vector.shape_cast %478 : vector<8xf32> to vector<8x1xf32>
    %480 = vector.broadcast %479 : vector<8x1xf32> to vector<8x8xf32>
    %481 = arith.subf %477, %480 : vector<8x8xf32>
    %482 = math.exp %481 : vector<8x8xf32>
    %cst_173 = arith.constant dense<0.000000e+00> : vector<8xf32>
    %483 = vector.multi_reduction <add>, %482, %cst_173 [1] : vector<8x8xf32> to vector<8xf32>
    %484 = vector.shape_cast %483 : vector<8xf32> to vector<8x1xf32>
    %485 = tpu.reciprocal %484 {approx = true} : vector<8x1xf32> -> vector<8x1xf32>
    %486 = vector.broadcast %485 : vector<8x1xf32> to vector<8x8xf32>
    %487 = arith.mulf %482, %486 : vector<8x8xf32>
    %488 = arith.truncf %487 : vector<8x8xf32> to vector<8x8xbf16>
    %489 = arith.truncf %472 : vector<8x32xf32> to vector<8x32xbf16>
    %cst_174 = arith.constant dense<0.000000e+00> : vector<8x32xf32>
    %490 = tpu.matmul %488, %489, %cst_174 {dimension_numbers = #tpu.dot_dimension_numbers<[1], [0], [0], [1], [0, 0, 1, 1], [], []>} : vector<8x8xbf16>, vector<8x32xbf16>, vector<8x32xf32> -> vector<8x32xf32>
    %cst_175 = arith.constant dense<0.000000e+00> : vector<32xf32>
    %491 = vector.multi_reduction <add>, %490, %cst_175 [0] : vector<8x32xf32> to vector<32xf32>
    %492 = vector.shape_cast %491 : vector<32xf32> to vector<1x32xf32>
    %cst_176 = arith.constant 1.250000e-01 : f32
    %493 = vector.broadcast %cst_176 : f32 to vector<1x32xf32>
    %494 = arith.mulf %492, %493 : vector<1x32xf32>
    %c6_177 = arith.constant 6 : index
    %c0_178 = arith.constant 0 : index
    %c0_179 = arith.constant 0 : index
    %495 = vector.load %arg11[%c6_177, %c0_178, %c0_179] : memref<8x8x32xf32, #tpu.memory_space<vmem>>, vector<1x8x32xf32>
    %496 = vector.shape_cast %495 : vector<1x8x32xf32> to vector<8x32xf32>
    %497 = arith.truncf %496 : vector<8x32xf32> to vector<8x32xbf16>
    %cst_180 = arith.constant dense<0.000000e+00> : vector<8x32xf32>
    %498 = tpu.matmul %497, %285, %cst_180 {dimension_numbers = #tpu.dot_dimension_numbers<[1], [0], [0], [1], [0, 0, 1, 1], [], []>} : vector<8x32xbf16>, vector<32x32xbf16>, vector<8x32xf32> -> vector<8x32xf32>
    %499 = vector.broadcast %288 : vector<1x32xf32> to vector<8x32xf32>
    %500 = arith.addf %498, %499 : vector<8x32xf32>
    %cst_181 = arith.constant dense<0.000000e+00> : vector<8x32xf32>
    %501 = tpu.matmul %497, %286, %cst_181 {dimension_numbers = #tpu.dot_dimension_numbers<[1], [0], [0], [1], [0, 0, 1, 1], [], []>} : vector<8x32xbf16>, vector<32x32xbf16>, vector<8x32xf32> -> vector<8x32xf32>
    %502 = vector.broadcast %289 : vector<1x32xf32> to vector<8x32xf32>
    %503 = arith.addf %501, %502 : vector<8x32xf32>
    %cst_182 = arith.constant dense<0.000000e+00> : vector<8x32xf32>
    %504 = tpu.matmul %497, %287, %cst_182 {dimension_numbers = #tpu.dot_dimension_numbers<[1], [0], [0], [1], [0, 0, 1, 1], [], []>} : vector<8x32xbf16>, vector<32x32xbf16>, vector<8x32xf32> -> vector<8x32xf32>
    %505 = vector.broadcast %290 : vector<1x32xf32> to vector<8x32xf32>
    %506 = arith.addf %504, %505 : vector<8x32xf32>
    %cst_183 = arith.constant 0.176776692 : f32
    %507 = vector.broadcast %cst_183 : f32 to vector<8x32xf32>
    %508 = arith.mulf %500, %507 : vector<8x32xf32>
    %509 = arith.truncf %508 : vector<8x32xf32> to vector<8x32xbf16>
    %510 = arith.truncf %503 : vector<8x32xf32> to vector<8x32xbf16>
    %cst_184 = arith.constant dense<0.000000e+00> : vector<8x8xf32>
    %511 = tpu.matmul %509, %510, %cst_184 {dimension_numbers = #tpu.dot_dimension_numbers<[1], [1], [0], [0], [0, 0, 1, 0], [], []>} : vector<8x32xbf16>, vector<8x32xbf16>, vector<8x8xf32> -> vector<8x8xf32>
    %cst_185 = arith.constant dense<0xFF800000> : vector<8xf32>
    %512 = vector.multi_reduction <maximumf>, %511, %cst_185 [1] : vector<8x8xf32> to vector<8xf32>
    %513 = vector.shape_cast %512 : vector<8xf32> to vector<8x1xf32>
    %514 = vector.broadcast %513 : vector<8x1xf32> to vector<8x8xf32>
    %515 = arith.subf %511, %514 : vector<8x8xf32>
    %516 = math.exp %515 : vector<8x8xf32>
    %cst_186 = arith.constant dense<0.000000e+00> : vector<8xf32>
    %517 = vector.multi_reduction <add>, %516, %cst_186 [1] : vector<8x8xf32> to vector<8xf32>
    %518 = vector.shape_cast %517 : vector<8xf32> to vector<8x1xf32>
    %519 = tpu.reciprocal %518 {approx = true} : vector<8x1xf32> -> vector<8x1xf32>
    %520 = vector.broadcast %519 : vector<8x1xf32> to vector<8x8xf32>
    %521 = arith.mulf %516, %520 : vector<8x8xf32>
    %522 = arith.truncf %521 : vector<8x8xf32> to vector<8x8xbf16>
    %523 = arith.truncf %506 : vector<8x32xf32> to vector<8x32xbf16>
    %cst_187 = arith.constant dense<0.000000e+00> : vector<8x32xf32>
    %524 = tpu.matmul %522, %523, %cst_187 {dimension_numbers = #tpu.dot_dimension_numbers<[1], [0], [0], [1], [0, 0, 1, 1], [], []>} : vector<8x8xbf16>, vector<8x32xbf16>, vector<8x32xf32> -> vector<8x32xf32>
    %cst_188 = arith.constant dense<0.000000e+00> : vector<32xf32>
    %525 = vector.multi_reduction <add>, %524, %cst_188 [0] : vector<8x32xf32> to vector<32xf32>
    %526 = vector.shape_cast %525 : vector<32xf32> to vector<1x32xf32>
    %cst_189 = arith.constant 1.250000e-01 : f32
    %527 = vector.broadcast %cst_189 : f32 to vector<1x32xf32>
    %528 = arith.mulf %526, %527 : vector<1x32xf32>
    %c7_190 = arith.constant 7 : index
    %c0_191 = arith.constant 0 : index
    %c0_192 = arith.constant 0 : index
    %529 = vector.load %arg11[%c7_190, %c0_191, %c0_192] : memref<8x8x32xf32, #tpu.memory_space<vmem>>, vector<1x8x32xf32>
    %530 = vector.shape_cast %529 : vector<1x8x32xf32> to vector<8x32xf32>
    %531 = arith.truncf %530 : vector<8x32xf32> to vector<8x32xbf16>
    %cst_193 = arith.constant dense<0.000000e+00> : vector<8x32xf32>
    %532 = tpu.matmul %531, %285, %cst_193 {dimension_numbers = #tpu.dot_dimension_numbers<[1], [0], [0], [1], [0, 0, 1, 1], [], []>} : vector<8x32xbf16>, vector<32x32xbf16>, vector<8x32xf32> -> vector<8x32xf32>
    %533 = vector.broadcast %288 : vector<1x32xf32> to vector<8x32xf32>
    %534 = arith.addf %532, %533 : vector<8x32xf32>
    %cst_194 = arith.constant dense<0.000000e+00> : vector<8x32xf32>
    %535 = tpu.matmul %531, %286, %cst_194 {dimension_numbers = #tpu.dot_dimension_numbers<[1], [0], [0], [1], [0, 0, 1, 1], [], []>} : vector<8x32xbf16>, vector<32x32xbf16>, vector<8x32xf32> -> vector<8x32xf32>
    %536 = vector.broadcast %289 : vector<1x32xf32> to vector<8x32xf32>
    %537 = arith.addf %535, %536 : vector<8x32xf32>
    %cst_195 = arith.constant dense<0.000000e+00> : vector<8x32xf32>
    %538 = tpu.matmul %531, %287, %cst_195 {dimension_numbers = #tpu.dot_dimension_numbers<[1], [0], [0], [1], [0, 0, 1, 1], [], []>} : vector<8x32xbf16>, vector<32x32xbf16>, vector<8x32xf32> -> vector<8x32xf32>
    %539 = vector.broadcast %290 : vector<1x32xf32> to vector<8x32xf32>
    %540 = arith.addf %538, %539 : vector<8x32xf32>
    %cst_196 = arith.constant 0.176776692 : f32
    %541 = vector.broadcast %cst_196 : f32 to vector<8x32xf32>
    %542 = arith.mulf %534, %541 : vector<8x32xf32>
    %543 = arith.truncf %542 : vector<8x32xf32> to vector<8x32xbf16>
    %544 = arith.truncf %537 : vector<8x32xf32> to vector<8x32xbf16>
    %cst_197 = arith.constant dense<0.000000e+00> : vector<8x8xf32>
    %545 = tpu.matmul %543, %544, %cst_197 {dimension_numbers = #tpu.dot_dimension_numbers<[1], [1], [0], [0], [0, 0, 1, 0], [], []>} : vector<8x32xbf16>, vector<8x32xbf16>, vector<8x8xf32> -> vector<8x8xf32>
    %cst_198 = arith.constant dense<0xFF800000> : vector<8xf32>
    %546 = vector.multi_reduction <maximumf>, %545, %cst_198 [1] : vector<8x8xf32> to vector<8xf32>
    %547 = vector.shape_cast %546 : vector<8xf32> to vector<8x1xf32>
    %548 = vector.broadcast %547 : vector<8x1xf32> to vector<8x8xf32>
    %549 = arith.subf %545, %548 : vector<8x8xf32>
    %550 = math.exp %549 : vector<8x8xf32>
    %cst_199 = arith.constant dense<0.000000e+00> : vector<8xf32>
    %551 = vector.multi_reduction <add>, %550, %cst_199 [1] : vector<8x8xf32> to vector<8xf32>
    %552 = vector.shape_cast %551 : vector<8xf32> to vector<8x1xf32>
    %553 = tpu.reciprocal %552 {approx = true} : vector<8x1xf32> -> vector<8x1xf32>
    %554 = vector.broadcast %553 : vector<8x1xf32> to vector<8x8xf32>
    %555 = arith.mulf %550, %554 : vector<8x8xf32>
    %556 = arith.truncf %555 : vector<8x8xf32> to vector<8x8xbf16>
    %557 = arith.truncf %540 : vector<8x32xf32> to vector<8x32xbf16>
    %cst_200 = arith.constant dense<0.000000e+00> : vector<8x32xf32>
    %558 = tpu.matmul %556, %557, %cst_200 {dimension_numbers = #tpu.dot_dimension_numbers<[1], [0], [0], [1], [0, 0, 1, 1], [], []>} : vector<8x8xbf16>, vector<8x32xbf16>, vector<8x32xf32> -> vector<8x32xf32>
    %cst_201 = arith.constant dense<0.000000e+00> : vector<32xf32>
    %559 = vector.multi_reduction <add>, %558, %cst_201 [0] : vector<8x32xf32> to vector<32xf32>
    %560 = vector.shape_cast %559 : vector<32xf32> to vector<1x32xf32>
    %cst_202 = arith.constant 1.250000e-01 : f32
    %561 = vector.broadcast %cst_202 : f32 to vector<1x32xf32>
    %562 = arith.mulf %560, %561 : vector<1x32xf32>
    %563 = tpu.concatenate %324, %358, %392, %426, %460, %494, %528, %562 in 0 : vector<1x32xf32>, vector<1x32xf32>, vector<1x32xf32>, vector<1x32xf32>, vector<1x32xf32>, vector<1x32xf32>, vector<1x32xf32>, vector<1x32xf32> -> vector<8x32xf32>
    %c0_203 = arith.constant 0 : index
    %c0_204 = arith.constant 0 : index
    %564 = vector.load %arg10[%c0_203, %c0_204] : memref<8x32xf32, #tpu.memory_space<vmem>>, vector<8x32xf32>
    tpu.vector_store %arg10[%c0_203, %c0_204], %563 {strides = array<i32>} : memref<8x32xf32, #tpu.memory_space<vmem>>, vector<8x32xf32>,
    return
  }
}

</mosaic_0001>

<bundles_post_ra>
// kernel: fwd.2
= control target key start
LH: loop header
LB: loop body
LE: loop exit
PB: predicated region body
PF: predicated region fallthrough
CT: control target
= control target key end

     0   :  { %vm98_vm0 = vcmask 1040384   ;;  %v233_v1 = vmov 0   ;;  %vm85_vm1 = vcmask 269312   ;;  %v30_v15 = vlaneseq  ;;  %s332_s1 = inlined_call_operand.vmem [shape: bf16[33,256], index: 1, kind: input, shape index: {}]   ;;  %s333_s0 = inlined_call_operand.vmem [shape: bf16[64,33], index: 0, kind: input, shape index: {}]   ;;  %s334_s2 = inlined_call_operand.vmem [shape: f32[1,256], index: 2, kind: input, shape index: {}]   ;;  %s335_s3 = inlined_call_operand.vmem [shape: f32[64,256], index: 3, kind: output, shape index: {}]  }
   0x1   :  { %v221_v0 = vld [vmem:[%s332_s1 + $0x4] ss:$8 sps:$4 sm:$0xff]   ;;  %139 = vmatprep.mubr.bf16.mxu0 %v233_v1  ;;  %159 = vmatprep.mubr.bf16.mxu1 %v233_v1  ;;  %v223_v2 = vld [vmem:[%s332_s1] ss:$8 sps:$4 sm:$0xff]   ;;  %v224_v3 = vld [vmem:[%s332_s1 + $0x14] ss:$8 sps:$4 sm:$0xff]  }
   0x2   :  { %107 = vmatprep.subr.bf16.mxu0 %v221_v0  ;;  %214 = vmatprep.subr.bf16.mxu1 %v221_v0  ;;  %v27_v4 = vld [vmem:[%s332_s1 + $0x20] sm:$0x11]  ;;  %v100_v5 = vsel %vm98_vm0, 65535, %v233_v1  ;;  %v226_v6 = vld [vmem:[%s332_s1 + $0x10] ss:$8 sps:$4 sm:$0xff]   ;;  %v231_v13 = vld [vmem:[%s333_s0 + $0x8] sm:$0xff]  }
   0x3   :  { %108 = vmatpush1.bf16.msra.mxu0 %v223_v2  ;;  %217 = vmatpush1.bf16.msra.mxu1 %v223_v2  ;;  %v209_v7 = vcombine.high %v27_v4, %v27_v4  ;;  %v208_v8 = vcombine.low %v27_v4, %v27_v4  ;;  %v229_v11 = vld [vmem:[%s333_s0] sm:$0xff]   ;;  %v230_v12 = vld [vmem:[%s333_s0 + $0x10] sm:$0xff]   ;;  %v232_v14 = vld [vmem:[%s333_s0 + $0x18] sm:$0xff]   ;;  %v31_v16 = vshrl.u32 %v30_v15, 7 }
   0x4   :  { %109 = vmatprep.subr.bf16.mxu0 %v224_v3  ;;  %215 = vmatprep.subr.bf16.mxu1 %v224_v3  ;;  %v28_v18 = vld [vmem:[%s334_s2] sm:$0x3] }
   0x5   :  { %v105_v9 = vand.u32 %v209_v7, %v100_v5  ;;  %v102_v10 = vand.u32 %v208_v8, %v100_v5  ;;  %v32_v17 = vsub.s32 0, %v31_v16  ;;  %v36_v19 = vsub.s32 1, %v31_v16 }
   0x7   :  { %110 = vmatpush1.bf16.msra.mxu0 %v226_v6  ;;  %218 = vmatpush1.bf16.msra.mxu1 %v226_v6  ;;  %v33_v20 = vrot.slane %v28_v18, %v32_v17  ;;  %v37_v21 = vrot.slane %v28_v18, %v36_v19 }
   0x8   :  { %111 = vmatprep.subr.bf16.mxu0 %v105_v9  ;;  %216 = vmatprep.subr.bf16.mxu1 %v105_v9 }
   0xb   :  { %112 = vmatpush1.bf16.msra.mxu0 %v102_v10  ;;  %219 = vmatpush1.bf16.msra.mxu1 %v102_v10 }
   0xe   :  { %210 = vmatmul.mubr.msk.bf16.vlgmr.msra.gmra.mrb[0].mxu0 %vm85_vm1, %v229_v11  ;;  %212 = vmatmul.mubr.msk.bf16.vlgmr.msra.gmra.mrb[0].mxu1 %vm85_vm1, %v230_v12 }
   0xf   :  { %149 = vmatprep.mubr.bf16.mxu0 %v233_v1  ;;  %169 = vmatprep.mubr.bf16.mxu1 %v233_v1 }
  0x16   :  { %211 = vmatmul.mubr.msk.bf16.gmra.mrb[4].mxu0 %vm85_vm1, %v231_v13  ;;  %213 = vmatmul.mubr.msk.bf16.gmra.mrb[4].mxu1 %vm85_vm1, %v232_v14 }
  0xe1   :  { %v141_v22 = vpop.f32.mrb[0].mxu0  ;;  %v161_v23 = vpop.f32.mrb[0].mxu1 }
  0xe2   :  { %v142_v24 = vadd.f32 %v141_v22, %v33_v20  ;;  %v162_v25 = vadd.f32 %v161_v23, %v33_v20  ;;  %v143_v26 = vpop.f32.mrb[1].mxu0  ;;  %v163_v27 = vpop.f32.mrb[1].mxu1 }
  0xe3   :  { %v144_v28 = vadd.f32 %v143_v26, %v37_v21  ;;  %v164_v29 = vadd.f32 %v163_v27, %v37_v21  ;;  %v145_v30 = vpop.f32.mrb[2].mxu0  ;;  %v165_v31 = vpop.f32.mrb[2].mxu1 }
  0xe4   :  { %180 = vst [vmem:[%s335_s3] sm:$0xff] %v142_v24  ;;  %188 = vst [vmem:[%s335_s3 + $0x40] sm:$0xff] %v162_v25  ;;  %v146_v32 = vadd.f32 %v145_v30, %v33_v20  ;;  %v166_v33 = vadd.f32 %v165_v31, %v33_v20  ;;  %v147_v34 = vpop.f32.mrb[3].mxu0  ;;  %v167_v35 = vpop.f32.mrb[3].mxu1 }
  0xe5   :  { %181 = vst [vmem:[%s335_s3 + $0x8] sm:$0xff] %v144_v28  ;;  %189 = vst [vmem:[%s335_s3 + $0x48] sm:$0xff] %v164_v29  ;;  %v148_v36 = vadd.f32 %v147_v34, %v37_v21  ;;  %v168_v37 = vadd.f32 %v167_v35, %v37_v21 }
  0xe6   :  { %182 = vst [vmem:[%s335_s3 + $0x10] sm:$0xff] %v146_v32  ;;  %190 = vst [vmem:[%s335_s3 + $0x50] sm:$0xff] %v166_v33 }
  0xe7   :  { %183 = vst [vmem:[%s335_s3 + $0x18] sm:$0xff] %v148_v36  ;;  %191 = vst [vmem:[%s335_s3 + $0x58] sm:$0xff] %v168_v37 }
  0xe9   :  { %v151_v38 = vpop.f32.mrb[4].mxu0  ;;  %v171_v39 = vpop.f32.mrb[4].mxu1 }
  0xea   :  { %v152_v40 = vadd.f32 %v151_v38, %v33_v20  ;;  %v172_v41 = vadd.f32 %v171_v39, %v33_v20  ;;  %v153_v42 = vpop.f32.mrb[5].mxu0  ;;  %v173_v43 = vpop.f32.mrb[5].mxu1 }
  0xeb   :  { %v154_v44 = vadd.f32 %v153_v42, %v37_v21  ;;  %v174_v45 = vadd.f32 %v173_v43, %v37_v21  ;;  %v155_v46 = vpop.f32.mrb[6].mxu0  ;;  %v175_v47 = vpop.f32.mrb[6].mxu1 }
  0xec   :  { %184 = vst [vmem:[%s335_s3 + $0x20] sm:$0xff] %v152_v40  ;;  %192 = vst [vmem:[%s335_s3 + $0x60] sm:$0xff] %v172_v41  ;;  %v156_v48 = vadd.f32 %v155_v46, %v33_v20  ;;  %v176_v49 = vadd.f32 %v175_v47, %v33_v20  ;;  %v157_v50 = vpop.f32.mrb[7].mxu0  ;;  %v177_v51 = vpop.f32.mrb[7].mxu1 }
  0xed   :  { %185 = vst [vmem:[%s335_s3 + $0x28] sm:$0xff] %v154_v44  ;;  %193 = vst [vmem:[%s335_s3 + $0x68] sm:$0xff] %v174_v45  ;;  %v158_v52 = vadd.f32 %v157_v50, %v37_v21  ;;  %v178_v53 = vadd.f32 %v177_v51, %v37_v21 }
  0xee   :  { %186 = vst [vmem:[%s335_s3 + $0x30] sm:$0xff] %v156_v48  ;;  %194 = vst [vmem:[%s335_s3 + $0x70] sm:$0xff] %v176_v49 }
  0xef   :  { %187 = vst [vmem:[%s335_s3 + $0x38] sm:$0xff] %v158_v52  ;;  %195 = vst [vmem:[%s335_s3 + $0x78] sm:$0xff] %v178_v53 }

// kernel: fwd.3
= control target key start
LH: loop header
LB: loop body
LE: loop exit
PB: predicated region body
PF: predicated region fallthrough
CT: control target
= control target key end

     0   :  { %v4717_v0 = vmov 0.0   ;;  %vm4718_vm0 = vmmov 0   ;;  %vm58_vm1 = vcmask 261120   ;;  %v4719_v6 = vmov 0   ;;  %s4720_s23 = smov 64   ;;  %s5914_s2 = inlined_call_operand.vmem [shape: bf16[32,128], index: 2, kind: input, shape index: {}]   ;;  %s5915_s1 = inlined_call_operand.vmem [shape: bf16[32,128], index: 1, kind: input, shape index: {}]   ;;  %s5916_s0 = inlined_call_operand.vmem [shape: bf16[8,8,32], index: 0, kind: input, shape index: {}]   ;;  %s5917_s3 = inlined_call_operand.vmem [shape: f32[1,128], index: 3, kind: input, shape index: {}]   ;;  %s5918_s4 = inlined_call_operand.vmem [shape: bf16[32,32], index: 4, kind: input, shape index: {}]   ;;  %s5919_s5 = inlined_call_operand.vmem [shape: bf16[32,32], index: 5, kind: input, shape index: {}]   ;;  %s5920_s6 = inlined_call_operand.vmem [shape: bf16[32,32], index: 6, kind: input, shape index: {}]   ;;  %s5921_s8 = inlined_call_operand.vmem [shape: f32[1,32], index: 8, kind: input, shape index: {}]   ;;  %s5922_s7 = inlined_call_operand.vmem [shape: f32[1,32], index: 7, kind: input, shape index: {}]   ;;  %s5923_s9 = inlined_call_operand.vmem [shape: f32[1,32], index: 9, kind: input, shape index: {}]   ;;  %s5924_s10 = inlined_call_operand.vmem [shape: f32[8,32], index: 10, kind: output, shape index: {}]  }
   0x1   :  { %4180 = vmatprep.subr.bf16.mxu0 %v4717_v0  ;;  %4188 = vmatprep.subr.bf16.mxu1 %v4717_v0  ;;  %v4783_v1 = vld [vmem:[%s5914_s2] sm:$0xff]   ;;  %v4798_v3 = vld [vmem:[%s5914_s2 + $0x8] sm:$0xff]   ;;  %vm294_vm2 = vcmask 253952   ;;  %vm2180_vm3 = vcmask 1043456   ;;  %vm2163_vm4 = vcmask 64512   ;;  %vm3926_vm5 = vcmask 1040384  }
   0x2   :  { %v4788_v2 = vld [vmem:[%s5915_s1] sm:$0xff]   ;;  %4184 = vmatprep.mubr.msk.bf16.mxu0 %vm4718_vm0, %v4717_v0  ;;  %4192 = vmatprep.mubr.msk.bf16.mxu1 %vm4718_vm0, %v4717_v0  ;;  %v4805_v4 = vld [vmem:[%s5915_s1 + $0x8] sm:$0xff]   ;;  %vm3928_vm6 = vcmask 1041408   ;;  %vm3930_vm7 = vcmask 1042432   ;;  %vm3933_vm8 = vcmask 1044480   ;;  %vm3935_vm9 = vcmask 1045504  }
   0x3   :  { %4181 = vmatpush3.bf16.msra.mxu0 %v4783_v1  ;;  %4189 = vmatpush3.bf16.msra.mxu1 %v4788_v2  ;;  %v45_v5 = vld [vmem:[%s5916_s0] sm:$0xf]  ;;  %v3951_v28 = vld [vmem:[%s5916_s0 + $0x4] sm:$0xf]  ;;  %v3955_v54 = vld [vmem:[%s5916_s0 + $0x8] sm:$0xf] }
   0x4   :  { %4182 = vmatprep.subr.bf16.mxu0 %v4717_v0  ;;  %4190 = vmatprep.subr.bf16.mxu1 %v4717_v0  ;;  %v4831_v8 = vld [vmem:[%s5917_s3] ss:$0 sm:$0xff]  ;;  %s4721_s3 = smov 32   ;;  %vm3937_vm10 = vcmask 1046528  }
   0x7   :  { %4183 = vmatpush3.bf16.msra.mxu0 %v4798_v3  ;;  %4191 = vmatpush3.bf16.msra.mxu1 %v4805_v4 }
   0x8   :  { %4196 = vmatprep.subr.bf16.mxu0 %v4717_v0  ;;  %4204 = vmatprep.subr.bf16.mxu1 %v4717_v0 }
   0xa   :  { %4185 = vmatmul.mubr.bf16.vlgmr.msra.gmra.mrb[0].mxu0 %v4719_v6  ;;  %4193 = vmatmul.mubr.msk.bf16.vlgmr.msra.gmra.mrb[0].mxu1 %vm58_vm1, %v45_v5 }
   0xb   :  { %4197 = vmatpush3.bf16.msra.mxu0 %v4783_v1  ;;  %4205 = vmatpush3.bf16.msra.mxu1 %v4788_v2 }
   0xc   :  { %4198 = vmatprep.subr.bf16.mxu0 %v4717_v0  ;;  %4206 = vmatprep.subr.bf16.mxu1 %v4717_v0 }
   0xd   :  { %4208 = vmatprep.mubr.msk.bf16.mxu1 %vm4718_vm0, %v4717_v0  ;;  %4200 = vmatprep.mubr.msk.bf16.mxu0 %vm4718_vm0, %v4717_v0 }
   0xf   :  { %4199 = vmatpush3.bf16.msra.mxu0 %v4798_v3  ;;  %4207 = vmatpush3.bf16.msra.mxu1 %v4805_v4 }
  0x10   :  { %4212 = vmatprep.subr.bf16.mxu0 %v4717_v0  ;;  %4220 = vmatprep.subr.bf16.mxu1 %v4717_v0 }
  0x12   :  { %4209 = vmatmul.mubr.msk.bf16.vlgmr.msra.gmra.mrb[4].mxu1 %vm58_vm1, %v3951_v28 }
  0x13   :  { %4221 = vmatpush3.bf16.msra.mxu1 %v4788_v2  ;;  %4224 = vmatprep.mubr.msk.bf16.mxu1 %vm4718_vm0, %v4717_v0 }
  0x14   :  { %4222 = vmatprep.subr.bf16.mxu1 %v4717_v0 }
  0x17   :  { %4223 = vmatpush3.bf16.msra.mxu1 %v4805_v4 }
  0x18   :  { %4236 = vmatprep.subr.bf16.mxu1 %v4717_v0 }
  0x1a   :  { %4225 = vmatmul.mubr.msk.bf16.vlgmr.msra.gmra.mrb[8].mxu1 %vm58_vm1, %v3955_v54 }
  0x1b   :  { %4237 = vmatpush3.bf16.msra.mxu1 %v4788_v2  ;;  %4240 = vmatprep.mubr.msk.bf16.mxu1 %vm4718_vm0, %v4717_v0 }
  0x1c   :  { %4238 = vmatprep.subr.bf16.mxu1 %v4717_v0 }
  0x1f   :  { %4239 = vmatpush3.bf16.msra.mxu1 %v4805_v4 }
  0x20   :  { %4252 = vmatprep.subr.bf16.mxu1 %v4717_v0 }
  0xdd   :  { %v96_v7 = vpop.f32.mrb[0].mxu0  ;;  %v151_v9 = vpop.f32.mrb[0].mxu1 }
  0xde   :  { %v4186_v10 = vpop.f32.mrb[1].mxu0  ;;  %v152_v11 = vadd.f32 %v151_v9, %v96_v7  ;;  %v4194_v12 = vpop.f32.mrb[1].mxu1 }
  0xdf   :  { %v99_v13 = vpop.f32.mrb[2].mxu0  ;;  %v154_v14 = vpop.f32.mrb[2].mxu1 }
  0xe0   :  { %v4187_v15 = vpop.f32.mrb[3].mxu0  ;;  %v163_v16 = vadd.f32 %v4831_v8, %v152_v11  ;;  %v4195_v17 = vpop.f32.mrb[3].mxu1 }
  0xe2   :  { %4612 = vtanh.f32 %v163_v16  ;;  %v3950_v19 = vmul.f32 -1.442695, %v163_v16 }
  0xe4   :  { %4614 = vpow2.f32 %v3950_v19 }
  0xe5   :  { %v389_v33 = vpop.f32.mrb[4].mxu1 }
  0xe6   :  { %v4210_v34 = vpop.f32.mrb[5].mxu1 }
  0xe7   :  { %v392_v35 = vpop.f32.mrb[6].mxu1 }
  0xe8   :  { %v4211_v36 = vpop.f32.mrb[7].mxu1 }
  0xec   :  { %v4613_v18 = vpop.eup %4612 }
  0xed   :  { %173 = vrot.lane.b32.xlu0 %v4613_v18, %s4720_s23  ;;  %v620_v59 = vpop.f32.mrb[8].mxu1 }
  0xee   :  { %v4615_v20 = vpop.eup %4614  ;;  %v4226_v60 = vpop.f32.mrb[9].mxu1 }
  0xef   :  { %v167_v21 = vadd.f32 1.0, %v4615_v20  ;;  %v623_v61 = vpop.f32.mrb[10].mxu1 }
  0xf0   :  { %v4227_v62 = vpop.f32.mrb[11].mxu1 }
  0xf1   :  { %4616 = vrcp.f32 %v167_v21 }
  0xfb   :  { %v4617_v22 = vpop.eup %4616 }
  0xfc   :  { %v171_v25 = vmul.f32 0.0, %v4617_v22 }
 0x15f   :  { %v174_v23 = vpop.permute.xlu0 %173 }
 0x160   :  { %v176_v24 = vmul.f32 %v4617_v22, %v174_v23 }
 0x162   :  { %178 = vrot.lane.b32.xlu0 %v176_v24, %s4721_s3 }
 0x1d4   :  { %v179_v26 = vpop.permute.xlu0 %178 }
 0x1d5   :  { %v181_v27 = vadd.f32 %v179_v26, %v171_v25 }
 0x1d7   :  { %4618 = vtanh.f32 %v181_v27 }
 0x1e1   :  { %v4619_v29 = vpop.eup %4618 }
 0x1e2   :  { %184 = vrot.lane.b32.xlu1 %v4619_v29, %s4720_s23 }
 0x254   :  { %v185_v30 = vpop.permute.xlu1 %184 }
 0x255   :  { %v4847_v31 = vmul.f32 %v4617_v22, %v185_v30  ;;  %v3959_v22 = vld [vmem:[%s5916_s0 + $0xc] sm:$0xf] }
 0x256   :  { %4241 = vmatmul.mubr.msk.bf16.vlgmr.msra.gmra.mrb[12].mxu1 %vm58_vm1, %v3959_v22 }
 0x257   :  { %v305_v32 = vpack.c.bf16 %v4847_v31, %v4847_v31  ;;  %4253 = vmatpush3.bf16.msra.mxu1 %v4788_v2  ;;  %4256 = vmatprep.mubr.msk.bf16.mxu1 %vm4718_vm0, %v4717_v0 }
 0x258   :  { %4254 = vmatprep.subr.bf16.mxu1 %v4717_v0 }
 0x259   :  { %307 = vrot.lane.b32.xlu1 %v305_v32, %s4721_s3 }
 0x25b   :  { %4255 = vmatpush3.bf16.msra.mxu1 %v4805_v4 }
 0x25c   :  { %4268 = vmatprep.subr.bf16.mxu1 %v4717_v0 }
 0x2cb   :  { %v308_v37 = vpop.permute.xlu1 %307 }
 0x2cc   :  { %4201 = vmatmul.mubr.msk.bf16.vlgmr.msra.gmra.mrb[4].mxu0 %vm58_vm1, %v308_v37 }
 0x2cd   :  { %4213 = vmatpush3.bf16.msra.mxu0 %v4783_v1  ;;  %4216 = vmatprep.mubr.msk.bf16.mxu0 %vm4718_vm0, %v4717_v0 }
 0x2ce   :  { %4214 = vmatprep.subr.bf16.mxu0 %v4717_v0 }
 0x2d1   :  { %4215 = vmatpush3.bf16.msra.mxu0 %v4798_v3 }
 0x2d2   :  { %4228 = vmatprep.subr.bf16.mxu0 %v4717_v0 }
 0x39f   :  { %v346_v38 = vpop.f32.mrb[4].mxu0 }
 0x3a0   :  { %v390_v39 = vadd.f32 %v389_v33, %v346_v38  ;;  %v4202_v40 = vpop.f32.mrb[5].mxu0 }
 0x3a1   :  { %v349_v41 = vpop.f32.mrb[6].mxu0 }
 0x3a2   :  { %v395_v42 = vadd.f32 %v4831_v8, %v390_v39  ;;  %v4203_v43 = vpop.f32.mrb[7].mxu0 }
 0x3a4   :  { %4620 = vtanh.f32 %v395_v42  ;;  %v3954_v45 = vmul.f32 -1.442695, %v395_v42 }
 0x3a6   :  { %4622 = vpow2.f32 %v3954_v45 }
 0x3ae   :  { %v4621_v44 = vpop.eup %4620 }
 0x3af   :  { %405 = vrot.lane.b32.xlu0 %v4621_v44, %s4720_s23 }
 0x3b0   :  { %v4623_v46 = vpop.eup %4622 }
 0x3b1   :  { %v399_v47 = vadd.f32 1.0, %v4623_v46 }
 0x3b3   :  { %4624 = vrcp.f32 %v399_v47 }
 0x3bd   :  { %v4625_v48 = vpop.eup %4624 }
 0x3be   :  { %v403_v51 = vmul.f32 %v4625_v48, %v181_v27  ;;  %v851_v27 = vpop.f32.mrb[12].mxu1 }
 0x3bf   :  { %v4242_v28 = vpop.f32.mrb[13].mxu1 }
 0x3c0   :  { %v854_v29 = vpop.f32.mrb[14].mxu1 }
 0x3c1   :  { %v4243_v30 = vpop.f32.mrb[15].mxu1 }
 0x421   :  { %v406_v49 = vpop.permute.xlu0 %405 }
 0x422   :  { %v408_v50 = vmul.f32 %v4625_v48, %v406_v49  ;;  %v3963_v49 = vld [vmem:[%s5916_s0 + $0x10] sm:$0xf] }
 0x423   :  { %4257 = vmatmul.mubr.msk.bf16.vlgmr.msra.gmra.mrb[16].mxu1 %vm58_vm1, %v3963_v49 }
 0x424   :  { %410 = vrot.lane.b32.xlu1 %v408_v50, %s4721_s3  ;;  %4269 = vmatpush3.bf16.msra.mxu1 %v4788_v2 }
 0x425   :  { %4272 = vmatprep.mubr.msk.bf16.mxu1 %vm4718_vm0, %v4717_v0  ;;  %4270 = vmatprep.subr.bf16.mxu1 %v4717_v0 }
 0x428   :  { %4271 = vmatpush3.bf16.msra.mxu1 %v4805_v4 }
 0x429   :  { %4284 = vmatprep.subr.bf16.mxu1 %v4717_v0 }
 0x496   :  { %v411_v52 = vpop.permute.xlu1 %410 }
 0x497   :  { %v413_v53 = vadd.f32 %v411_v52, %v403_v51 }
 0x499   :  { %4626 = vtanh.f32 %v413_v53 }
 0x4a3   :  { %v4627_v55 = vpop.eup %4626 }
 0x4a4   :  { %416 = vrot.lane.b32.xlu0 %v4627_v55, %s4720_s23 }
 0x4f6   :  { %v1082_v54 = vpop.f32.mrb[16].mxu1 }
 0x4f7   :  { %v4258_v55 = vpop.f32.mrb[17].mxu1 }
 0x516   :  { %v417_v56 = vpop.permute.xlu0 %416 }
 0x517   :  { %v4873_v57 = vmul.f32 %v4625_v48, %v417_v56  ;;  %v1085_v56 = vpop.f32.mrb[18].mxu1 }
 0x519   :  { %v536_v58 = vpack.c.bf16 %v4873_v57, %v4873_v57 }
 0x51b   :  { %538 = vrot.lane.b32.xlu1 %v536_v58, %s4721_s3  ;;  %v4259_v58 = vpop.f32.mrb[19].mxu1 }
 0x58d   :  { %v539_v63 = vpop.permute.xlu1 %538 }
 0x58e   :  { %4217 = vmatmul.mubr.msk.bf16.vlgmr.msra.gmra.mrb[8].mxu0 %vm58_vm1, %v539_v63 }
 0x58f   :  { %4229 = vmatpush3.bf16.msra.mxu0 %v4783_v1  ;;  %4232 = vmatprep.mubr.msk.bf16.mxu0 %vm4718_vm0, %v4717_v0 }
 0x590   :  { %4230 = vmatprep.subr.bf16.mxu0 %v4717_v0 }
 0x593   :  { %4231 = vmatpush3.bf16.msra.mxu0 %v4798_v3 }
 0x594   :  { %4244 = vmatprep.subr.bf16.mxu0 %v4717_v0 }
 0x661   :  { %v577_v5 = vpop.f32.mrb[8].mxu0 }
 0x662   :  { %v621_v6 = vadd.f32 %v620_v59, %v577_v5  ;;  %v4218_v7 = vpop.f32.mrb[9].mxu0 }
 0x663   :  { %v580_v9 = vpop.f32.mrb[10].mxu0 }
 0x664   :  { %v626_v10 = vadd.f32 %v4831_v8, %v621_v6  ;;  %v4219_v11 = vpop.f32.mrb[11].mxu0 }
 0x666   :  { %4628 = vtanh.f32 %v626_v10  ;;  %v3958_v13 = vmul.f32 -1.442695, %v626_v10 }
 0x668   :  { %4630 = vpow2.f32 %v3958_v13 }
 0x670   :  { %v4629_v12 = vpop.eup %4628 }
 0x671   :  { %636 = vrot.lane.b32.xlu0 %v4629_v12, %s4720_s23 }
 0x672   :  { %v4631_v14 = vpop.eup %4630 }
 0x673   :  { %v630_v15 = vadd.f32 1.0, %v4631_v14 }
 0x675   :  { %4632 = vrcp.f32 %v630_v15 }
 0x67f   :  { %v4633_v16 = vpop.eup %4632 }
 0x680   :  { %v634_v19 = vmul.f32 %v4633_v16, %v413_v53 }
 0x6e3   :  { %v637_v17 = vpop.permute.xlu0 %636 }
 0x6e4   :  { %v639_v18 = vmul.f32 %v4633_v16, %v637_v17 }
 0x6e6   :  { %641 = vrot.lane.b32.xlu1 %v639_v18, %s4721_s3  ;;  %v3967_v18 = vld [vmem:[%s5916_s0 + $0x14] sm:$0xf] }
 0x6e7   :  { %4273 = vmatmul.mubr.msk.bf16.vlgmr.msra.gmra.mrb[20].mxu1 %vm58_vm1, %v3967_v18 }
 0x6e8   :  { %4285 = vmatpush3.bf16.msra.mxu1 %v4788_v2  ;;  %4288 = vmatprep.mubr.msk.bf16.mxu1 %vm4718_vm0, %v4717_v0 }
 0x6e9   :  { %4286 = vmatprep.subr.bf16.mxu1 %v4717_v0 }
 0x6ec   :  { %4287 = vmatpush3.bf16.msra.mxu1 %v4805_v4 }
 0x6ed   :  { %4300 = vmatprep.subr.bf16.mxu1 %v4717_v0 }
 0x758   :  { %v642_v20 = vpop.permute.xlu1 %641 }
 0x759   :  { %v644_v21 = vadd.f32 %v642_v20, %v634_v19 }
 0x75b   :  { %4634 = vtanh.f32 %v644_v21 }
 0x765   :  { %v4635_v23 = vpop.eup %4634 }
 0x766   :  { %647 = vrot.lane.b32.xlu0 %v4635_v23, %s4720_s23 }
 0x7ba   :  { %v1313_v23 = vpop.f32.mrb[20].mxu1 }
 0x7d8   :  { %v648_v24 = vpop.permute.xlu0 %647 }
 0x7d9   :  { %v4899_v25 = vmul.f32 %v4633_v16, %v648_v24  ;;  %v4274_v24 = vpop.f32.mrb[21].mxu1 }
 0x7db   :  { %v767_v26 = vpack.c.bf16 %v4899_v25, %v4899_v25 }
 0x7dd   :  { %769 = vrot.lane.b32.xlu1 %v767_v26, %s4721_s3  ;;  %v1316_v26 = vpop.f32.mrb[22].mxu1 }
 0x84f   :  { %v770_v32 = vpop.permute.xlu1 %769 }
 0x850   :  { %4233 = vmatmul.mubr.msk.bf16.vlgmr.msra.gmra.mrb[12].mxu0 %vm58_vm1, %v770_v32 }
 0x851   :  { %4245 = vmatpush3.bf16.msra.mxu0 %v4783_v1  ;;  %4248 = vmatprep.mubr.msk.bf16.mxu0 %vm4718_vm0, %v4717_v0 }
 0x852   :  { %4246 = vmatprep.subr.bf16.mxu0 %v4717_v0 }
 0x855   :  { %4247 = vmatpush3.bf16.msra.mxu0 %v4798_v3 }
 0x856   :  { %4260 = vmatprep.subr.bf16.mxu0 %v4717_v0 }
 0x923   :  { %v808_v33 = vpop.f32.mrb[12].mxu0 }
 0x924   :  { %v852_v34 = vadd.f32 %v851_v27, %v808_v33  ;;  %v4234_v35 = vpop.f32.mrb[13].mxu0  ;;  %v4275_v27 = vpop.f32.mrb[23].mxu1 }
 0x925   :  { %v811_v36 = vpop.f32.mrb[14].mxu0 }
 0x926   :  { %v857_v37 = vadd.f32 %v4831_v8, %v852_v34  ;;  %v4235_v38 = vpop.f32.mrb[15].mxu0 }
 0x928   :  { %4636 = vtanh.f32 %v857_v37  ;;  %v3962_v40 = vmul.f32 -1.442695, %v857_v37 }
 0x92a   :  { %4638 = vpow2.f32 %v3962_v40 }
 0x932   :  { %v4637_v39 = vpop.eup %4636 }
 0x933   :  { %867 = vrot.lane.b32.xlu0 %v4637_v39, %s4720_s23 }
 0x934   :  { %v4639_v41 = vpop.eup %4638 }
 0x935   :  { %v861_v42 = vadd.f32 1.0, %v4639_v41 }
 0x937   :  { %4640 = vrcp.f32 %v861_v42 }
 0x941   :  { %v4641_v43 = vpop.eup %4640 }
 0x942   :  { %v865_v46 = vmul.f32 %v4641_v43, %v644_v21 }
 0x9a5   :  { %v868_v44 = vpop.permute.xlu0 %867 }
 0x9a6   :  { %v870_v45 = vmul.f32 %v4641_v43, %v868_v44 }
 0x9a8   :  { %872 = vrot.lane.b32.xlu1 %v870_v45, %s4721_s3 }
 0xa1a   :  { %v873_v47 = vpop.permute.xlu1 %872 }
 0xa1b   :  { %v875_v48 = vadd.f32 %v873_v47, %v865_v46  ;;  %v3971_v46 = vld [vmem:[%s5916_s0 + $0x18] sm:$0xf] }
 0xa1c   :  { %4289 = vmatmul.mubr.msk.bf16.vlgmr.msra.gmra.mrb[24].mxu1 %vm58_vm1, %v3971_v46 }
 0xa1d   :  { %4642 = vtanh.f32 %v875_v48  ;;  %4301 = vmatpush3.bf16.msra.mxu1 %v4788_v2  ;;  %4304 = vmatprep.mubr.msk.bf16.mxu1 %vm4718_vm0, %v4717_v0 }
 0xa1e   :  { %4302 = vmatprep.subr.bf16.mxu1 %v4717_v0 }
 0xa21   :  { %4303 = vmatpush3.bf16.msra.mxu1 %v4805_v4 }
 0xa22   :  { %4316 = vmatprep.subr.bf16.mxu1 %v4717_v0 }
 0xa27   :  { %v4643_v50 = vpop.eup %4642 }
 0xa28   :  { %878 = vrot.lane.b32.xlu0 %v4643_v50, %s4720_s23 }
 0xa9a   :  { %v879_v51 = vpop.permute.xlu0 %878 }
 0xa9b   :  { %v4925_v52 = vmul.f32 %v4641_v43, %v879_v51 }
 0xa9d   :  { %v998_v53 = vpack.c.bf16 %v4925_v52, %v4925_v52 }
 0xa9f   :  { %1000 = vrot.lane.b32.xlu1 %v998_v53, %s4721_s3 }
 0xaef   :  { %v1544_v2 = vpop.f32.mrb[24].mxu1 }
 0xaf0   :  { %v4290_v51 = vpop.f32.mrb[25].mxu1 }
 0xaf1   :  { %v1547_v53 = vpop.f32.mrb[26].mxu1 }
 0xb11   :  { %v1001_v59 = vpop.permute.xlu1 %1000 }
 0xb12   :  { %4249 = vmatmul.mubr.msk.bf16.vlgmr.msra.gmra.mrb[16].mxu0 %vm58_vm1, %v1001_v59 }
 0xb13   :  { %4261 = vmatpush3.bf16.msra.mxu0 %v4783_v1  ;;  %4264 = vmatprep.mubr.msk.bf16.mxu0 %vm4718_vm0, %v4717_v0 }
 0xb14   :  { %4262 = vmatprep.subr.bf16.mxu0 %v4717_v0 }
 0xb17   :  { %4263 = vmatpush3.bf16.msra.mxu0 %v4798_v3 }
 0xb18   :  { %4276 = vmatprep.subr.bf16.mxu0 %v4717_v0 }
 0xbe5   :  { %v1039_v60 = vpop.f32.mrb[16].mxu0 }
 0xbe6   :  { %v1083_v61 = vadd.f32 %v1082_v54, %v1039_v60  ;;  %v4250_v62 = vpop.f32.mrb[17].mxu0  ;;  %v4291_v54 = vpop.f32.mrb[27].mxu1 }
 0xbe7   :  { %v1042_v63 = vpop.f32.mrb[18].mxu0 }
 0xbe8   :  { %v1088_v5 = vadd.f32 %v4831_v8, %v1083_v61  ;;  %v4251_v6 = vpop.f32.mrb[19].mxu0 }
 0xbea   :  { %4644 = vtanh.f32 %v1088_v5  ;;  %v3966_v9 = vmul.f32 -1.442695, %v1088_v5 }
 0xbec   :  { %4646 = vpow2.f32 %v3966_v9 }
 0xbf4   :  { %v4645_v7 = vpop.eup %4644 }
 0xbf5   :  { %1098 = vrot.lane.b32.xlu0 %v4645_v7, %s4720_s23 }
 0xbf6   :  { %v4647_v10 = vpop.eup %4646 }
 0xbf7   :  { %v1092_v11 = vadd.f32 1.0, %v4647_v10 }
 0xbf9   :  { %4648 = vrcp.f32 %v1092_v11 }
 0xc03   :  { %v4649_v12 = vpop.eup %4648 }
 0xc04   :  { %v1096_v15 = vmul.f32 %v4649_v12, %v875_v48 }
 0xc67   :  { %v1099_v13 = vpop.permute.xlu0 %1098 }
 0xc68   :  { %v1101_v14 = vmul.f32 %v4649_v12, %v1099_v13 }
 0xc6a   :  { %1103 = vrot.lane.b32.xlu1 %v1101_v14, %s4721_s3 }
 0xcdc   :  { %v1104_v16 = vpop.permute.xlu1 %1103 }
 0xcdd   :  { %v1106_v17 = vadd.f32 %v1104_v16, %v1096_v15 }
 0xcdf   :  { %4650 = vtanh.f32 %v1106_v17 }
 0xce9   :  { %v4651_v19 = vpop.eup %4650 }
 0xcea   :  { %1109 = vrot.lane.b32.xlu0 %v4651_v19, %s4720_s23 }
 0xd5c   :  { %v1110_v20 = vpop.permute.xlu0 %1109 }
 0xd5d   :  { %v4951_v21 = vmul.f32 %v4649_v12, %v1110_v20  ;;  %v3975_v12 = vld [vmem:[%s5916_s0 + $0x1c] sm:$0xf] }
 0xd5e   :  { %4305 = vmatmul.mubr.msk.bf16.vlgmr.msra.gmra.mrb[28].mxu1 %vm58_vm1, %v3975_v12 }
 0xd5f   :  { %v1229_v22 = vpack.c.bf16 %v4951_v21, %v4951_v21  ;;  %4320 = vmatprep.mubr.msk.bf16.mxu1 %vm4718_vm0, %v4717_v0 }
 0xd61   :  { %1231 = vrot.lane.b32.xlu1 %v1229_v22, %s4721_s3 }
 0xdd3   :  { %v1232_v28 = vpop.permute.xlu1 %1231 }
 0xdd4   :  { %4265 = vmatmul.mubr.msk.bf16.vlgmr.msra.gmra.mrb[20].mxu0 %vm58_vm1, %v1232_v28 }
 0xdd5   :  { %4277 = vmatpush3.bf16.msra.mxu0 %v4783_v1  ;;  %4280 = vmatprep.mubr.msk.bf16.mxu0 %vm4718_vm0, %v4717_v0 }
 0xdd6   :  { %4278 = vmatprep.subr.bf16.mxu0 %v4717_v0 }
 0xdd9   :  { %4279 = vmatpush3.bf16.msra.mxu0 %v4798_v3 }
 0xdda   :  { %4292 = vmatprep.subr.bf16.mxu0 %v4717_v0 }
 0xea7   :  { %v1270_v29 = vpop.f32.mrb[20].mxu0 }
 0xea8   :  { %v1314_v30 = vadd.f32 %v1313_v23, %v1270_v29  ;;  %v4266_v32 = vpop.f32.mrb[21].mxu0 }
 0xea9   :  { %v1273_v33 = vpop.f32.mrb[22].mxu0 }
 0xeaa   :  { %v1319_v34 = vadd.f32 %v4831_v8, %v1314_v30  ;;  %v4267_v35 = vpop.f32.mrb[23].mxu0 }
 0xeac   :  { %4652 = vtanh.f32 %v1319_v34  ;;  %v3970_v37 = vmul.f32 -1.442695, %v1319_v34  ;;  %v4722_v34 = vmov 1966171168  }
 0xead   :  { %v191_v35 = vunpack.c.l.s4 %v4722_v34 }
 0xeae   :  { %4654 = vpow2.f32 %v3970_v37 }
 0xeb6   :  { %v4653_v36 = vpop.eup %4652 }
 0xeb7   :  { %1329 = vrot.lane.b32.xlu0 %v4653_v36, %s4720_s23  ;;  %v193_v36 = vlaneseq }
 0xeb8   :  { %v4655_v38 = vpop.eup %4654 }
 0xeb9   :  { %v1323_v39 = vadd.f32 1.0, %v4655_v38  ;;  %v192_v38 = vunpack.c.0.s8 %v191_v35 }
 0xebb   :  { %4656 = vrcp.f32 %v1323_v39  ;;  %v194_v39 = vshrl.u32 %v193_v36, 7 }
 0xebd   :  { %v5023_v46 = vsub.s32 0, %v194_v39 }
 0xec5   :  { %v4657_v40 = vpop.eup %4656 }
 0xec6   :  { %v1327_v43 = vmul.f32 %v4657_v40, %v1106_v17  ;;  %v1775_v17 = vpop.f32.mrb[28].mxu1 }
 0xec7   :  { %v4306_v18 = vpop.f32.mrb[29].mxu1 }
 0xec8   :  { %v1778_v19 = vpop.f32.mrb[30].mxu1  ;;  %v5106_v18 = vld [vmem:[%s5918_s4 + $0x8] sm:$0xff]  }
 0xec9   :  { %v4307_v20 = vpop.f32.mrb[31].mxu1  ;;  %v5111_v19 = vld [vmem:[%s5919_s5 + $0x8] sm:$0xff]  }
 0xf29   :  { %v1330_v41 = vpop.permute.xlu0 %1329 }
 0xf2a   :  { %v1332_v42 = vmul.f32 %v4657_v40, %v1330_v41 }
 0xf2c   :  { %1334 = vrot.lane.b32.xlu1 %v1332_v42, %s4721_s3 }
 0xf9e   :  { %v1335_v44 = vpop.permute.xlu1 %1334 }
 0xf9f   :  { %v1337_v45 = vadd.f32 %v1335_v44, %v1327_v43 }
 0xfa1   :  { %4658 = vtanh.f32 %v1337_v45 }
 0xfab   :  { %v4659_v47 = vpop.eup %4658 }
 0xfac   :  { %1340 = vrot.lane.b32.xlu0 %v4659_v47, %s4720_s23 }
0x101e   :  { %v1341_v48 = vpop.permute.xlu0 %1340 }
0x101f   :  { %v4977_v49 = vmul.f32 %v4657_v40, %v1341_v48  ;;  %v5009_v40 = vsub.s32 %v192_v38, %v194_v39 }
0x1021   :  { %v1460_v50 = vpack.c.bf16 %v4977_v49, %v4977_v49  ;;  %v5017_v43 = vrot.slane %v4899_v25, %v5009_v40  ;;  %v5028_v47 = vrot.slane %v4951_v21, %v5009_v40 }
0x1023   :  { %1462 = vrot.lane.b32.xlu1 %v1460_v50, %s4721_s3  ;;  %v5034_v50 = vrot.slane %v5017_v43, %v5009_v40  ;;  %v5045_v53 = vrot.slane %v5028_v47, %v5009_v40 }
0x1025   :  { %v704_v51 = vrot.slane %v5034_v50, %v5023_v46  ;;  %v1166_v54 = vrot.slane %v5045_v53, %v5023_v46 }
0x1095   :  { %v1463_v55 = vpop.permute.xlu1 %1462 }
0x1096   :  { %4281 = vmatmul.mubr.msk.bf16.vlgmr.msra.gmra.mrb[24].mxu0 %vm58_vm1, %v1463_v55 }
0x1097   :  { %4293 = vmatpush3.bf16.msra.mxu0 %v4783_v1  ;;  %4296 = vmatprep.mubr.msk.bf16.mxu0 %vm4718_vm0, %v4717_v0 }
0x1098   :  { %4294 = vmatprep.subr.bf16.mxu0 %v4717_v0 }
0x109b   :  { %4295 = vmatpush3.bf16.msra.mxu0 %v4798_v3 }
0x109c   :  { %4308 = vmatprep.subr.bf16.mxu0 %v4717_v0 }
0x1169   :  { %v1501_v4 = vpop.f32.mrb[24].mxu0 }
0x116a   :  { %v1545_v56 = vadd.f32 %v1544_v2, %v1501_v4  ;;  %v4282_v58 = vpop.f32.mrb[25].mxu0 }
0x116b   :  { %v1504_v59 = vpop.f32.mrb[26].mxu0 }
0x116c   :  { %v1550_v60 = vadd.f32 %v4831_v8, %v1545_v56  ;;  %v4283_v61 = vpop.f32.mrb[27].mxu0 }
0x116d   :  { %v5061_v61 = vrot.slane %v4873_v57, %v5009_v40 }
0x116e   :  { %4660 = vtanh.f32 %v1550_v60  ;;  %v3974_v1 = vmul.f32 -1.442695, %v1550_v60 }
0x1170   :  { %4662 = vpow2.f32 %v3974_v1  ;;  %v890_v1 = vrot.slane %v4925_v52, %v5009_v40 }
0x1178   :  { %v4661_v62 = vpop.eup %4660 }
0x1179   :  { %1560 = vrot.lane.b32.xlu0 %v4661_v62, %s4720_s23 }
0x117a   :  { %v4663_v63 = vpop.eup %4662 }
0x117b   :  { %v1554_v5 = vadd.f32 1.0, %v4663_v63 }
0x117d   :  { %4664 = vrcp.f32 %v1554_v5  ;;  %v5068_v5 = vrot.slane %v5061_v61, %v5009_v40 }
0x1187   :  { %v4665_v6 = vpop.eup %4664 }
0x1188   :  { %v1558_v9 = vmul.f32 %v4665_v6, %v1337_v45 }
0x11eb   :  { %v1561_v3 = vpop.permute.xlu0 %1560 }
0x11ec   :  { %v1563_v7 = vmul.f32 %v4665_v6, %v1561_v3  ;;  %v1352_v3 = vrot.slane %v4977_v49, %v5009_v40 }
0x11ee   :  { %1565 = vrot.lane.b32.xlu1 %v1563_v7, %s4721_s3  ;;  %v5084_v12 = vrot.slane %v1352_v3, %v5009_v40 }
0x1260   :  { %v1566_v10 = vpop.permute.xlu1 %1565 }
0x1261   :  { %v1568_v11 = vadd.f32 %v1566_v10, %v1558_v9  ;;  %v473_v9 = vrot.slane %v5068_v5, %v5023_v46  ;;  %v5077_v10 = vrot.slane %v890_v1, %v5009_v40 }
0x1263   :  { %4666 = vtanh.f32 %v1568_v11 }
0x126d   :  { %v4667_v13 = vpop.eup %4666 }
0x126e   :  { %1571 = vrot.lane.b32.xlu0 %v4667_v13, %s4720_s23  ;;  %v1397_v13 = vrot.slane %v5084_v12, %v5023_v46 }
0x12e0   :  { %v1572_v14 = vpop.permute.xlu0 %1571 }
0x12e1   :  { %v4999_v15 = vmul.f32 %v4665_v6, %v1572_v14  ;;  %v5093_v14 = vld [vmem:[%s5918_s4] sm:$0xff]  }
0x12e3   :  { %v1691_v16 = vpack.c.bf16 %v4999_v15, %v4999_v15  ;;  %v5039_v2 = vrot.slane %v4999_v15, %v5009_v40 }
0x12e5   :  { %1693 = vrot.lane.b32.xlu1 %v1691_v16, %s4721_s3  ;;  %v5052_v55 = vrot.slane %v5039_v2, %v5009_v40  ;;  %v5098_v16 = vld [vmem:[%s5919_s5] sm:$0xff]  }
0x12e6   :  { %4317 = vmatpush3.bf16.msra.mxu1 %v5098_v16 }
0x12e7   :  { %v1628_v4 = vrot.slane %v5052_v55, %v5023_v46  ;;  %4318 = vmatprep.subr.bf16.mxu1 %v4717_v0 }
0x12ea   :  { %4319 = vmatpush3.bf16.msra.mxu1 %v5111_v19 }
0x12eb   :  { %4332 = vmatprep.subr.bf16.mxu1 %v4717_v0 }
0x1357   :  { %v1694_v22 = vpop.permute.xlu1 %1693 }
0x1358   :  { %4297 = vmatmul.mubr.msk.bf16.vlgmr.msra.gmra.mrb[28].mxu0 %vm58_vm1, %v1694_v22 }
0x1359   :  { %4312 = vmatprep.mubr.msk.bf16.mxu0 %vm4718_vm0, %v4717_v0  ;;  %4309 = vmatpush3.bf16.msra.mxu0 %v5093_v14 }
0x135a   :  { %4310 = vmatprep.subr.bf16.mxu0 %v4717_v0 }
0x135d   :  { %4311 = vmatpush3.bf16.msra.mxu0 %v5106_v18 }
0x135e   :  { %4324 = vmatprep.subr.bf16.mxu0 %v4717_v0 }
0x142b   :  { %v1732_v23 = vpop.f32.mrb[28].mxu0 }
0x142c   :  { %v1776_v24 = vadd.f32 %v1775_v17, %v1732_v23  ;;  %v4298_v26 = vpop.f32.mrb[29].mxu0 }
0x142d   :  { %v1735_v27 = vpop.f32.mrb[30].mxu0 }
0x142e   :  { %v1781_v28 = vadd.f32 %v4831_v8, %v1776_v24  ;;  %v4299_v29 = vpop.f32.mrb[31].mxu0  ;;  %v5013_v8 = vrot.slane %v4847_v31, %v5009_v40  ;;  %v898_v27 = vcombine.high %v890_v1, %v890_v1 }
0x1430   :  { %4668 = vtanh.f32 %v1781_v28  ;;  %v3978_v32 = vmul.f32 -1.442695, %v1781_v28  ;;  %v5021_v45 = vrot.slane %v5013_v8, %v5009_v40  ;;  %v204_v23 = vcombine.high %v5013_v8, %v5013_v8 }
0x1431   :  { %v5141_v34 = vrot.slane %v898_v27, %v5009_v40 }
0x1432   :  { %4670 = vpow2.f32 %v3978_v32  ;;  %v241_v48 = vrot.slane %v5021_v45, %v5023_v46  ;;  %v5134_v29 = vrot.slane %v204_v23, %v5009_v40  ;;  %v1360_v32 = vcombine.high %v1352_v3, %v1352_v3 }
0x1433   :  { %v939_v36 = vrot.slane %v5141_v34, %v5023_v46 }
0x143a   :  { %v4669_v30 = vpop.eup %4668 }
0x143b   :  { %1791 = vrot.lane.b32.xlu0 %v4669_v30, %s4720_s23 }
0x143c   :  { %v4671_v33 = vpop.eup %4670 }
0x143d   :  { %v1785_v37 = vadd.f32 1.0, %v4671_v33  ;;  %v245_v33 = vrot.slane %v5134_v29, %v5023_v46 }
0x143f   :  { %4672 = vrcp.f32 %v1785_v37  ;;  %v5148_v37 = vrot.slane %v1360_v32, %v5009_v40 }
0x1441   :  { %v1401_v38 = vrot.slane %v5148_v37, %v5023_v46 }
0x1449   :  { %v4673_v41 = vpop.eup %4672 }
0x144a   :  { %v1789_v56 = vmul.f32 %v4673_v41, %v1568_v11  ;;  %v935_v11 = vrot.slane %v5077_v10, %v5023_v46 }
0x14ad   :  { %v1792_v42 = vpop.permute.xlu0 %1791 }
0x14ae   :  { %v1794_v44 = vmul.f32 %v4673_v41, %v1792_v42 }
0x14b0   :  { %1796 = vrot.lane.b32.xlu1 %v1794_v44, %s4721_s3  ;;  %v5159_v44 = vld [vmem:[%s5920_s6] sm:$0xff]  }
0x14b4   :  { %270 = vrot.lane.b32.xlu1 %v241_v48, %s4721_s3 }
0x14b8   :  { %733 = vrot.lane.b32.xlu1 %v704_v51, %s4721_s3 }
0x14bc   :  { %1195 = vrot.lane.b32.xlu1 %v1166_v54, %s4721_s3  ;;  %v5168_v54 = vld [vmem:[%s5920_s6 + $0x8] sm:$0xff]  }
0x14c0   :  { %1657 = vrot.lane.b32.xlu1 %v1628_v4, %s4721_s3  ;;  %v5184_v4 = vld [vmem:[%s5921_s8] ss:$0 sm:$0xff] }
0x1522   :  { %v1797_v58 = vpop.permute.xlu1 %1796 }
0x1523   :  { %v1799_v59 = vadd.f32 %v1797_v58, %v1789_v56  ;;  %v5189_v56 = vld [vmem:[%s5922_s7] ss:$0 sm:$0xff] }
0x1525   :  { %4674 = vtanh.f32 %v1799_v59 }
0x1526   :  { %v271_v60 = vpop.permute.xlu1 %270 }
0x1527   :  { %295 = vst.msk [vmem:[#allocation2] sm:$0x1] %vm294_vm2, %v271_v60 }
0x152a   :  { %v734_v62 = vpop.permute.xlu1 %733 }
0x152b   :  { %757 = vst.msk [vmem:[#allocation2 + $0x2] sm:$0x1] %vm294_vm2, %v734_v62 }
0x152e   :  { %v1196_v63 = vpop.permute.xlu1 %1195 }
0x152f   :  { %v4675_v6 = vpop.eup %4674  ;;  %1219 = vst.msk [vmem:[#allocation2 + $0x4] sm:$0x1] %vm294_vm2, %v1196_v63 }
0x1530   :  { %1802 = vrot.lane.b32.xlu0 %v4675_v6, %s4720_s23 }
0x1532   :  { %v1658_v7 = vpop.permute.xlu1 %1657 }
0x1533   :  { %1681 = vst.msk [vmem:[#allocation2 + $0x6] sm:$0x1] %vm294_vm2, %v1658_v7 }
0x1534   :  { %502 = vrot.lane.b32.xlu0 %v473_v9, %s4721_s3 }
0x1538   :  { %964 = vrot.lane.b32.xlu0 %v935_v11, %s4721_s3 }
0x153c   :  { %1426 = vrot.lane.b32.xlu0 %v1397_v13, %s4721_s3 }
0x15a2   :  { %v1803_v17 = vpop.permute.xlu0 %1802 }
0x15a3   :  { %v5113_v20 = vmul.f32 %v4673_v41, %v1803_v17  ;;  %v5197_v17 = vld [vmem:[%s5923_s9] ss:$0 sm:$0xff] }
0x15a5   :  { %v5118_v22 = vrot.slane %v5113_v20, %v5009_v40 }
0x15a6   :  { %v503_v24 = vpop.permute.xlu0 %502 }
0x15a7   :  { %v5127_v26 = vrot.slane %v5118_v22, %v5009_v40  ;;  %526 = vst.msk [vmem:[#allocation2 + $0x1] sm:$0x1] %vm294_vm2, %v503_v24 }
0x15a9   :  { %v1859_v28 = vrot.slane %v5127_v26, %v5023_v46 }
0x15aa   :  { %v965_v30 = vpop.permute.xlu0 %964 }
0x15ab   :  { %988 = vst.msk [vmem:[#allocation2 + $0x3] sm:$0x1] %vm294_vm2, %v965_v30  ;;  %1888 = vrot.lane.b32.xlu0 %v1859_v28, %s4721_s3 }
0x15ae   :  { %v1427_v35 = vpop.permute.xlu0 %1426 }
0x15af   :  { %1450 = vst.msk [vmem:[#allocation2 + $0x5] sm:$0x1] %vm294_vm2, %v1427_v35  ;;  %272 = vrot.lane.b32.xlu0 %v245_v33, %s4721_s3 }
0x15b3   :  { %966 = vrot.lane.b32.xlu0 %v939_v36, %s4721_s3 }
0x15b7   :  { %1428 = vrot.lane.b32.xlu0 %v1401_v38, %s4721_s3 }
0x161d   :  { %v1889_v39 = vpop.permute.xlu0 %1888 }
0x161e   :  { %1912 = vst.msk [vmem:[#allocation2 + $0x7] sm:$0x1] %vm294_vm2, %v1889_v39 }
0x1621   :  { %v273_v8 = vpop.permute.xlu0 %272 }
0x1622   :  { %296 = vst.msk [vmem:[#allocation2 + $0x8] sm:$0x1] %vm294_vm2, %v273_v8 }
0x1625   :  { %v967_v41 = vpop.permute.xlu0 %966  ;;  %v1935_v42 = vld [vmem:[#allocation2] sm:$0xff] }
0x1626   :  { %989 = vst.msk [vmem:[#allocation2 + $0xb] sm:$0x1] %vm294_vm2, %v967_v41  ;;  %v1936_v48 = vpack.c.bf16 %v1935_v42, %v1935_v42 }
0x1628   :  { %4313 = vmatmul.mubr.msk.bf16.vlgmr.msra.gmra.mrb[32].mxu0 %vm58_vm1, %v1936_v48  ;;  %4321 = vmatmul.mubr.msk.bf16.vlgmr.msra.gmra.mrb[32].mxu1 %vm58_vm1, %v1936_v48 }
0x1629   :  { %4325 = vmatpush3.bf16.msra.mxu0 %v5159_v44  ;;  %v1429_v51 = vpop.permute.xlu0 %1428  ;;  %4328 = vmatprep.mubr.msk.bf16.mxu0 %vm4718_vm0, %v4717_v0 }
0x162a   :  { %1451 = vst.msk [vmem:[#allocation2 + $0xd] sm:$0x1] %vm294_vm2, %v1429_v51  ;;  %4326 = vmatprep.subr.bf16.mxu0 %v4717_v0  ;;  %4334 = vmatprep.mubr.msk.bf16.mxu1 %vm4718_vm0, %v4717_v0 }
0x162d   :  { %4327 = vmatpush3.bf16.msra.mxu0 %v5168_v54 }
0x162e   :  { %4338 = vmatprep.subr.bf16.mxu0 %v4717_v0 }
0x1630   :  { %4329 = vmatmul.mubr.msk.bf16.vlgmr.msra.gmra.mrb[36].mxu0 %vm58_vm1, %v1936_v48  ;;  %v436_v48 = vcombine.high %v5061_v61, %v5061_v61  ;;  %v1591_v61 = vcombine.high %v5039_v2, %v5039_v2 }
0x1631   :  { %4340 = vmatprep.mubr.msk.bf16.mxu0 %vm4718_vm0, %v4717_v0 }
0x1632   :  { %v5214_v51 = vrot.slane %v436_v48, %v5009_v40 }
0x16fb   :  { %v1992_v58 = vpop.f32.mrb[32].mxu0  ;;  %v2050_v59 = vpop.f32.mrb[32].mxu1 }
0x16fc   :  { %v2051_v60 = vadd.f32 %v5184_v4, %v2050_v59  ;;  %v4314_v62 = vpop.f32.mrb[33].mxu0  ;;  %v4322_v1 = vpop.f32.mrb[33].mxu1  ;;  %v1993_v3 = vadd.f32 %v5189_v56, %v1992_v58  ;;  %v667_v58 = vcombine.high %v5017_v43, %v5017_v43  ;;  %v1129_v59 = vcombine.high %v5028_v47, %v5028_v47 }
0x16fd   :  { %v1995_v63 = vpop.f32.mrb[34].mxu0  ;;  %v2053_v6 = vpop.f32.mrb[34].mxu1  ;;  %v5237_v47 = vrot.slane %v1591_v61, %v5009_v40 }
0x16fe   :  { %v2116_v7 = vpack.c.bf16 %v2051_v60, %v2051_v60  ;;  %v4315_v9 = vpop.f32.mrb[35].mxu0  ;;  %v4323_v11 = vpop.f32.mrb[35].mxu1  ;;  %v2114_v23 = vmul.f32 0.17677669, %v1993_v3  ;;  %v477_v60 = vrot.slane %v5214_v51, %v5023_v46  ;;  %v5223_v62 = vrot.slane %v667_v58, %v5009_v40 }
0x16ff   :  { %v5231_v63 = vrot.slane %v1129_v59, %v5009_v40  ;;  %v1632_v6 = vrot.slane %v5237_v47, %v5023_v46 }
0x1700   :  { %v2121_v13 = vsel %vm58_vm1, %v2116_v7, 0  ;;  %v2115_v32 = vpack.c.bf16 %v2114_v23, %v2114_v23  ;;  %v708_v1 = vrot.slane %v5223_v62, %v5023_v46 }
0x1701   :  { %4333 = vmatpush3.bf16.xpose.msra.mxu1 %v2121_v13  ;;  %v1170_v43 = vrot.slane %v5231_v63, %v5023_v46 }
0x1702   :  { %4344 = vmatprep.subr.bf16.mxu1 %v4717_v0 }
0x1703   :  { %v2108_v24 = vpop.f32.mrb[36].mxu0 }
0x1704   :  { %v2109_v27 = vadd.f32 %v5197_v17, %v2108_v24  ;;  %v4330_v28 = vpop.f32.mrb[37].mxu0 }
0x1705   :  { %v2111_v30 = vpop.f32.mrb[38].mxu0  ;;  %v1822_v28 = vcombine.high %v5118_v22, %v5118_v22 }
0x1706   :  { %v2176_v33 = vpack.c.bf16 %v2109_v27, %v2109_v27  ;;  %v4331_v35 = vpop.f32.mrb[39].mxu0 }
0x1707   :  { %v5251_v30 = vrot.slane %v1822_v28, %v5009_v40 }
0x1708   :  { %v2182_v36 = vsel %vm2180_vm3, %v2176_v33, 0  ;;  %4335 = vmatmul.mubr.msk.bf16.vlgmr.msra.gmra.mrb[36].mxu1 %vm58_vm1, %v2115_v32  ;;  %v234_v33 = vcombine.high %v5021_v45, %v5021_v45 }
0x1709   :  { %4339 = vmatpush3.bf16.msra.mxu0 %v2182_v36  ;;  %4345 = vmatpush3.bf16.msra.mxu1 %v5093_v14  ;;  %v1863_v32 = vrot.slane %v5251_v30, %v5023_v46  ;;  %v928_v36 = vcombine.high %v5077_v10, %v5077_v10 }
0x170a   :  { %4346 = vmatprep.subr.bf16.mxu1 %v4717_v0  ;;  %4348 = vmatprep.mubr.msk.bf16.mxu1 %vm4718_vm0, %v4717_v0  ;;  %v249_v35 = vrot.slane %v234_v33, %v5023_v46 }
0x170b   :  { %4352 = vmatprep.subr.bf16.mxu0 %v4717_v0  ;;  %v943_v22 = vrot.slane %v928_v36, %v5023_v46 }
0x170d   :  { %4347 = vmatpush3.bf16.msra.mxu1 %v5106_v18 }
0x170e   :  { %4360 = vmatprep.subr.bf16.mxu1 %v4717_v0 }
0x17db   :  { %v2157_v38 = vpop.f32.mrb[36].mxu1 }
0x17dc   :  { %v4336_v39 = vpop.f32.mrb[37].mxu1  ;;  %v2164_v8 = vsel %vm2163_vm4, %v2157_v38, -inf }
0x17dd   :  { %2165 = vmax.xlane.f32.xlu1 %v2164_v8  ;;  %v2160_v41 = vpop.f32.mrb[38].mxu1 }
0x17de   :  { %v4337_v42 = vpop.f32.mrb[39].mxu1 }
0x17ee   :  { %504 = vrot.lane.b32.xlu1 %v477_v60, %s4721_s3 }
0x17f2   :  { %735 = vrot.lane.b32.xlu1 %v708_v1, %s4721_s3 }
0x17f6   :  { %1197 = vrot.lane.b32.xlu1 %v1170_v43, %s4721_s3 }
0x17fa   :  { %1659 = vrot.lane.b32.xlu1 %v1632_v6, %s4721_s3 }
0x186a   :  { %v2166_v2 = vpop.xlane.xlu1 %2165 }
0x186b   :  { %v2167_v3 = vsub.f32 %v2157_v38, %v2166_v2  ;;  %v1390_v38 = vcombine.high %v5084_v12, %v5084_v12 }
0x186d   :  { %v2168_v7 = vmul.f32 1.442695, %v2167_v3  ;;  %v1405_v39 = vrot.slane %v1390_v38, %v5023_v46 }
0x186e   :  { %v505_v9 = vpop.permute.xlu1 %504 }
0x186f   :  { %4676 = vpow2.f32 %v2168_v7  ;;  %527 = vst.msk [vmem:[#allocation2 + $0x9] sm:$0x1] %vm294_vm2, %v505_v9 }
0x1872   :  { %v736_v11 = vpop.permute.xlu1 %735 }
0x1873   :  { %758 = vst.msk [vmem:[#allocation2 + $0xa] sm:$0x1] %vm294_vm2, %v736_v11 }
0x1876   :  { %v1198_v13 = vpop.permute.xlu1 %1197 }
0x1877   :  { %1220 = vst.msk [vmem:[#allocation2 + $0xc] sm:$0x1] %vm294_vm2, %v1198_v13 }
0x1879   :  { %v4677_v23 = vpop.eup %4676 }
0x187a   :  { %v1660_v24 = vpop.permute.xlu1 %1659  ;;  %v2170_v27 = vsel %vm2163_vm4, %v4677_v23, 0.0 }
0x187b   :  { %1682 = vst.msk [vmem:[#allocation2 + $0xe] sm:$0x1] %vm294_vm2, %v1660_v24  ;;  %2171 = vadd.xlane.f32.xlu0 %v2170_v27 }
0x1891   :  { %1890 = vrot.lane.b32.xlu0 %v1863_v32, %s4721_s3 }
0x1895   :  { %274 = vrot.lane.b32.xlu0 %v249_v35, %s4721_s3 }
0x1899   :  { %968 = vrot.lane.b32.xlu0 %v943_v22, %s4721_s3 }
0x189d   :  { %1430 = vrot.lane.b32.xlu0 %v1405_v39, %s4721_s3 }
0x1908   :  { %v2172_v45 = vpop.xlane.xlu0 %2171 }
0x1909   :  { %4678 = vrcp.f32 %v2172_v45 }
0x190c   :  { %v1891_v8 = vpop.permute.xlu0 %1890 }
0x190d   :  { %1913 = vst.msk [vmem:[#allocation2 + $0xf] sm:$0x1] %vm294_vm2, %v1891_v8 }
0x1910   :  { %v275_v41 = vpop.permute.xlu0 %274 }
0x1911   :  { %297 = vst.msk [vmem:[#allocation2 + $0x10] sm:$0x1] %vm294_vm2, %v275_v41 }
0x1913   :  { %v4679_v10 = vpop.eup %4678 }
0x1914   :  { %v2174_v42 = vmul.f32 %v4679_v10, %v4677_v23  ;;  %v969_v48 = vpop.permute.xlu0 %968  ;;  %v2233_v58 = vld [vmem:[#allocation2 + $0x8] sm:$0xff] }
0x1915   :  { %990 = vst.msk [vmem:[#allocation2 + $0x13] sm:$0x1] %vm294_vm2, %v969_v48  ;;  %v2234_v12 = vpack.c.bf16 %v2233_v58, %v2233_v58 }
0x1916   :  { %v2175_v59 = vpack.c.bf16 %v2174_v42, %v2174_v42 }
0x1917   :  { %4349 = vmatmul.mubr.msk.bf16.vlgmr.msra.gmra.mrb[40].mxu1 %vm58_vm1, %v2234_v12 }
0x1918   :  { %4341 = vmatmul.mubr.msk.bf16.vlgmr.msra.gmra.mrb[40].mxu0 %vm2163_vm4, %v2175_v59  ;;  %v1431_v60 = vpop.permute.xlu0 %1430  ;;  %4361 = vmatpush3.bf16.msra.mxu1 %v5159_v44 }
0x1919   :  { %1452 = vst.msk [vmem:[#allocation2 + $0x15] sm:$0x1] %vm294_vm2, %v1431_v60  ;;  %4353 = vmatpush3.bf16.msra.mxu0 %v5098_v16  ;;  %4362 = vmatprep.subr.bf16.mxu1 %v4717_v0  ;;  %v466_v60 = vcombine.high %v5068_v5, %v5068_v5 }
0x191a   :  { %4354 = vmatprep.subr.bf16.mxu0 %v4717_v0  ;;  %4364 = vmatprep.mubr.msk.bf16.mxu1 %vm4718_vm0, %v4717_v0 }
0x191b   :  { %4356 = vmatprep.mubr.msk.bf16.mxu0 %vm4718_vm0, %v4717_v0 }
0x191c   :  { %4363 = vmatpush3.bf16.msra.mxu1 %v5168_v54 }
0x191d   :  { %4355 = vmatpush3.bf16.msra.mxu0 %v5111_v19  ;;  %4374 = vmatprep.subr.bf16.mxu1 %v4717_v0 }
0x191e   :  { %4368 = vmatprep.subr.bf16.mxu0 %v4717_v0 }
0x191f   :  { %4365 = vmatmul.mubr.msk.bf16.vlgmr.msra.gmra.mrb[44].mxu1 %vm58_vm1, %v2234_v12 }
0x1920   :  { %4357 = vmatmul.mubr.msk.bf16.vlgmr.msra.gmra.mrb[44].mxu0 %vm58_vm1, %v2234_v12  ;;  %4376 = vmatprep.mubr.msk.bf16.mxu1 %vm4718_vm0, %v4717_v0 }
0x1921   :  { %4370 = vmatprep.mubr.msk.bf16.mxu0 %vm4718_vm0, %v4717_v0 }
0x19ea   :  { %v2272_v61 = vpop.f32.mrb[40].mxu1 }
0x19eb   :  { %v5292_v1 = vpop.f32.mrb[40].mxu0  ;;  %v4350_v43 = vpop.f32.mrb[41].mxu1  ;;  %v2273_v22 = vadd.f32 %v5189_v56, %v2272_v61  ;;  %v481_v61 = vrot.slane %v466_v60, %v5023_v46 }
0x19ec   :  { %v4342_v6 = vpop.f32.mrb[41].mxu0  ;;  %v2275_v2 = vpop.f32.mrb[42].mxu1  ;;  %v697_v43 = vcombine.high %v5034_v50, %v5034_v50 }
0x19ed   :  { %v2221_v3 = vpop.f32.mrb[42].mxu0  ;;  %v4351_v7 = vpop.f32.mrb[43].mxu1  ;;  %v2358_v41 = vmul.f32 0.17677669, %v2273_v22  ;;  %v1159_v2 = vcombine.high %v5045_v53, %v5045_v53 }
0x19ee   :  { %v4343_v9 = vpop.f32.mrb[43].mxu0  ;;  %v712_v6 = vrot.slane %v697_v43, %v5023_v46  ;;  %v1621_v7 = vcombine.high %v5052_v55, %v5052_v55 }
0x19ef   :  { %v2359_v10 = vpack.c.bf16 %v2358_v41, %v2358_v41  ;;  %v1174_v3 = vrot.slane %v1159_v2, %v5023_v46 }
0x19f0   :  { %v1636_v5 = vrot.slane %v1621_v7, %v5023_v46 }
0x19f2   :  { %v2352_v11 = vpop.f32.mrb[44].mxu1 }
0x19f3   :  { %v2353_v13 = vadd.f32 %v5197_v17, %v2352_v11  ;;  %v2312_v23 = vpop.f32.mrb[44].mxu0  ;;  %v4366_v24 = vpop.f32.mrb[45].mxu1 }
0x19f4   :  { %v2313_v27 = vadd.f32 %v5184_v4, %v2312_v23  ;;  %v4358_v28 = vpop.f32.mrb[45].mxu0  ;;  %v2355_v32 = vpop.f32.mrb[46].mxu1 }
0x19f5   :  { %v2419_v33 = vpack.c.bf16 %v2353_v13, %v2353_v13  ;;  %v2315_v35 = vpop.f32.mrb[46].mxu0  ;;  %v4367_v36 = vpop.f32.mrb[47].mxu1  ;;  %v1852_v28 = vcombine.high %v5127_v26, %v5127_v26 }
0x19f6   :  { %v2360_v38 = vpack.c.bf16 %v2313_v27, %v2313_v27  ;;  %v4359_v39 = vpop.f32.mrb[47].mxu0  ;;  %v930_v36 = vcombine.high %v5141_v34, %v5141_v34 }
0x19f7   :  { %v2424_v45 = vsel %vm2180_vm3, %v2419_v33, 0  ;;  %v1867_v32 = vrot.slane %v1852_v28, %v5023_v46  ;;  %v236_v33 = vcombine.high %v5134_v29, %v5134_v29 }
0x19f8   :  { %v2365_v8 = vsel %vm58_vm1, %v2360_v38, 0  ;;  %4375 = vmatpush3.bf16.msra.mxu1 %v2424_v45  ;;  %v947_v22 = vrot.slane %v930_v36, %v5023_v46  ;;  %v1392_v38 = vcombine.high %v5148_v37, %v5148_v37 }
0x19f9   :  { %4369 = vmatpush3.bf16.xpose.msra.mxu0 %v2365_v8  ;;  %4388 = vmatprep.subr.bf16.mxu1 %v4717_v0  ;;  %v253_v35 = vrot.slane %v236_v33, %v5023_v46 }
0x19fa   :  { %4380 = vmatprep.subr.bf16.mxu0 %v4717_v0  ;;  %v1409_v26 = vrot.slane %v1392_v38, %v5023_v46 }
0x1a00   :  { %4371 = vmatmul.mubr.msk.bf16.vlgmr.msra.gmra.mrb[48].mxu0 %vm58_vm1, %v2359_v10 }
0x1a01   :  { %4381 = vmatpush3.bf16.msra.mxu0 %v5093_v14  ;;  %4384 = vmatprep.mubr.msk.bf16.mxu0 %vm4718_vm0, %v4717_v0 }
0x1a02   :  { %4382 = vmatprep.subr.bf16.mxu0 %v4717_v0 }
0x1a05   :  { %4383 = vmatpush3.bf16.msra.mxu0 %v5106_v18 }
0x1a06   :  { %4396 = vmatprep.subr.bf16.mxu0 %v4717_v0 }
0x1ad3   :  { %v2401_v42 = vpop.f32.mrb[48].mxu0 }
0x1ad4   :  { %v4372_v48 = vpop.f32.mrb[49].mxu0  ;;  %v2407_v58 = vsel %vm2163_vm4, %v2401_v42, -inf }
0x1ad5   :  { %2408 = vmax.xlane.f32.xlu1 %v2407_v58  ;;  %v2404_v12 = vpop.f32.mrb[50].mxu0  ;;  %v2224_v58 = vsel %vm58_vm1, %v5292_v1, 0.0 }
0x1ad6   :  { %v4373_v59 = vpop.f32.mrb[51].mxu0  ;;  %v2225_v12 = vrot.slane %v2224_v58, 4 }
0x1ad8   :  { %v2226_v59 = vadd.f32 %v2225_v12, %v2224_v58 }
0x1ada   :  { %v2227_v60 = vrot.slane %v2226_v59, 2 }
0x1ae6   :  { %506 = vrot.lane.b32.xlu1 %v481_v61, %s4721_s3 }
0x1aea   :  { %737 = vrot.lane.b32.xlu1 %v712_v6, %s4721_s3 }
0x1aee   :  { %1199 = vrot.lane.b32.xlu1 %v1174_v3, %s4721_s3 }
0x1af2   :  { %1661 = vrot.lane.b32.xlu1 %v1636_v5, %s4721_s3  ;;  %v2228_v5 = vadd.f32 %v2227_v60, %v2226_v59 }
0x1b62   :  { %v2409_v50 = vpop.xlane.xlu1 %2408 }
0x1b63   :  { %v2410_v9 = vsub.f32 %v2401_v42, %v2409_v50 }
0x1b65   :  { %v2411_v11 = vmul.f32 1.442695, %v2410_v9 }
0x1b66   :  { %v507_v13 = vpop.permute.xlu1 %506 }
0x1b67   :  { %4680 = vpow2.f32 %v2411_v11  ;;  %528 = vst.msk [vmem:[#allocation2 + $0x11] sm:$0x1] %vm294_vm2, %v507_v13 }
0x1b6a   :  { %v738_v53 = vpop.permute.xlu1 %737 }
0x1b6b   :  { %759 = vst.msk [vmem:[#allocation2 + $0x12] sm:$0x1] %vm294_vm2, %v738_v53 }
0x1b6e   :  { %v1200_v23 = vpop.permute.xlu1 %1199 }
0x1b6f   :  { %1221 = vst.msk [vmem:[#allocation2 + $0x14] sm:$0x1] %vm294_vm2, %v1200_v23  ;;  %v2229_v23 = vrot.slane %v2228_v5, 1 }
0x1b71   :  { %v4681_v55 = vpop.eup %4680 }
0x1b72   :  { %v1662_v24 = vpop.permute.xlu1 %1661  ;;  %v2413_v27 = vsel %vm2163_vm4, %v4681_v55, 0.0 }
0x1b73   :  { %1683 = vst.msk [vmem:[#allocation2 + $0x16] sm:$0x1] %vm294_vm2, %v1662_v24  ;;  %2414 = vadd.xlane.f32.xlu0 %v2413_v27 }
0x1b89   :  { %1892 = vrot.lane.b32.xlu0 %v1867_v32, %s4721_s3 }
0x1b8d   :  { %276 = vrot.lane.b32.xlu0 %v253_v35, %s4721_s3 }
0x1b91   :  { %970 = vrot.lane.b32.xlu0 %v947_v22, %s4721_s3  ;;  %v2230_v22 = vadd.f32 %v2229_v23, %v2228_v5  ;;  %v699_v5 = vcombine.high %v5223_v62, %v5223_v62 }
0x1b95   :  { %1432 = vrot.lane.b32.xlu0 %v1409_v26, %s4721_s3 }
0x1c00   :  { %v2415_v29 = vpop.xlane.xlu0 %2414 }
0x1c01   :  { %4682 = vrcp.f32 %v2415_v29 }
0x1c04   :  { %v1893_v39 = vpop.permute.xlu0 %1892 }
0x1c05   :  { %1914 = vst.msk [vmem:[#allocation2 + $0x17] sm:$0x1] %vm294_vm2, %v1893_v39 }
0x1c08   :  { %v277_v45 = vpop.permute.xlu0 %276 }
0x1c09   :  { %298 = vst.msk [vmem:[#allocation2 + $0x18] sm:$0x1] %vm294_vm2, %v277_v45 }
0x1c0b   :  { %v4683_v34 = vpop.eup %4682 }
0x1c0c   :  { %v2417_v8 = vmul.f32 %v4683_v34, %v4681_v55  ;;  %v971_v41 = vpop.permute.xlu0 %970  ;;  %v2475_v10 = vld [vmem:[#allocation2 + $0x10] sm:$0xff] }
0x1c0d   :  { %991 = vst.msk [vmem:[#allocation2 + $0x1b] sm:$0x1] %vm294_vm2, %v971_v41  ;;  %v2476_v37 = vpack.c.bf16 %v2475_v10, %v2475_v10 }
0x1c0e   :  { %v2418_v42 = vpack.c.bf16 %v2417_v8, %v2417_v8 }
0x1c0f   :  { %4385 = vmatmul.mubr.msk.bf16.vlgmr.msra.gmra.mrb[52].mxu0 %vm58_vm1, %v2476_v37 }
0x1c10   :  { %v1433_v48 = vpop.permute.xlu0 %1432  ;;  %4377 = vmatmul.mubr.msk.bf16.vlgmr.msra.gmra.mrb[48].mxu1 %vm2163_vm4, %v2418_v42  ;;  %4397 = vmatpush3.bf16.msra.mxu0 %v5159_v44  ;;  %v2231_v42 = vmul.f32 0.125, %v2230_v22  ;;  %v1345_v22 = vcombine.high %v4977_v49, %v4977_v49 }
0x1c11   :  { %1453 = vst.msk [vmem:[#allocation2 + $0x1d] sm:$0x1] %vm294_vm2, %v1433_v48  ;;  %4389 = vmatpush3.bf16.msra.mxu1 %v5098_v16  ;;  %4398 = vmatprep.subr.bf16.mxu0 %v4717_v0 }
0x1c12   :  { %4390 = vmatprep.subr.bf16.mxu1 %v4717_v0  ;;  %4400 = vmatprep.mubr.msk.bf16.mxu0 %vm4718_vm0, %v4717_v0 }
0x1c13   :  { %4392 = vmatprep.mubr.msk.bf16.mxu1 %vm4718_vm0, %v4717_v0 }
0x1c14   :  { %4399 = vmatpush3.bf16.msra.mxu0 %v5168_v54 }
0x1c15   :  { %4391 = vmatpush3.bf16.msra.mxu1 %v5111_v19  ;;  %4410 = vmatprep.subr.bf16.mxu0 %v4717_v0 }
0x1c16   :  { %4404 = vmatprep.subr.bf16.mxu1 %v4717_v0 }
0x1c17   :  { %4401 = vmatmul.mubr.msk.bf16.vlgmr.msra.gmra.mrb[56].mxu0 %vm58_vm1, %v2476_v37 }
0x1c18   :  { %4393 = vmatmul.mubr.msk.bf16.vlgmr.msra.gmra.mrb[52].mxu1 %vm58_vm1, %v2476_v37  ;;  %4412 = vmatprep.mubr.msk.bf16.mxu0 %vm4718_vm0, %v4717_v0 }
0x1c19   :  { %4406 = vmatprep.mubr.msk.bf16.mxu1 %vm4718_vm0, %v4717_v0 }
0x1ce2   :  { %v2514_v61 = vpop.f32.mrb[52].mxu0 }
0x1ce3   :  { %v2460_v43 = vpop.f32.mrb[48].mxu1  ;;  %v4386_v6 = vpop.f32.mrb[53].mxu0  ;;  %v2515_v45 = vadd.f32 %v5189_v56, %v2514_v61 }
0x1ce4   :  { %v2466_v2 = vsel %vm58_vm1, %v2460_v43, 0.0  ;;  %v4378_v3 = vpop.f32.mrb[49].mxu1  ;;  %v2517_v7 = vpop.f32.mrb[54].mxu0 }
0x1ce5   :  { %v2467_v50 = vrot.slane %v2466_v2, 4  ;;  %v2463_v9 = vpop.f32.mrb[50].mxu1  ;;  %v4387_v11 = vpop.f32.mrb[55].mxu0  ;;  %v2600_v58 = vmul.f32 0.17677669, %v2515_v45  ;;  %v468_v3 = vcombine.high %v5214_v51, %v5214_v51 }
0x1ce6   :  { %v4379_v13 = vpop.f32.mrb[51].mxu1  ;;  %v1161_v9 = vcombine.high %v5231_v63, %v5231_v63 }
0x1ce7   :  { %v2468_v53 = vadd.f32 %v2467_v50, %v2466_v2  ;;  %v2601_v59 = vpack.c.bf16 %v2600_v58, %v2600_v58  ;;  %v485_v7 = vrot.slane %v468_v3, %v5023_v46  ;;  %v716_v50 = vrot.slane %v699_v5, %v5023_v46 }
0x1ce8   :  { %v1178_v11 = vrot.slane %v1161_v9, %v5023_v46  ;;  %v1623_v13 = vcombine.high %v5237_v47, %v5237_v47 }
0x1ce9   :  { %v2469_v55 = vrot.slane %v2468_v53, 2 }
0x1cea   :  { %v2594_v24 = vpop.f32.mrb[56].mxu0  ;;  %v1640_v51 = vrot.slane %v1623_v13, %v5023_v46 }
0x1ceb   :  { %v2470_v1 = vadd.f32 %v2469_v55, %v2468_v53  ;;  %v2595_v27 = vadd.f32 %v5197_v17, %v2594_v24  ;;  %v2554_v28 = vpop.f32.mrb[52].mxu1  ;;  %v4402_v32 = vpop.f32.mrb[57].mxu0 }
0x1cec   :  { %v2555_v33 = vadd.f32 %v5184_v4, %v2554_v28  ;;  %v4394_v35 = vpop.f32.mrb[53].mxu1  ;;  %v2597_v36 = vpop.f32.mrb[58].mxu0  ;;  %v189_v28 = vcombine.high %v4847_v31, %v4847_v31  ;;  %v883_v32 = vcombine.high %v4925_v52, %v4925_v52  ;;  %v5432_v52 = vrot.slane %v1345_v22, %v5009_v40 }
0x1ced   :  { %v2471_v38 = vrot.slane %v2470_v1, 1  ;;  %v2661_v26 = vpack.c.bf16 %v2595_v27, %v2595_v27  ;;  %v2557_v29 = vpop.f32.mrb[54].mxu1  ;;  %v4403_v39 = vpop.f32.mrb[59].mxu0 }
0x1cee   :  { %v2602_v34 = vpack.c.bf16 %v2555_v33, %v2555_v33  ;;  %v4395_v8 = vpop.f32.mrb[55].mxu1  ;;  %v1854_v33 = vcombine.high %v5251_v30, %v5251_v30  ;;  %v5418_v35 = vrot.slane %v189_v28, %v5009_v40  ;;  %v5421_v36 = vrot.slane %v883_v32, %v5009_v40 }
0x1cef   :  { %v2472_v41 = vadd.f32 %v2471_v38, %v2470_v1  ;;  %v2666_v10 = vsel %vm2180_vm3, %v2661_v26, 0  ;;  %v5445_v29 = vrot.slane %v5432_v52, %v5009_v40 }
0x1cf0   :  { %v2607_v37 = vsel %vm58_vm1, %v2602_v34, 0  ;;  %4411 = vmatpush3.bf16.msra.mxu0 %v2666_v10  ;;  %v1871_v38 = vrot.slane %v1854_v33, %v5023_v46  ;;  %v5428_v31 = vrot.slane %v5418_v35, %v5009_v40  ;;  %v5438_v26 = vrot.slane %v5421_v36, %v5009_v40 }
0x1cf1   :  { %v2473_v48 = vmul.f32 0.125, %v2472_v41  ;;  %4405 = vmatpush3.bf16.xpose.msra.mxu1 %v2607_v37  ;;  %4424 = vmatprep.subr.bf16.mxu0 %v4717_v0  ;;  %v1413_v39 = vrot.slane %v5445_v29, %v5023_v46 }
0x1cf2   :  { %4416 = vmatprep.subr.bf16.mxu1 %v4717_v0  ;;  %v257_v30 = vrot.slane %v5428_v31, %v5023_v46  ;;  %v951_v49 = vrot.slane %v5438_v26, %v5023_v46 }
0x1cf3   :  { %v5380_v12 = vsel %vm3926_vm5, %v2231_v42, %v2473_v48 }
0x1cf8   :  { %4407 = vmatmul.mubr.msk.bf16.vlgmr.msra.gmra.mrb[56].mxu1 %vm58_vm1, %v2601_v59 }
0x1cf9   :  { %4417 = vmatpush3.bf16.msra.mxu1 %v5093_v14  ;;  %4420 = vmatprep.mubr.msk.bf16.mxu1 %vm4718_vm0, %v4717_v0 }
0x1cfa   :  { %4418 = vmatprep.subr.bf16.mxu1 %v4717_v0 }
0x1cfd   :  { %4419 = vmatpush3.bf16.msra.mxu1 %v5106_v18 }
0x1cfe   :  { %4432 = vmatprep.subr.bf16.mxu1 %v4717_v0 }
0x1dcb   :  { %v2643_v60 = vpop.f32.mrb[56].mxu1 }
0x1dcc   :  { %v4408_v61 = vpop.f32.mrb[57].mxu1  ;;  %v2649_v43 = vsel %vm2163_vm4, %v2643_v60, -inf }
0x1dcd   :  { %2650 = vmax.xlane.f32.xlu1 %v2649_v43  ;;  %v2646_v6 = vpop.f32.mrb[58].mxu1 }
0x1dce   :  { %v4409_v2 = vpop.f32.mrb[59].mxu1 }
0x1dde   :  { %508 = vrot.lane.b32.xlu1 %v485_v7, %s4721_s3 }
0x1de2   :  { %739 = vrot.lane.b32.xlu1 %v716_v50, %s4721_s3 }
0x1de6   :  { %1201 = vrot.lane.b32.xlu1 %v1178_v11, %s4721_s3 }
0x1dea   :  { %1663 = vrot.lane.b32.xlu1 %v1640_v51, %s4721_s3 }
0x1e5a   :  { %v2651_v62 = vpop.xlane.xlu1 %2650 }
0x1e5b   :  { %v2652_v53 = vsub.f32 %v2643_v60, %v2651_v62 }
0x1e5d   :  { %v2653_v23 = vmul.f32 1.442695, %v2652_v53 }
0x1e5e   :  { %v509_v55 = vpop.permute.xlu1 %508 }
0x1e5f   :  { %4684 = vpow2.f32 %v2653_v23  ;;  %529 = vst.msk [vmem:[#allocation2 + $0x19] sm:$0x1] %vm294_vm2, %v509_v55 }
0x1e62   :  { %v740_v63 = vpop.permute.xlu1 %739 }
0x1e63   :  { %760 = vst.msk [vmem:[#allocation2 + $0x1a] sm:$0x1] %vm294_vm2, %v740_v63 }
0x1e66   :  { %v1202_v24 = vpop.permute.xlu1 %1201 }
0x1e67   :  { %1222 = vst.msk [vmem:[#allocation2 + $0x1c] sm:$0x1] %vm294_vm2, %v1202_v24 }
0x1e69   :  { %v4685_v47 = vpop.eup %4684 }
0x1e6a   :  { %v1664_v1 = vpop.permute.xlu1 %1663  ;;  %v2655_v27 = vsel %vm2163_vm4, %v4685_v47, 0.0 }
0x1e6b   :  { %1684 = vst.msk [vmem:[#allocation2 + $0x1e] sm:$0x1] %vm294_vm2, %v1664_v1  ;;  %2656 = vadd.xlane.f32.xlu0 %v2655_v27 }
0x1e81   :  { %1894 = vrot.lane.b32.xlu0 %v1871_v38, %s4721_s3 }
0x1e85   :  { %278 = vrot.lane.b32.xlu0 %v257_v30, %s4721_s3 }
0x1e89   :  { %972 = vrot.lane.b32.xlu0 %v951_v49, %s4721_s3 }
0x1e8d   :  { %1434 = vrot.lane.b32.xlu0 %v1413_v39, %s4721_s3 }
0x1ef8   :  { %v2657_v45 = vpop.xlane.xlu0 %2656 }
0x1ef9   :  { %4686 = vrcp.f32 %v2657_v45 }
0x1efc   :  { %v1895_v34 = vpop.permute.xlu0 %1894 }
0x1efd   :  { %1915 = vst.msk [vmem:[#allocation2 + $0x1f] sm:$0x1] %vm294_vm2, %v1895_v34 }
0x1f00   :  { %v279_v8 = vpop.permute.xlu0 %278 }
0x1f01   :  { %299 = vst.msk [vmem:[#allocation2 + $0x20] sm:$0x1] %vm294_vm2, %v279_v8 }
0x1f03   :  { %v4687_v41 = vpop.eup %4686 }
0x1f04   :  { %v2659_v10 = vmul.f32 %v4687_v41, %v4685_v47  ;;  %v973_v37 = vpop.permute.xlu0 %972  ;;  %v2717_v42 = vld [vmem:[#allocation2 + $0x18] sm:$0xff] }
0x1f05   :  { %992 = vst.msk [vmem:[#allocation2 + $0x23] sm:$0x1] %vm294_vm2, %v973_v37  ;;  %v2718_v48 = vpack.c.bf16 %v2717_v42, %v2717_v42 }
0x1f06   :  { %v2660_v58 = vpack.c.bf16 %v2659_v10, %v2659_v10  ;;  %v421_v10 = vcombine.high %v4873_v57, %v4873_v57  ;;  %v1576_v57 = vcombine.high %v4999_v15, %v4999_v15 }
0x1f07   :  { %4421 = vmatmul.mubr.msk.bf16.vlgmr.msra.gmra.mrb[60].mxu1 %vm58_vm1, %v2718_v48 }
0x1f08   :  { %4413 = vmatmul.mubr.msk.bf16.vlgmr.msra.gmra.mrb[60].mxu0 %vm2163_vm4, %v2660_v58  ;;  %v1435_v59 = vpop.permute.xlu0 %1434  ;;  %4433 = vmatpush3.bf16.msra.mxu1 %v5159_v44  ;;  %v5499_v37 = vrot.slane %v421_v10, %v5009_v40 }
0x1f09   :  { %1454 = vst.msk [vmem:[#allocation2 + $0x25] sm:$0x1] %vm294_vm2, %v1435_v59  ;;  %4425 = vmatpush3.bf16.msra.mxu0 %v5098_v16  ;;  %4434 = vmatprep.subr.bf16.mxu1 %v4717_v0 }
0x1f0a   :  { %4426 = vmatprep.subr.bf16.mxu0 %v4717_v0  ;;  %4436 = vmatprep.mubr.msk.bf16.mxu1 %vm4718_vm0, %v4717_v0  ;;  %v5505_v42 = vrot.slane %v5499_v37, %v5009_v40 }
0x1f0b   :  { %4428 = vmatprep.mubr.msk.bf16.mxu0 %vm4718_vm0, %v4717_v0 }
0x1f0c   :  { %4435 = vmatpush3.bf16.msra.mxu1 %v5168_v54 }
0x1f0d   :  { %4427 = vmatpush3.bf16.msra.mxu0 %v5111_v19  ;;  %4446 = vmatprep.subr.bf16.mxu1 %v4717_v0 }
0x1f0e   :  { %4440 = vmatprep.subr.bf16.mxu0 %v4717_v0 }
0x1f0f   :  { %4437 = vmatmul.mubr.msk.bf16.vlgmr.msra.gmra.mrb[64].mxu1 %vm58_vm1, %v2718_v48 }
0x1f10   :  { %4429 = vmatmul.mubr.msk.bf16.vlgmr.msra.gmra.mrb[64].mxu0 %vm58_vm1, %v2718_v48  ;;  %4448 = vmatprep.mubr.msk.bf16.mxu1 %vm4718_vm0, %v4717_v0 }
0x1f11   :  { %4442 = vmatprep.mubr.msk.bf16.mxu0 %vm4718_vm0, %v4717_v0 }
0x1fda   :  { %v2756_v16 = vpop.f32.mrb[60].mxu1 }
0x1fdb   :  { %v2702_v60 = vpop.f32.mrb[60].mxu0  ;;  %v4422_v61 = vpop.f32.mrb[61].mxu1  ;;  %v2757_v28 = vadd.f32 %v5189_v56, %v2756_v16 }
0x1fdc   :  { %v2708_v43 = vsel %vm58_vm1, %v2702_v60, 0.0  ;;  %v4414_v19 = vpop.f32.mrb[61].mxu0  ;;  %v2759_v6 = vpop.f32.mrb[62].mxu1 }
0x1fdd   :  { %v2709_v2 = vrot.slane %v2708_v43, 4  ;;  %v2705_v3 = vpop.f32.mrb[62].mxu0  ;;  %v4423_v7 = vpop.f32.mrb[63].mxu1 }
0x1fde   :  { %v4415_v5 = vpop.f32.mrb[63].mxu0 }
0x1fdf   :  { %v2710_v50 = vadd.f32 %v2709_v2, %v2708_v43 }
0x1fe1   :  { %v2711_v9 = vrot.slane %v2710_v50, 2 }
0x1fe2   :  { %v2836_v11 = vpop.f32.mrb[64].mxu1 }
0x1fe3   :  { %v2712_v13 = vadd.f32 %v2711_v9, %v2710_v50  ;;  %v2837_v51 = vadd.f32 %v5197_v17, %v2836_v11  ;;  %v2796_v62 = vpop.f32.mrb[64].mxu0  ;;  %v4438_v53 = vpop.f32.mrb[65].mxu1 }
0x1fe4   :  { %v2797_v23 = vadd.f32 %v5184_v4, %v2796_v62  ;;  %v4430_v55 = vpop.f32.mrb[65].mxu0  ;;  %v2839_v63 = vpop.f32.mrb[66].mxu1  ;;  %v2842_v4 = vmul.f32 0.17677669, %v2757_v28  ;;  %v205_v53 = vcombine.high %v5418_v35, %v5418_v35  ;;  %v1361_v35 = vcombine.high %v5432_v52, %v5432_v52 }
0x1fe5   :  { %v2713_v24 = vrot.slane %v2712_v13, 1  ;;  %v2903_v47 = vpack.c.bf16 %v2837_v51, %v2837_v51  ;;  %v2799_v1 = vpop.f32.mrb[66].mxu0  ;;  %v4439_v27 = vpop.f32.mrb[67].mxu1  ;;  %v899_v63 = vcombine.high %v5421_v36, %v5421_v36 }
0x1fe6   :  { %v2844_v32 = vpack.c.bf16 %v2797_v23, %v2797_v23  ;;  %v4431_v33 = vpop.f32.mrb[67].mxu0  ;;  %v2843_v56 = vpack.c.bf16 %v2842_v4, %v2842_v4  ;;  %v5561_v55 = vrot.slane %v205_v53, %v5009_v40  ;;  %v5577_v1 = vrot.slane %v1361_v35, %v5009_v40 }
0x1fe7   :  { %v2714_v22 = vadd.f32 %v2713_v24, %v2712_v13  ;;  %v2908_v38 = vsel %vm2180_vm3, %v2903_v47, 0  ;;  %v1807_v13 = vcombine.high %v5113_v20, %v5113_v20  ;;  %v5569_v24 = vrot.slane %v899_v63, %v5009_v40 }
0x1fe8   :  { %v2849_v30 = vsel %vm58_vm1, %v2844_v32, 0  ;;  %4447 = vmatpush3.bf16.msra.mxu1 %v2908_v38  ;;  %v261_v20 = vrot.slane %v5561_v55, %v5023_v46  ;;  %v1417_v36 = vrot.slane %v5577_v1, %v5023_v46 }
0x1fe9   :  { %v2715_v49 = vmul.f32 0.125, %v2714_v22  ;;  %4441 = vmatpush3.bf16.xpose.msra.mxu0 %v2849_v30  ;;  %4460 = vmatprep.subr.bf16.mxu1 %v4717_v0  ;;  %v5550_v51 = vrot.slane %v1807_v13, %v5009_v40  ;;  %v955_v47 = vrot.slane %v5569_v24, %v5023_v46 }
0x1fea   :  { %4452 = vmatprep.subr.bf16.mxu0 %v4717_v0 }
0x1feb   :  { %v5484_v39 = vsel %vm3928_vm6, %v5380_v12, %v2715_v49  ;;  %v5554_v62 = vrot.slane %v5550_v51, %v5009_v40 }
0x1fed   :  { %v1875_v23 = vrot.slane %v5554_v62, %v5023_v46 }
0x1ff0   :  { %4443 = vmatmul.mubr.msk.bf16.vlgmr.msra.gmra.mrb[68].mxu0 %vm58_vm1, %v2843_v56  ;;  %v5593_v56 = vld [vmem:[%s5919_s5] sm:$0xff]  }
0x1ff1   :  { %4453 = vmatpush3.bf16.msra.mxu0 %v5093_v14  ;;  %4456 = vmatprep.mubr.msk.bf16.mxu0 %vm4718_vm0, %v4717_v0  ;;  %v652_v14 = vcombine.high %v4899_v25, %v4899_v25  ;;  %v489_v25 = vrot.slane %v5505_v42, %v5023_v46 }
0x1ff2   :  { %4454 = vmatprep.subr.bf16.mxu0 %v4717_v0 }
0x1ff3   :  { %v5508_v48 = vrot.slane %v652_v14, %v5009_v40 }
0x1ff5   :  { %4455 = vmatpush3.bf16.msra.mxu0 %v5106_v18  ;;  %v1114_v18 = vcombine.high %v4951_v21, %v4951_v21  ;;  %v5519_v59 = vrot.slane %v5508_v48, %v5009_v40  ;;  %v5523_v21 = vrot.slane %v1576_v57, %v5009_v40 }
0x1ff6   :  { %4468 = vmatprep.subr.bf16.mxu0 %v4717_v0 }
0x1ff7   :  { %v5511_v58 = vrot.slane %v1114_v18, %v5009_v40  ;;  %v720_v16 = vrot.slane %v5519_v59, %v5023_v46  ;;  %v5536_v61 = vrot.slane %v5523_v21, %v5009_v40 }
0x1ff9   :  { %v5529_v60 = vrot.slane %v5511_v58, %v5009_v40  ;;  %v1644_v43 = vrot.slane %v5536_v61, %v5023_v46 }
0x1ffb   :  { %v1182_v15 = vrot.slane %v5529_v60, %v5023_v46 }
0x20c3   :  { %v2885_v45 = vpop.f32.mrb[68].mxu0 }
0x20c4   :  { %v4444_v34 = vpop.f32.mrb[69].mxu0  ;;  %v2891_v8 = vsel %vm2163_vm4, %v2885_v45, -inf }
0x20c5   :  { %2892 = vmax.xlane.f32.xlu1 %v2891_v8  ;;  %v2888_v12 = vpop.f32.mrb[70].mxu0 }
0x20c6   :  { %v4445_v41 = vpop.f32.mrb[71].mxu0 }
0x20d6   :  { %510 = vrot.lane.b32.xlu1 %v489_v25, %s4721_s3 }
0x20da   :  { %741 = vrot.lane.b32.xlu1 %v720_v16, %s4721_s3 }
0x20de   :  { %1203 = vrot.lane.b32.xlu1 %v1182_v15, %s4721_s3 }
0x20e2   :  { %1665 = vrot.lane.b32.xlu1 %v1644_v43, %s4721_s3 }
0x2152   :  { %v2893_v19 = vpop.xlane.xlu1 %2892 }
0x2153   :  { %v2894_v6 = vsub.f32 %v2885_v45, %v2893_v19 }
0x2155   :  { %v2895_v2 = vmul.f32 1.442695, %v2894_v6 }
0x2156   :  { %v511_v3 = vpop.permute.xlu1 %510 }
0x2157   :  { %4688 = vpow2.f32 %v2895_v2  ;;  %530 = vst.msk [vmem:[#allocation2 + $0x21] sm:$0x1] %vm294_vm2, %v511_v3  ;;  %v5622_v3 = vld [vmem:[%s5921_s8] ss:$0 sm:$0xff] }
0x215a   :  { %v742_v7 = vpop.permute.xlu1 %741 }
0x215b   :  { %761 = vst.msk [vmem:[#allocation2 + $0x22] sm:$0x1] %vm294_vm2, %v742_v7 }
0x215e   :  { %v1204_v5 = vpop.permute.xlu1 %1203 }
0x215f   :  { %1223 = vst.msk [vmem:[#allocation2 + $0x24] sm:$0x1] %vm294_vm2, %v1204_v5 }
0x2161   :  { %v4689_v50 = vpop.eup %4688 }
0x2162   :  { %v1666_v9 = vpop.permute.xlu1 %1665  ;;  %v2897_v11 = vsel %vm2163_vm4, %v4689_v50, 0.0 }
0x2163   :  { %1685 = vst.msk [vmem:[#allocation2 + $0x26] sm:$0x1] %vm294_vm2, %v1666_v9  ;;  %2898 = vadd.xlane.f32.xlu0 %v2897_v11 }
0x2179   :  { %1896 = vrot.lane.b32.xlu0 %v1875_v23, %s4721_s3  ;;  %v5628_v23 = vld [vmem:[%s5922_s7] ss:$0 sm:$0xff] }
0x217d   :  { %280 = vrot.lane.b32.xlu0 %v261_v20, %s4721_s3 }
0x2181   :  { %974 = vrot.lane.b32.xlu0 %v955_v47, %s4721_s3 }
0x2185   :  { %1436 = vrot.lane.b32.xlu0 %v1417_v36, %s4721_s3 }
0x21f0   :  { %v2899_v27 = vpop.xlane.xlu0 %2898 }
0x21f1   :  { %4690 = vrcp.f32 %v2899_v27 }
0x21f4   :  { %v1897_v28 = vpop.permute.xlu0 %1896 }
0x21f5   :  { %1916 = vst.msk [vmem:[#allocation2 + $0x27] sm:$0x1] %vm294_vm2, %v1897_v28 }
0x21f8   :  { %v281_v52 = vpop.permute.xlu0 %280 }
0x21f9   :  { %300 = vst.msk [vmem:[#allocation2 + $0x28] sm:$0x1] %vm294_vm2, %v281_v52 }
0x21fb   :  { %v4691_v32 = vpop.eup %4690 }
0x21fc   :  { %v2901_v33 = vmul.f32 %v4691_v32, %v4689_v50  ;;  %v975_v22 = vpop.permute.xlu0 %974  ;;  %v2959_v38 = vld [vmem:[#allocation2 + $0x20] sm:$0xff] }
0x21fd   :  { %993 = vst.msk [vmem:[#allocation2 + $0x2b] sm:$0x1] %vm294_vm2, %v975_v22  ;;  %v2960_v30 = vpack.c.bf16 %v2959_v38, %v2959_v38 }
0x21fe   :  { %v2902_v49 = vpack.c.bf16 %v2901_v33, %v2901_v33  ;;  %v5642_v33 = vld [vmem:[%s5918_s4] sm:$0xff]  }
0x21ff   :  { %4457 = vmatmul.mubr.msk.bf16.vlgmr.msra.gmra.mrb[72].mxu0 %vm58_vm1, %v2960_v30 }
0x2200   :  { %v1437_v4 = vpop.permute.xlu0 %1436  ;;  %4449 = vmatmul.mubr.msk.bf16.vlgmr.msra.gmra.mrb[68].mxu1 %vm2163_vm4, %v2902_v49  ;;  %4469 = vmatpush3.bf16.msra.mxu0 %v5159_v44  ;;  %v5606_v44 = vld [vmem:[%s5919_s5 + $0x8] sm:$0xff]  }
0x2201   :  { %1455 = vst.msk [vmem:[#allocation2 + $0x2d] sm:$0x1] %vm294_vm2, %v1437_v4  ;;  %4461 = vmatpush3.bf16.msra.mxu1 %v5593_v56  ;;  %4470 = vmatprep.subr.bf16.mxu0 %v4717_v0 }
0x2202   :  { %4462 = vmatprep.subr.bf16.mxu1 %v4717_v0  ;;  %4472 = vmatprep.mubr.msk.bf16.mxu0 %vm4718_vm0, %v4717_v0 }
0x2203   :  { %4464 = vmatprep.mubr.msk.bf16.mxu1 %vm4718_vm0, %v4717_v0 }
0x2204   :  { %4471 = vmatpush3.bf16.msra.mxu0 %v5168_v54 }
0x2205   :  { %4463 = vmatpush3.bf16.msra.mxu1 %v5606_v44  ;;  %4482 = vmatprep.subr.bf16.mxu0 %v4717_v0 }
0x2206   :  { %4476 = vmatprep.subr.bf16.mxu1 %v4717_v0 }
0x2207   :  { %4473 = vmatmul.mubr.msk.bf16.vlgmr.msra.gmra.mrb[76].mxu0 %vm58_vm1, %v2960_v30 }
0x2208   :  { %4465 = vmatmul.mubr.msk.bf16.vlgmr.msra.gmra.mrb[72].mxu1 %vm58_vm1, %v2960_v30  ;;  %4484 = vmatprep.mubr.msk.bf16.mxu0 %vm4718_vm0, %v4717_v0 }
0x2209   :  { %4478 = vmatprep.mubr.msk.bf16.mxu1 %vm4718_vm0, %v4717_v0 }
0x22d2   :  { %v2998_v54 = vpop.f32.mrb[72].mxu0 }
0x22d3   :  { %v2944_v45 = vpop.f32.mrb[68].mxu1  ;;  %v4458_v34 = vpop.f32.mrb[73].mxu0 }
0x22d4   :  { %v2950_v8 = vsel %vm58_vm1, %v2944_v45, 0.0  ;;  %v4450_v12 = vpop.f32.mrb[69].mxu1  ;;  %v3001_v41 = vpop.f32.mrb[74].mxu0  ;;  %v668_v34 = vcombine.high %v5508_v48, %v5508_v48  ;;  %v1592_v48 = vcombine.high %v5523_v21, %v5523_v21 }
0x22d5   :  { %v2951_v10 = vrot.slane %v2950_v8, 4  ;;  %v2947_v14 = vpop.f32.mrb[70].mxu1  ;;  %v4459_v18 = vpop.f32.mrb[75].mxu0  ;;  %v1130_v41 = vcombine.high %v5511_v58, %v5511_v58 }
0x22d6   :  { %v4451_v57 = vpop.f32.mrb[71].mxu1  ;;  %v5666_v12 = vrot.slane %v668_v34, %v5009_v40  ;;  %v5682_v18 = vrot.slane %v1592_v48, %v5009_v40 }
0x22d7   :  { %v2952_v25 = vadd.f32 %v2951_v10, %v2950_v8  ;;  %v5674_v10 = vrot.slane %v1130_v41, %v5009_v40 }
0x22d8   :  { %v1648_v58 = vrot.slane %v5682_v18, %v5023_v46 }
0x22d9   :  { %v2953_v16 = vrot.slane %v2952_v25, 2  ;;  %v1186_v14 = vrot.slane %v5674_v10, %v5023_v46 }
0x22da   :  { %v3078_v15 = vpop.f32.mrb[76].mxu0 }
0x22db   :  { %v2954_v43 = vadd.f32 %v2953_v16, %v2952_v25  ;;  %v3079_v19 = vadd.f32 %v5197_v17, %v3078_v15  ;;  %v3038_v6 = vpop.f32.mrb[72].mxu1  ;;  %v4474_v2 = vpop.f32.mrb[77].mxu0  ;;  %v2999_v17 = vadd.f32 %v5628_v23, %v2998_v54  ;;  %v437_v54 = vcombine.high %v5499_v37, %v5499_v37 }
0x22dc   :  { %v3039_v7 = vadd.f32 %v5622_v3, %v3038_v6  ;;  %v4466_v5 = vpop.f32.mrb[73].mxu1  ;;  %v3081_v50 = vpop.f32.mrb[78].mxu0  ;;  %v724_v37 = vrot.slane %v5666_v12, %v5023_v46 }
0x22dd   :  { %v2955_v9 = vrot.slane %v2954_v43, 1  ;;  %v3145_v11 = vpack.c.bf16 %v3079_v19, %v3079_v19  ;;  %v3041_v13 = vpop.f32.mrb[74].mxu1  ;;  %v4475_v53 = vpop.f32.mrb[79].mxu0  ;;  %v3084_v28 = vmul.f32 0.17677669, %v2999_v17  ;;  %v5659_v45 = vrot.slane %v437_v54, %v5009_v40 }
0x22de   :  { %v3086_v63 = vpack.c.bf16 %v3039_v7, %v3039_v7  ;;  %v4467_v20 = vpop.f32.mrb[75].mxu1  ;;  %v1823_v7 = vcombine.high %v5550_v51, %v5550_v51  ;;  %v929_v13 = vcombine.high %v5438_v26, %v5438_v26 }
0x22df   :  { %v2956_v35 = vadd.f32 %v2955_v9, %v2954_v43  ;;  %v3150_v47 = vsel %vm2180_vm3, %v3145_v11, 0  ;;  %v3085_v32 = vpack.c.bf16 %v3084_v28, %v3084_v28  ;;  %v493_v8 = vrot.slane %v5659_v45, %v5023_v46  ;;  %v5721_v28 = vld [vmem:[%s5920_s6] sm:$0xff]  }
0x22e0   :  { %v3091_v36 = vsel %vm58_vm1, %v3086_v63, 0  ;;  %4483 = vmatpush3.bf16.msra.mxu0 %v3150_v47  ;;  %v5696_v5 = vrot.slane %v1823_v7, %v5009_v40  ;;  %v235_v9 = vcombine.high %v5428_v31, %v5428_v31  ;;  %v959_v51 = vrot.slane %v929_v13, %v5023_v46 }
0x22e1   :  { %v2957_v27 = vmul.f32 0.125, %v2956_v35  ;;  %4477 = vmatpush3.bf16.xpose.msra.mxu1 %v3091_v36  ;;  %4496 = vmatprep.subr.bf16.mxu0 %v4717_v0  ;;  %v1391_v40 = vcombine.high %v5445_v29, %v5445_v29 }
0x22e2   :  { %4488 = vmatprep.subr.bf16.mxu1 %v4717_v0  ;;  %v1879_v50 = vrot.slane %v5696_v5, %v5023_v46  ;;  %v265_v11 = vrot.slane %v235_v9, %v5023_v46 }
0x22e3   :  { %v5636_v52 = vsel %vm3930_vm7, %v5484_v39, %v2957_v27  ;;  %v5651_v39 = vld [vmem:[%s5918_s4 + $0x8] sm:$0xff]   ;;  %v1421_v53 = vrot.slane %v1391_v40, %v5023_v46 }
0x22e8   :  { %4479 = vmatmul.mubr.msk.bf16.vlgmr.msra.gmra.mrb[76].mxu1 %vm58_vm1, %v3085_v32  ;;  %v5735_v32 = vld [vmem:[%s5920_s6 + $0x8] sm:$0xff]  }
0x22e9   :  { %4489 = vmatpush3.bf16.msra.mxu1 %v5642_v33  ;;  %4492 = vmatprep.mubr.msk.bf16.mxu1 %vm4718_vm0, %v4717_v0 }
0x22ea   :  { %4490 = vmatprep.subr.bf16.mxu1 %v4717_v0 }
0x22ed   :  { %4491 = vmatpush3.bf16.msra.mxu1 %v5651_v39 }
0x22ee   :  { %4504 = vmatprep.subr.bf16.mxu1 %v4717_v0 }
0x23bb   :  { %v3127_v22 = vpop.f32.mrb[76].mxu1 }
0x23bc   :  { %v4480_v38 = vpop.f32.mrb[77].mxu1  ;;  %v3133_v30 = vsel %vm2163_vm4, %v3127_v22, -inf }
0x23bd   :  { %3134 = vmax.xlane.f32.xlu1 %v3133_v30  ;;  %v3130_v49 = vpop.f32.mrb[78].mxu1 }
0x23be   :  { %v4481_v4 = vpop.f32.mrb[79].mxu1 }
0x23ce   :  { %512 = vrot.lane.b32.xlu1 %v493_v8, %s4721_s3 }
0x23d2   :  { %743 = vrot.lane.b32.xlu1 %v724_v37, %s4721_s3 }
0x23d6   :  { %1205 = vrot.lane.b32.xlu1 %v1186_v14, %s4721_s3 }
0x23da   :  { %1667 = vrot.lane.b32.xlu1 %v1648_v58, %s4721_s3 }
0x244a   :  { %v3135_v57 = vpop.xlane.xlu1 %3134 }
0x244b   :  { %v3136_v25 = vsub.f32 %v3127_v22, %v3135_v57 }
0x244d   :  { %v3137_v16 = vmul.f32 1.442695, %v3136_v25  ;;  %v5751_v25 = vld [vmem:[%s5923_s9] ss:$0 sm:$0xff] }
0x244e   :  { %v513_v15 = vpop.permute.xlu1 %512 }
0x244f   :  { %4692 = vpow2.f32 %v3137_v16  ;;  %531 = vst.msk [vmem:[#allocation2 + $0x29] sm:$0x1] %vm294_vm2, %v513_v15 }
0x2452   :  { %v744_v21 = vpop.permute.xlu1 %743 }
0x2453   :  { %762 = vst.msk [vmem:[#allocation2 + $0x2a] sm:$0x1] %vm294_vm2, %v744_v21 }
0x2456   :  { %v1206_v43 = vpop.permute.xlu1 %1205 }
0x2457   :  { %1224 = vst.msk [vmem:[#allocation2 + $0x2c] sm:$0x1] %vm294_vm2, %v1206_v43 }
0x2459   :  { %v4693_v19 = vpop.eup %4692 }
0x245a   :  { %v1668_v6 = vpop.permute.xlu1 %1667  ;;  %v3139_v2 = vsel %vm2163_vm4, %v4693_v19, 0.0 }
0x245b   :  { %1686 = vst.msk [vmem:[#allocation2 + $0x2e] sm:$0x1] %vm294_vm2, %v1668_v6  ;;  %3140 = vadd.xlane.f32.xlu0 %v3139_v2 }
0x2471   :  { %1898 = vrot.lane.b32.xlu0 %v1879_v50, %s4721_s3 }
0x2475   :  { %282 = vrot.lane.b32.xlu0 %v265_v11, %s4721_s3 }
0x2479   :  { %976 = vrot.lane.b32.xlu0 %v959_v51, %s4721_s3 }
0x247d   :  { %1438 = vrot.lane.b32.xlu0 %v1421_v53, %s4721_s3 }
0x24e8   :  { %v3141_v31 = vpop.xlane.xlu0 %3140 }
0x24e9   :  { %4694 = vrcp.f32 %v3141_v31 }
0x24ec   :  { %v1899_v17 = vpop.permute.xlu0 %1898 }
0x24ed   :  { %1917 = vst.msk [vmem:[#allocation2 + $0x2f] sm:$0x1] %vm294_vm2, %v1899_v17 }
0x24f0   :  { %v283_v63 = vpop.permute.xlu0 %282 }
0x24f1   :  { %301 = vst.msk [vmem:[#allocation2 + $0x30] sm:$0x1] %vm294_vm2, %v283_v63 }
0x24f3   :  { %v4695_v26 = vpop.eup %4694 }
0x24f4   :  { %v3143_v20 = vmul.f32 %v4695_v26, %v4693_v19  ;;  %v977_v35 = vpop.permute.xlu0 %976  ;;  %v3201_v47 = vld [vmem:[#allocation2 + $0x28] sm:$0xff] }
0x24f5   :  { %994 = vst.msk [vmem:[#allocation2 + $0x33] sm:$0x1] %vm294_vm2, %v977_v35  ;;  %v3202_v29 = vpack.c.bf16 %v3201_v47, %v3201_v47 }
0x24f6   :  { %v3144_v36 = vpack.c.bf16 %v3143_v20, %v3143_v20 }
0x24f7   :  { %4493 = vmatmul.mubr.msk.bf16.vlgmr.msra.gmra.mrb[80].mxu1 %vm58_vm1, %v3202_v29 }
0x24f8   :  { %4485 = vmatmul.mubr.msk.bf16.vlgmr.msra.gmra.mrb[80].mxu0 %vm2163_vm4, %v3144_v36  ;;  %v1439_v27 = vpop.permute.xlu0 %1438  ;;  %4505 = vmatpush3.bf16.msra.mxu1 %v5721_v28 }
0x24f9   :  { %1456 = vst.msk [vmem:[#allocation2 + $0x35] sm:$0x1] %vm294_vm2, %v1439_v27  ;;  %4497 = vmatpush3.bf16.msra.mxu0 %v5593_v56  ;;  %4506 = vmatprep.subr.bf16.mxu1 %v4717_v0  ;;  %v467_v27 = vcombine.high %v5505_v42, %v5505_v42 }
0x24fa   :  { %4498 = vmatprep.subr.bf16.mxu0 %v4717_v0  ;;  %4508 = vmatprep.mubr.msk.bf16.mxu1 %vm4718_vm0, %v4717_v0 }
0x24fb   :  { %4500 = vmatprep.mubr.msk.bf16.mxu0 %vm4718_vm0, %v4717_v0 }
0x24fc   :  { %4507 = vmatpush3.bf16.msra.mxu1 %v5735_v32 }
0x24fd   :  { %4499 = vmatpush3.bf16.msra.mxu0 %v5606_v44  ;;  %4518 = vmatprep.subr.bf16.mxu1 %v4717_v0 }
0x24fe   :  { %4512 = vmatprep.subr.bf16.mxu0 %v4717_v0 }
0x24ff   :  { %4509 = vmatmul.mubr.msk.bf16.vlgmr.msra.gmra.mrb[84].mxu1 %vm58_vm1, %v3202_v29 }
0x2500   :  { %4501 = vmatmul.mubr.msk.bf16.vlgmr.msra.gmra.mrb[84].mxu0 %vm58_vm1, %v3202_v29  ;;  %4520 = vmatprep.mubr.msk.bf16.mxu1 %vm4718_vm0, %v4717_v0 }
0x2501   :  { %4514 = vmatprep.mubr.msk.bf16.mxu0 %vm4718_vm0, %v4717_v0 }
0x25ca   :  { %v3240_v22 = vpop.f32.mrb[80].mxu1 }
0x25cb   :  { %v3186_v38 = vpop.f32.mrb[80].mxu0  ;;  %v4494_v30 = vpop.f32.mrb[81].mxu1  ;;  %v3241_v11 = vadd.f32 %v5628_v23, %v3240_v22  ;;  %v497_v22 = vrot.slane %v467_v27, %v5023_v46 }
0x25cc   :  { %v3192_v49 = vsel %vm58_vm1, %v3186_v38, 0.0  ;;  %v4486_v4 = vpop.f32.mrb[81].mxu0  ;;  %v3243_v54 = vpop.f32.mrb[82].mxu1  ;;  %v698_v38 = vcombine.high %v5519_v59, %v5519_v59 }
0x25cd   :  { %v3193_v34 = vrot.slane %v3192_v49, 4  ;;  %v3189_v8 = vpop.f32.mrb[82].mxu0  ;;  %v4495_v41 = vpop.f32.mrb[83].mxu1  ;;  %v3326_v63 = vmul.f32 0.17677669, %v3241_v11  ;;  %v1622_v54 = vcombine.high %v5536_v61, %v5536_v61 }
0x25ce   :  { %v4487_v37 = vpop.f32.mrb[83].mxu0  ;;  %v728_v30 = vrot.slane %v698_v38, %v5023_v46 }
0x25cf   :  { %v3194_v48 = vadd.f32 %v3193_v34, %v3192_v49  ;;  %v3327_v20 = vpack.c.bf16 %v3326_v63, %v3326_v63  ;;  %v1160_v49 = vcombine.high %v5529_v60, %v5529_v60  ;;  %v1652_v42 = vrot.slane %v1622_v54, %v5023_v46 }
0x25d1   :  { %v3195_v14 = vrot.slane %v3194_v48, 2  ;;  %v1190_v4 = vrot.slane %v1160_v49, %v5023_v46 }
0x25d2   :  { %v3320_v58 = vpop.f32.mrb[84].mxu1 }
0x25d3   :  { %v3196_v57 = vadd.f32 %v3195_v14, %v3194_v48  ;;  %v3321_v16 = vadd.f32 %v5751_v25, %v3320_v58  ;;  %v3280_v15 = vpop.f32.mrb[84].mxu0  ;;  %v4510_v21 = vpop.f32.mrb[85].mxu1  ;;  %v1853_v58 = vcombine.high %v5554_v62, %v5554_v62 }
0x25d4   :  { %v3281_v43 = vadd.f32 %v5622_v3, %v3280_v15  ;;  %v4502_v19 = vpop.f32.mrb[85].mxu0  ;;  %v3323_v6 = vpop.f32.mrb[86].mxu1  ;;  %v931_v15 = vcombine.high %v5569_v24, %v5569_v24 }
0x25d5   :  { %v3197_v2 = vrot.slane %v3196_v57, 1  ;;  %v3387_v7 = vpack.c.bf16 %v3321_v16, %v3321_v16  ;;  %v3283_v50 = vpop.f32.mrb[86].mxu0  ;;  %v4511_v9 = vpop.f32.mrb[87].mxu1  ;;  %v1883_v16 = vrot.slane %v1853_v58, %v5023_v46 }
0x25d6   :  { %v3328_v13 = vpack.c.bf16 %v3281_v43, %v3281_v43  ;;  %v4503_v51 = vpop.f32.mrb[87].mxu0  ;;  %v1393_v43 = vcombine.high %v5577_v1, %v5577_v1  ;;  %v963_v19 = vrot.slane %v931_v15, %v5023_v46 }
0x25d7   :  { %v3198_v40 = vadd.f32 %v3197_v2, %v3196_v57  ;;  %v3392_v53 = vsel %vm2180_vm3, %v3387_v7, 0  ;;  %v237_v57 = vcombine.high %v5561_v55, %v5561_v55 }
0x25d8   :  { %v3333_v31 = vsel %vm58_vm1, %v3328_v13, 0  ;;  %4519 = vmatpush3.bf16.msra.mxu1 %v3392_v53  ;;  %v1425_v62 = vrot.slane %v1393_v43, %v5023_v46 }
0x25d9   :  { %v3199_v17 = vmul.f32 0.125, %v3198_v40  ;;  %4513 = vmatpush3.bf16.xpose.msra.mxu0 %v3333_v31  ;;  %4532 = vmatprep.subr.bf16.mxu1 %v4717_v0  ;;  %v269_v21 = vrot.slane %v237_v57, %v5023_v46 }
0x25da   :  { %4524 = vmatprep.subr.bf16.mxu0 %v4717_v0 }
0x25db   :  { %v5762_v26 = vsel %vm2180_vm3, %v5636_v52, %v3199_v17 }
0x25e0   :  { %4515 = vmatmul.mubr.msk.bf16.vlgmr.msra.gmra.mrb[88].mxu0 %vm58_vm1, %v3327_v20 }
0x25e1   :  { %4525 = vmatpush3.bf16.msra.mxu0 %v5642_v33  ;;  %4528 = vmatprep.mubr.msk.bf16.mxu0 %vm4718_vm0, %v4717_v0 }
0x25e2   :  { %4526 = vmatprep.subr.bf16.mxu0 %v4717_v0 }
0x25e5   :  { %4527 = vmatpush3.bf16.msra.mxu0 %v5651_v39 }
0x25e6   :  { %4540 = vmatprep.subr.bf16.mxu0 %v4717_v0 }
0x26b3   :  { %v3369_v35 = vpop.f32.mrb[88].mxu0 }
0x26b4   :  { %v4516_v47 = vpop.f32.mrb[89].mxu0  ;;  %v3375_v29 = vsel %vm2163_vm4, %v3369_v35, -inf }
0x26b5   :  { %3376 = vmax.xlane.f32.xlu1 %v3375_v29  ;;  %v3372_v52 = vpop.f32.mrb[90].mxu0 }
0x26b6   :  { %v4517_v36 = vpop.f32.mrb[91].mxu0 }
0x26c6   :  { %514 = vrot.lane.b32.xlu1 %v497_v22, %s4721_s3 }
0x26ca   :  { %745 = vrot.lane.b32.xlu1 %v728_v30, %s4721_s3 }
0x26ce   :  { %1207 = vrot.lane.b32.xlu1 %v1190_v4, %s4721_s3 }
0x26d2   :  { %1669 = vrot.lane.b32.xlu1 %v1652_v42, %s4721_s3 }
0x2742   :  { %v3377_v59 = vpop.xlane.xlu1 %3376 }
0x2743   :  { %v3378_v34 = vsub.f32 %v3369_v35, %v3377_v59 }
0x2745   :  { %v3379_v8 = vmul.f32 1.442695, %v3378_v34 }
0x2746   :  { %v515_v41 = vpop.permute.xlu1 %514 }
0x2747   :  { %4696 = vpow2.f32 %v3379_v8  ;;  %532 = vst.msk [vmem:[#allocation2 + $0x31] sm:$0x1] %vm294_vm2, %v515_v41 }
0x274a   :  { %v746_v60 = vpop.permute.xlu1 %745 }
0x274b   :  { %763 = vst.msk [vmem:[#allocation2 + $0x32] sm:$0x1] %vm294_vm2, %v746_v60 }
0x274e   :  { %v1208_v37 = vpop.permute.xlu1 %1207 }
0x274f   :  { %1225 = vst.msk [vmem:[#allocation2 + $0x34] sm:$0x1] %vm294_vm2, %v1208_v37 }
0x2751   :  { %v4697_v61 = vpop.eup %4696 }
0x2752   :  { %v1670_v48 = vpop.permute.xlu1 %1669  ;;  %v3381_v14 = vsel %vm2163_vm4, %v4697_v61, 0.0 }
0x2753   :  { %1687 = vst.msk [vmem:[#allocation2 + $0x36] sm:$0x1] %vm294_vm2, %v1670_v48  ;;  %3382 = vadd.xlane.f32.xlu0 %v3381_v14 }
0x2769   :  { %1900 = vrot.lane.b32.xlu0 %v1883_v16, %s4721_s3 }
0x276d   :  { %284 = vrot.lane.b32.xlu0 %v269_v21, %s4721_s3 }
0x2771   :  { %978 = vrot.lane.b32.xlu0 %v963_v19, %s4721_s3 }
0x2775   :  { %1440 = vrot.lane.b32.xlu0 %v1425_v62, %s4721_s3 }
0x27e0   :  { %v3383_v55 = vpop.xlane.xlu0 %3382 }
0x27e1   :  { %4698 = vrcp.f32 %v3383_v55 }
0x27e4   :  { %v1901_v6 = vpop.permute.xlu0 %1900 }
0x27e5   :  { %1918 = vst.msk [vmem:[#allocation2 + $0x37] sm:$0x1] %vm294_vm2, %v1901_v6  ;;  %v469_v6 = vcombine.high %v5659_v45, %v5659_v45 }
0x27e8   :  { %v285_v24 = vpop.permute.xlu0 %284 }
0x27e9   :  { %302 = vst.msk [vmem:[#allocation2 + $0x38] sm:$0x1] %vm294_vm2, %v285_v24  ;;  %v501_v24 = vrot.slane %v469_v6, %v5023_v46 }
0x27eb   :  { %v4699_v2 = vpop.eup %4698 }
0x27ec   :  { %v3385_v7 = vmul.f32 %v4699_v2, %v4697_v61  ;;  %v979_v50 = vpop.permute.xlu0 %978  ;;  %v3443_v1 = vld [vmem:[#allocation2 + $0x30] sm:$0xff] }
0x27ed   :  { %995 = vst.msk [vmem:[#allocation2 + $0x3b] sm:$0x1] %vm294_vm2, %v979_v50  ;;  %v3444_v9 = vpack.c.bf16 %v3443_v1, %v3443_v1 }
0x27ee   :  { %v3386_v11 = vpack.c.bf16 %v3385_v7, %v3385_v7  ;;  %v1624_v7 = vcombine.high %v5682_v18, %v5682_v18 }
0x27ef   :  { %4529 = vmatmul.mubr.msk.bf16.vlgmr.msra.gmra.mrb[92].mxu0 %vm58_vm1, %v3444_v9 }
0x27f0   :  { %v1441_v13 = vpop.permute.xlu0 %1440  ;;  %4521 = vmatmul.mubr.msk.bf16.vlgmr.msra.gmra.mrb[88].mxu1 %vm2163_vm4, %v3386_v11  ;;  %4541 = vmatpush3.bf16.msra.mxu0 %v5721_v28  ;;  %v1656_v45 = vrot.slane %v1624_v7, %v5023_v46 }
0x27f1   :  { %1457 = vst.msk [vmem:[#allocation2 + $0x3d] sm:$0x1] %vm294_vm2, %v1441_v13  ;;  %4533 = vmatpush3.bf16.msra.mxu1 %v5593_v56  ;;  %4542 = vmatprep.subr.bf16.mxu0 %v4717_v0 }
0x27f2   :  { %4534 = vmatprep.subr.bf16.mxu1 %v4717_v0  ;;  %4544 = vmatprep.mubr.msk.bf16.mxu0 %vm4718_vm0, %v4717_v0 }
0x27f3   :  { %4536 = vmatprep.mubr.msk.bf16.mxu1 %vm4718_vm0, %v4717_v0 }
0x27f4   :  { %4543 = vmatpush3.bf16.msra.mxu0 %v5735_v32 }
0x27f5   :  { %4535 = vmatpush3.bf16.msra.mxu1 %v5606_v44  ;;  %4554 = vmatprep.subr.bf16.mxu0 %v4717_v0 }
0x27f6   :  { %4548 = vmatprep.subr.bf16.mxu1 %v4717_v0 }
0x27f7   :  { %4545 = vmatmul.mubr.msk.bf16.vlgmr.msra.gmra.mrb[96].mxu0 %vm58_vm1, %v3444_v9 }
0x27f8   :  { %4537 = vmatmul.mubr.msk.bf16.vlgmr.msra.gmra.mrb[92].mxu1 %vm58_vm1, %v3444_v9  ;;  %4556 = vmatprep.mubr.msk.bf16.mxu0 %vm4718_vm0, %v4717_v0 }
0x27f9   :  { %4550 = vmatprep.mubr.msk.bf16.mxu1 %vm4718_vm0, %v4717_v0 }
0x28c2   :  { %v3482_v51 = vpop.f32.mrb[92].mxu0 }
0x28c3   :  { %v3428_v40 = vpop.f32.mrb[88].mxu1  ;;  %v4530_v53 = vpop.f32.mrb[93].mxu0  ;;  %v3483_v60 = vadd.f32 %v5628_v23, %v3482_v51 }
0x28c4   :  { %v3434_v31 = vsel %vm58_vm1, %v3428_v40, 0.0  ;;  %v4522_v17 = vpop.f32.mrb[89].mxu1  ;;  %v3485_v63 = vpop.f32.mrb[94].mxu0  ;;  %v1855_v53 = vcombine.high %v5696_v5, %v5696_v5 }
0x28c5   :  { %v3435_v20 = vrot.slane %v3434_v31, 4  ;;  %v3431_v35 = vpop.f32.mrb[90].mxu1  ;;  %v4531_v47 = vpop.f32.mrb[95].mxu0  ;;  %v3568_v16 = vmul.f32 0.17677669, %v3483_v60 }
0x28c6   :  { %v4523_v29 = vpop.f32.mrb[91].mxu1 }
0x28c7   :  { %v3436_v52 = vadd.f32 %v3435_v20, %v3434_v31  ;;  %v3569_v21 = vpack.c.bf16 %v3568_v16, %v3568_v16  ;;  %v1887_v31 = vrot.slane %v1855_v53, %v5023_v46 }
0x28c9   :  { %v3437_v36 = vrot.slane %v3436_v52, 2 }
0x28ca   :  { %v3562_v27 = vpop.f32.mrb[96].mxu0 }
0x28cb   :  { %v3438_v22 = vadd.f32 %v3437_v36, %v3436_v52  ;;  %v3563_v38 = vadd.f32 %v5751_v25, %v3562_v27  ;;  %v3522_v30 = vpop.f32.mrb[92].mxu1  ;;  %v4546_v49 = vpop.f32.mrb[97].mxu0 }
0x28cc   :  { %v3523_v4 = vadd.f32 %v5622_v3, %v3522_v30  ;;  %v4538_v54 = vpop.f32.mrb[93].mxu1  ;;  %v3565_v42 = vpop.f32.mrb[98].mxu0 }
0x28cd   :  { %v3439_v59 = vrot.slane %v3438_v22, 1  ;;  %v3629_v34 = vpack.c.bf16 %v3563_v38, %v3563_v38  ;;  %v3525_v8 = vpop.f32.mrb[94].mxu1  ;;  %v4547_v41 = vpop.f32.mrb[99].mxu0 }
0x28ce   :  { %v3570_v37 = vpack.c.bf16 %v3523_v4, %v3523_v4  ;;  %v4539_v61 = vpop.f32.mrb[95].mxu1 }
0x28cf   :  { %v3440_v48 = vadd.f32 %v3439_v59, %v3438_v22  ;;  %v3634_v14 = vsel %vm2180_vm3, %v3629_v34, 0 }
0x28d0   :  { %v3575_v58 = vsel %vm58_vm1, %v3570_v37, 0  ;;  %4555 = vmatpush3.bf16.msra.mxu0 %v3634_v14 }
0x28d1   :  { %v3441_v57 = vmul.f32 0.125, %v3440_v48  ;;  %4549 = vmatpush3.bf16.xpose.msra.mxu1 %v3575_v58  ;;  %4568 = vmatprep.subr.bf16.mxu0 %v4717_v0 }
0x28d2   :  { %4560 = vmatprep.subr.bf16.mxu1 %v4717_v0 }
0x28d3   :  { %v5842_v15 = vsel %vm3933_vm8, %v5762_v26, %v3441_v57 }
0x28d8   :  { %4551 = vmatmul.mubr.msk.bf16.vlgmr.msra.gmra.mrb[96].mxu1 %vm58_vm1, %v3569_v21 }
0x28d9   :  { %4561 = vmatpush3.bf16.msra.mxu1 %v5642_v33  ;;  %4564 = vmatprep.mubr.msk.bf16.mxu1 %vm4718_vm0, %v4717_v0  ;;  %v700_v33 = vcombine.high %v5666_v12, %v5666_v12 }
0x28da   :  { %4562 = vmatprep.subr.bf16.mxu1 %v4717_v0 }
0x28db   :  { %v732_v2 = vrot.slane %v700_v33, %v5023_v46 }
0x28dd   :  { %4563 = vmatpush3.bf16.msra.mxu1 %v5651_v39  ;;  %v1162_v39 = vcombine.high %v5674_v10, %v5674_v10 }
0x28de   :  { %4576 = vmatprep.subr.bf16.mxu1 %v4717_v0 }
0x28df   :  { %v1194_v50 = vrot.slane %v1162_v39, %v5023_v46 }
0x29ab   :  { %v3611_v43 = vpop.f32.mrb[96].mxu1 }
0x29ac   :  { %v4552_v19 = vpop.f32.mrb[97].mxu1  ;;  %v3617_v62 = vsel %vm2163_vm4, %v3611_v43, -inf }
0x29ad   :  { %3618 = vmax.xlane.f32.xlu1 %v3617_v62  ;;  %v3614_v26 = vpop.f32.mrb[98].mxu1 }
0x29ae   :  { %v4553_v55 = vpop.f32.mrb[99].mxu1 }
0x29be   :  { %516 = vrot.lane.b32.xlu1 %v501_v24, %s4721_s3 }
0x29c2   :  { %747 = vrot.lane.b32.xlu1 %v732_v2, %s4721_s3 }
0x29c6   :  { %1209 = vrot.lane.b32.xlu1 %v1194_v50, %s4721_s3 }
0x29ca   :  { %1671 = vrot.lane.b32.xlu1 %v1656_v45, %s4721_s3 }
0x2a3a   :  { %v3619_v12 = vpop.xlane.xlu1 %3618 }
0x2a3b   :  { %v3620_v1 = vsub.f32 %v3611_v43, %v3619_v12 }
0x2a3d   :  { %v3621_v9 = vmul.f32 1.442695, %v3620_v1 }
0x2a3e   :  { %v517_v11 = vpop.permute.xlu1 %516 }
0x2a3f   :  { %4700 = vpow2.f32 %v3621_v9  ;;  %533 = vst.msk [vmem:[#allocation2 + $0x39] sm:$0x1] %vm294_vm2, %v517_v11 }
0x2a42   :  { %v748_v10 = vpop.permute.xlu1 %747 }
0x2a43   :  { %764 = vst.msk [vmem:[#allocation2 + $0x3a] sm:$0x1] %vm294_vm2, %v748_v10 }
0x2a46   :  { %v1210_v13 = vpop.permute.xlu1 %1209 }
0x2a47   :  { %1226 = vst.msk [vmem:[#allocation2 + $0x3c] sm:$0x1] %vm294_vm2, %v1210_v13 }
0x2a49   :  { %v4701_v18 = vpop.eup %4700 }
0x2a4a   :  { %v1672_v51 = vpop.permute.xlu1 %1671  ;;  %v3623_v40 = vsel %vm2163_vm4, %v4701_v18, 0.0 }
0x2a4b   :  { %1688 = vst.msk [vmem:[#allocation2 + $0x3e] sm:$0x1] %vm294_vm2, %v1672_v51  ;;  %3624 = vadd.xlane.f32.xlu0 %v3623_v40 }
0x2a61   :  { %1902 = vrot.lane.b32.xlu0 %v1887_v31, %s4721_s3 }
0x2ad8   :  { %v3625_v17 = vpop.xlane.xlu0 %3624 }
0x2ad9   :  { %4702 = vrcp.f32 %v3625_v17 }
0x2adc   :  { %v1903_v63 = vpop.permute.xlu0 %1902 }
0x2add   :  { %1919 = vst.msk [vmem:[#allocation2 + $0x3f] sm:$0x1] %vm294_vm2, %v1903_v63 }
0x2ae3   :  { %v4703_v20 = vpop.eup %4702 }
0x2ae4   :  { %v3627_v35 = vmul.f32 %v4703_v20, %v4701_v18  ;;  %v3685_v47 = vld [vmem:[#allocation2 + $0x38] sm:$0xff] }
0x2ae5   :  { %v3686_v29 = vpack.c.bf16 %v3685_v47, %v3685_v47 }
0x2ae6   :  { %v3628_v52 = vpack.c.bf16 %v3627_v35, %v3627_v35 }
0x2ae7   :  { %4565 = vmatmul.mubr.msk.bf16.vlgmr.msra.gmra.mrb[100].mxu1 %vm58_vm1, %v3686_v29 }
0x2ae8   :  { %4557 = vmatmul.mubr.msk.bf16.vlgmr.msra.gmra.mrb[100].mxu0 %vm2163_vm4, %v3628_v52  ;;  %4577 = vmatpush3.bf16.msra.mxu1 %v5721_v28 }
0x2ae9   :  { %4569 = vmatpush3.bf16.msra.mxu0 %v5593_v56  ;;  %4578 = vmatprep.subr.bf16.mxu1 %v4717_v0 }
0x2aea   :  { %4570 = vmatprep.subr.bf16.mxu0 %v4717_v0  ;;  %4580 = vmatprep.mubr.msk.bf16.mxu1 %vm4718_vm0, %v4717_v0 }
0x2aeb   :  { %4572 = vmatprep.mubr.msk.bf16.mxu0 %vm4718_vm0, %v4717_v0 }
0x2aec   :  { %4579 = vmatpush3.bf16.msra.mxu1 %v5735_v32 }
0x2aed   :  { %4571 = vmatpush3.bf16.msra.mxu0 %v5606_v44  ;;  %4590 = vmatprep.subr.bf16.mxu1 %v4717_v0 }
0x2aee   :  { %4584 = vmatprep.subr.bf16.mxu0 %v4717_v0 }
0x2aef   :  { %4581 = vmatmul.mubr.msk.bf16.vlgmr.msra.gmra.mrb[104].mxu1 %vm58_vm1, %v3686_v29 }
0x2af0   :  { %4573 = vmatmul.mubr.msk.bf16.vlgmr.msra.gmra.mrb[104].mxu0 %vm58_vm1, %v3686_v29  ;;  %4592 = vmatprep.mubr.msk.bf16.mxu1 %vm4718_vm0, %v4717_v0 }
0x2af1   :  { %4586 = vmatprep.mubr.msk.bf16.mxu0 %vm4718_vm0, %v4717_v0 }
0x2bba   :  { %v3724_v46 = vpop.f32.mrb[100].mxu1 }
0x2bbb   :  { %v3670_v56 = vpop.f32.mrb[100].mxu0  ;;  %v4566_v5 = vpop.f32.mrb[101].mxu1  ;;  %v3725_v14 = vadd.f32 %v5628_v23, %v3724_v46 }
0x2bbc   :  { %v3676_v28 = vsel %vm58_vm1, %v3670_v56, 0.0  ;;  %v4558_v44 = vpop.f32.mrb[101].mxu0  ;;  %v3727_v32 = vpop.f32.mrb[102].mxu1 }
0x2bbd   :  { %v3677_v36 = vrot.slane %v3676_v28, 4  ;;  %v3673_v27 = vpop.f32.mrb[102].mxu0  ;;  %v4567_v22 = vpop.f32.mrb[103].mxu1 }
0x2bbe   :  { %v4559_v38 = vpop.f32.mrb[103].mxu0 }
0x2bbf   :  { %v3678_v30 = vadd.f32 %v3677_v36, %v3676_v28 }
0x2bc1   :  { %v3679_v49 = vrot.slane %v3678_v30, 2 }
0x2bc2   :  { %v3804_v4 = vpop.f32.mrb[104].mxu1 }
0x2bc3   :  { %v3680_v54 = vadd.f32 %v3679_v49, %v3678_v30  ;;  %v3805_v42 = vadd.f32 %v5751_v25, %v3804_v4  ;;  %v3764_v59 = vpop.f32.mrb[104].mxu0  ;;  %v4582_v34 = vpop.f32.mrb[105].mxu1 }
0x2bc4   :  { %v3765_v0 = vadd.f32 %v5622_v3, %v3764_v59  ;;  %v4574_v8 = vpop.f32.mrb[105].mxu0  ;;  %v3807_v41 = vpop.f32.mrb[106].mxu1  ;;  %v3810_v3 = vmul.f32 0.17677669, %v3725_v14 }
0x2bc5   :  { %v3681_v60 = vrot.slane %v3680_v54, 1  ;;  %v3871_v37 = vpack.c.bf16 %v3805_v42, %v3805_v42  ;;  %v3767_v61 = vpop.f32.mrb[106].mxu0  ;;  %v4583_v48 = vpop.f32.mrb[107].mxu1 }
0x2bc6   :  { %v3812_v58 = vpack.c.bf16 %v3765_v0, %v3765_v0  ;;  %v4575_v57 = vpop.f32.mrb[107].mxu0  ;;  %v3811_v62 = vpack.c.bf16 %v3810_v3, %v3810_v3 }
0x2bc7   :  { %v3682_v16 = vadd.f32 %v3681_v60, %v3680_v54  ;;  %v3876_v21 = vsel %vm2180_vm3, %v3871_v37, 0 }
0x2bc8   :  { %v3817_v25 = vsel %vm58_vm1, %v3812_v58, 0  ;;  %4591 = vmatpush3.bf16.msra.mxu1 %v3876_v21 }
0x2bc9   :  { %v3683_v43 = vmul.f32 0.125, %v3682_v16  ;;  %4585 = vmatpush3.bf16.xpose.msra.mxu0 %v3817_v25 }
0x2bcb   :  { %v3936_v19 = vsel %vm3935_vm9, %v5842_v15, %v3683_v43 }
0x2bd0   :  { %4587 = vmatmul.mubr.msk.bf16.vlgmr.msra.gmra.mrb[108].mxu0 %vm58_vm1, %v3811_v62 }
0x2ca3   :  { %v3853_v26 = vpop.f32.mrb[108].mxu0 }
0x2ca4   :  { %v4588_v55 = vpop.f32.mrb[109].mxu0  ;;  %v3859_v23 = vsel %vm2163_vm4, %v3853_v26, -inf }
0x2ca5   :  { %3860 = vmax.xlane.f32.xlu1 %v3859_v23  ;;  %v3856_v6 = vpop.f32.mrb[110].mxu0 }
0x2ca6   :  { %v4589_v33 = vpop.f32.mrb[111].mxu0 }
0x2d32   :  { %v3861_v24 = vpop.xlane.xlu1 %3860 }
0x2d33   :  { %v3862_v39 = vsub.f32 %v3853_v26, %v3861_v24 }
0x2d35   :  { %v3863_v2 = vmul.f32 1.442695, %v3862_v39 }
0x2d37   :  { %4704 = vpow2.f32 %v3863_v2 }
0x2d41   :  { %v4705_v7 = vpop.eup %4704 }
0x2d42   :  { %v3865_v50 = vsel %vm2163_vm4, %v4705_v7, 0.0 }
0x2d43   :  { %3866 = vadd.xlane.f32.xlu0 %v3865_v50 }
0x2dd0   :  { %v3867_v45 = vpop.xlane.xlu0 %3866 }
0x2dd1   :  { %4706 = vrcp.f32 %v3867_v45 }
0x2ddb   :  { %v4707_v15 = vpop.eup %4706 }
0x2ddc   :  { %v3869_v12 = vmul.f32 %v4707_v15, %v4705_v7 }
0x2dde   :  { %v3870_v1 = vpack.c.bf16 %v3869_v12, %v3869_v12 }
0x2de0   :  { %4593 = vmatmul.mubr.msk.bf16.vlgmr.msra.gmra.mrb[108].mxu1 %vm2163_vm4, %v3870_v1 }
0x2eb3   :  { %v3912_v9 = vpop.f32.mrb[108].mxu1 }
0x2eb4   :  { %v3918_v11 = vsel %vm58_vm1, %v3912_v9, 0.0  ;;  %v4594_v10 = vpop.f32.mrb[109].mxu1 }
0x2eb5   :  { %v3919_v13 = vrot.slane %v3918_v11, 4  ;;  %v3915_v18 = vpop.f32.mrb[110].mxu1 }
0x2eb6   :  { %v4595_v51 = vpop.f32.mrb[111].mxu1 }
0x2eb7   :  { %v3920_v40 = vadd.f32 %v3919_v13, %v3918_v11 }
0x2eb9   :  { %v3921_v53 = vrot.slane %v3920_v40, 2 }
0x2ebb   :  { %v3922_v31 = vadd.f32 %v3921_v53, %v3920_v40 }
0x2ebd   :  { %v3923_v17 = vrot.slane %v3922_v31, 1 }
0x2ebf   :  { %v3924_v63 = vadd.f32 %v3923_v17, %v3922_v31 }
0x2ec1   :  { %v3925_v20 = vmul.f32 0.125, %v3924_v63 }
0x2ec3   :  { %v3938_v35 = vsel %vm3937_vm10, %v3936_v19, %v3925_v20 }
0x2ec4   :  { %3939 = vst.msk [vmem:[%s5924_s10] sm:$0xff] %vm58_vm1, %v3938_v35 }

</bundles_post_ra>
